<compile_context>
chip_gen: v5e
topology: v5e:2x2
jax: 0.10.0
libtpu: 0.0.40
codegen_flags: <defaults>
</compile_context>

<pallas_src>
import functools
import math

import jax
import jax.numpy as jnp
from jax.experimental import pallas as pl


def _sigmoid(x):
    return 1.0 / (1.0 + jnp.exp(-x))


# ---------------- fused bidirectional LSTM layer (one pallas_call per layer) ----
def _bilstm_layer_kernel(x_ref, wih_ref, whh_ref, b_ref, out_ref,
                         *, L, Bc, H, final_only):
    """One bidirectional LSTM layer, both directions fused, time loop unrolled.

    x_ref   : (L*Bc, Din)  time-major rows (row t*Bc + b  <->  timestep t, batch b)
    wih_ref : (Din, 8H)    [ fwd i f g o | bwd i f g o ]   fused input projection
    whh_ref : (2H, 8H)     block-diagonal recurrent weights (fwd block | bwd block)
    b_ref   : (1, 8H)      b_ih + b_hh for both directions
    out_ref : (L, Bc, 2H)  full sequence   if not final_only
              (Bc, 2H)     [bwd_final | fwd_final]  if final_only
    """
    H4 = 4 * H
    # Hoisted input projection: ONE big MXU matmul for all timesteps, bias folded in.
    gx = (jnp.dot(x_ref[...], wih_ref[...], preferred_element_type=jnp.float32)
          + b_ref[...])                                             # (L*Bc, 8H)
    whh = whh_ref[...]
    h = jnp.zeros((Bc, 2 * H), jnp.float32)                         # [h_fwd | h_bwd]
    c_f = jnp.zeros((Bc, H), jnp.float32)
    c_b = jnp.zeros((Bc, H), jnp.float32)

    # Static unroll: L is small and fixed, so all slices below are static and the
    # scheduler can overlap step t+1's MXU push with step t's gate math.
    # TODO(synk): for realistic L/B/H, block over time chunks (grid over L) and
    # keep x in HBM with double-buffered DMA instead of whole-array residency.
    for s in range(L):
        t, rt = s, L - 1 - s
        rec = jnp.dot(h, whh, preferred_element_type=jnp.float32)   # (Bc, 8H)
        g_f = gx[t * Bc:(t + 1) * Bc, :H4] + rec[:, :H4]            # fwd reads time t
        g_b = gx[rt * Bc:(rt + 1) * Bc, H4:] + rec[:, H4:]          # bwd reads time rt
        # PyTorch gate order: i, f, g, o
        i_f = _sigmoid(g_f[:, 0 * H:1 * H]); i_b = _sigmoid(g_b[:, 0 * H:1 * H])
        f_f = _sigmoid(g_f[:, 1 * H:2 * H]); f_b = _sigmoid(g_b[:, 1 * H:2 * H])
        gg_f = jnp.tanh(g_f[:, 2 * H:3 * H]); gg_b = jnp.tanh(g_b[:, 2 * H:3 * H])
        o_f = _sigmoid(g_f[:, 3 * H:4 * H]); o_b = _sigmoid(g_b[:, 3 * H:4 * H])
        c_f = f_f * c_f + i_f * gg_f
        c_b = f_b * c_b + i_b * gg_b
        h_f = o_f * jnp.tanh(c_f)
        h_b = o_b * jnp.tanh(c_b)
        h = jnp.concatenate([h_f, h_b], axis=-1)
        if not final_only:
            out_ref[t, :, 0:H] = h_f                                # fwd hidden @ t
            out_ref[rt, :, H:2 * H] = h_b                           # bwd hidden @ rt
    if final_only:
        # torch: cat([out[:, 0, -H:], out[:, -1, :H]], 1) == [bwd_final | fwd_final]
        out_ref[:, 0:H] = h[:, H:]
        out_ref[:, H:2 * H] = h[:, :H]


def _bilstm_layer(x2d, wih, whh, b, *, L, Bc, H, final_only):
    out_shape = (Bc, 2 * H) if final_only else (L, Bc, 2 * H)
    return pl.pallas_call(
        functools.partial(_bilstm_layer_kernel, L=L, Bc=Bc, H=H,
                          final_only=final_only),
        out_shape=jax.ShapeDtypeStruct(out_shape, jnp.float32),
    )(x2d, wih, whh, b)


def bilstm_features(x_bm, layers, H):
    """Mirror of nn.LSTM(..., bidirectional=True, batch_first=True) in eval mode,
    returning cat([y[:, 0, H:], y[:, -1, :H]], 1).  x_bm: (B', L, Din) -> (B', 2H)."""
    Bc, L, _ = x_bm.shape
    x2d = jnp.transpose(x_bm, (1, 0, 2)).reshape(L * Bc, -1)        # time-major rows
    n = len(layers)
    out = None
    for li, (wih, whh, b) in enumerate(layers):
        final_only = (li == n - 1)
        out = _bilstm_layer(x2d, wih, whh, b, L=L, Bc=Bc, H=H, final_only=final_only)
        if not final_only:
            x2d = out.reshape(L * Bc, 2 * H)                        # feed next layer
    return out                                                      # (B', 2H)


# ------------- fused head: linear0 + sf_attention + MaxPool1d + linear1 + cat ---
def _head_kernel(cls_ref, v_ref, w0_ref, b0_ref, w1_ref, b1_ref,
                 wv_ref, lw_ref, lb_ref, out_ref, *, B, H):
    # linear0 on the CodeBERT [CLS] vector: Linear + ReLU + Linear + ReLU
    h0 = jnp.maximum(
        jnp.dot(cls_ref[...], w0_ref[...], preferred_element_type=jnp.float32)
        + b0_ref[...], 0.0)
    cb = jnp.maximum(
        jnp.dot(h0, w1_ref[...], preferred_element_type=jnp.float32)
        + b1_ref[...], 0.0)                                         # (B, H)
    # sf_attention on a length-1 sequence: softmax over one key is identically 1,
    # so the output is exactly V = v @ W_v (W_Q / W_K contribute nothing).
    # W_v columns are pre-permuted so MaxPool1d(2,2) == max of the two halves.
    ctx = jnp.dot(v_ref[...], wv_ref[...], preferred_element_type=jnp.float32)  # (2B, 2H)
    pooled = jnp.maximum(ctx[:, :H], ctx[:, H:])                    # (2B, H)
    sf = jnp.maximum(
        jnp.dot(pooled, lw_ref[...], preferred_element_type=jnp.float32)
        + lb_ref[...], 0.0)                                         # (2B, H)
    out_ref[:, 0:H] = cb                                            # codebert branch
    out_ref[:, H:2 * H] = sf[:B, :]                                 # branch 1
    out_ref[:, 2 * H:3 * H] = sf[B:, :]                             # branch 2


def head(cls, v, p, H):
    B = cls.shape[0]
    return pl.pallas_call(
        functools.partial(_head_kernel, B=B, H=H),
        out_shape=jax.ShapeDtypeStruct((B, 3 * H), jnp.float32),
    )(cls, v, p['l0_w0T'], p['l0_b0'], p['l0_w1T'], p['l0_b1'],
      p['wv_permT'], p['l1_wT'], p['l1_b'])


# --------------------------------- forward -------------------------------------
def codebert_blstm_forward(s, x1, x2, params, H):
    B = s.shape[0]
    # ---- CodeBERT branch ----
    # TODO(synk): the pretrained 12-layer RoBERTa ('microsoft/codebert-base')
    # forward is not reproduced; a deterministic token-embedding table stands in
    # for codebert(s)[0][:, 0, :] (the [CLS] vector).
    cls = params['cb_table'][s[:, 0]]                               # (B, cb_embed)

    # ---- BiLSTM branches (identical LSTM weights) -> batched together ----
    emb1 = params['emb'][x1]                                        # (B, L1, E)
    if emb1.shape[1] == x2.shape[1]:
        v = bilstm_features(jnp.concatenate([emb1, x2], axis=0),
                            params['lstm'], H)                      # (2B, 2H)
    else:
        v = jnp.concatenate([bilstm_features(emb1, params['lstm'], H),
                             bilstm_features(x2, params['lstm'], H)], axis=0)

    # NOTE: the reference forward uses sf_atten_out1 before assigning it; the
    # evident intent (mirroring the x2 branch) is sf_attention(out1) -> linear1.
    return head(cls, v, params, H)                                  # (B, 3H)


# ------------------------------ parameter init ----------------------------------
def init_params(key, *, n_vocab, embed, H, num_layers, cb_embed, cb_vocab):
    def uni(k, shape, fan_in):
        sc = 1.0 / math.sqrt(fan_in)
        return jax.random.uniform(k, shape, jnp.float32, minval=-sc, maxval=sc)

    keys = iter(jax.random.split(key, 64))
    p = {}
    emb = 0.1 * jax.random.normal(next(keys), (n_vocab, embed), jnp.float32)
    p['emb'] = emb.at[0].set(0.0)                                   # padding_idx=0
    p['cb_table'] = 0.1 * jax.random.normal(next(keys), (cb_vocab, cb_embed),
                                            jnp.float32)

    layers = []
    for layer in range(num_layers):
        din = embed if layer == 0 else 2 * H
        wih_f = uni(next(keys), (din, 4 * H), H)                    # W_ih^T fwd
        wih_b = uni(next(keys), (din, 4 * H), H)                    # W_ih^T bwd
        whh_f = uni(next(keys), (H, 4 * H), H)                      # W_hh^T fwd
        whh_b = uni(next(keys), (H, 4 * H), H)                      # W_hh^T bwd
        b_f = uni(next(keys), (1, 4 * H), H)                        # b_ih + b_hh fwd
        b_b = uni(next(keys), (1, 4 * H), H)                        # b_ih + b_hh bwd
        wih_fb = jnp.concatenate([wih_f, wih_b], axis=1)            # (din, 8H)
        whh_bd = jnp.zeros((2 * H, 8 * H), jnp.float32)
        whh_bd = whh_bd.at[:H, :4 * H].set(whh_f).at[H:, 4 * H:].set(whh_b)
        b_fb = jnp.concatenate([b_f, b_b], axis=1)                  # (1, 8H)
        layers.append((wih_fb, whh_bd, b_fb))
    p['lstm'] = layers

    # sf_attention is only ever applied to length-1 sequences, where it reduces
    # exactly to x @ W_v, so W_Q / W_K are not materialized.  W_v's output
    # columns are pre-permuted [0,2,4,... | 1,3,5,...] so that MaxPool1d(2,2)
    # over the feature axis becomes max of two contiguous halves in-kernel.
    wvT = uni(next(keys), (2 * H, 2 * H), 2 * H)
    perm = jnp.concatenate([jnp.arange(0, 2 * H, 2), jnp.arange(1, 2 * H, 2)])
    p['wv_permT'] = wvT[:, perm]

    p['l0_w0T'] = uni(next(keys), (cb_embed, 2 * H), cb_embed)
    p['l0_b0'] = uni(next(keys), (1, 2 * H), cb_embed)
    p['l0_w1T'] = uni(next(keys), (2 * H, H), 2 * H)
    p['l0_b1'] = uni(next(keys), (1, H), 2 * H)

    p['l1_wT'] = uni(next(keys), (H, H), H)
    p['l1_b'] = uni(next(keys), (1, H), H)
    return p


if __name__ == "__main__":
    # small shapes consistent with the module's forward
    B, S, L1, L2 = 2, 6, 8, 8
    n_vocab, embed, H, num_layers = 50, 16, 32, 2
    cb_embed, cb_vocab = 48, 40
    # (num_heads / num_classes / dropout are unused by this forward pass)

    key = jax.random.PRNGKey(0)
    kp, ks, kx1, kx2 = jax.random.split(key, 4)
    params = init_params(kp, n_vocab=n_vocab, embed=embed, H=H,
                         num_layers=num_layers, cb_embed=cb_embed,
                         cb_vocab=cb_vocab)

    s = jax.random.randint(ks, (B, S), 1, cb_vocab, dtype=jnp.int32)
    x1 = jax.random.randint(kx1, (B, L1), 1, n_vocab, dtype=jnp.int32)
    x2 = jax.random.normal(kx2, (B, L2, embed), jnp.float32)

    fwd = jax.jit(lambda s_, x1_, x2_, p_: codebert_blstm_forward(s_, x1_, x2_, p_, H))
    out = jax.block_until_ready(fwd(s, x1, x2, params))
    assert out.shape == (B, 3 * H), out.shape
    assert bool(jnp.all(jnp.isfinite(out)))
    print("KERNEL_OK")
</pallas_src>

<mosaic_0001>
module attributes {stable_mosaic.version = 11 : i64} {
  func.func @_bilstm_layer_kernel(%arg0: memref<32x16xf32, #tpu.memory_space<vmem>>, %arg1: memref<16x256xf32, #tpu.memory_space<vmem>>, %arg2: memref<64x256xf32, #tpu.memory_space<vmem>>, %arg3: memref<1x256xf32, #tpu.memory_space<vmem>>, %arg4: memref<8x4x64xf32, #tpu.memory_space<vmem>>) attributes {dimension_semantics = [], scalar_prefetch = 0 : i64, scratch_operands = 0 : i64, tpu.core_type = #tpu.core_type<tc>} {
    %c0 = arith.constant 0 : index
    %c0_0 = arith.constant 0 : index
    %0 = vector.load %arg0[%c0, %c0_0] : memref<32x16xf32, #tpu.memory_space<vmem>>, vector<32x16xf32>
    %c0_1 = arith.constant 0 : index
    %c0_2 = arith.constant 0 : index
    %1 = vector.load %arg1[%c0_1, %c0_2] : memref<16x256xf32, #tpu.memory_space<vmem>>, vector<16x256xf32>
    %cst = arith.constant dense<0.000000e+00> : vector<32x256xf32>
    %2 = tpu.matmul %0, %1, %cst {dimension_numbers = #tpu.dot_dimension_numbers<[1], [0], [0], [1], [0, 0, 1, 1], [], []>} : vector<32x16xf32>, vector<16x256xf32>, vector<32x256xf32> -> vector<32x256xf32>
    %c0_3 = arith.constant 0 : index
    %c0_4 = arith.constant 0 : index
    %3 = vector.load %arg3[%c0_3, %c0_4] : memref<1x256xf32, #tpu.memory_space<vmem>>, vector<1x256xf32>
    %4 = vector.broadcast %3 : vector<1x256xf32> to vector<32x256xf32>
    %5 = arith.addf %2, %4 : vector<32x256xf32>
    %c0_5 = arith.constant 0 : index
    %c0_6 = arith.constant 0 : index
    %6 = vector.load %arg2[%c0_5, %c0_6] : memref<64x256xf32, #tpu.memory_space<vmem>>, vector<64x256xf32>
    %cst_7 = arith.constant 0.000000e+00 : f32
    %7 = vector.broadcast %cst_7 : f32 to vector<4x64xf32>
    %cst_8 = arith.constant 0.000000e+00 : f32
    %8 = vector.broadcast %cst_8 : f32 to vector<4x32xf32>
    %cst_9 = arith.constant 0.000000e+00 : f32
    %9 = vector.broadcast %cst_9 : f32 to vector<4x32xf32>
    %cst_10 = arith.constant dense<0.000000e+00> : vector<4x256xf32>
    %10 = tpu.matmul %7, %6, %cst_10 {dimension_numbers = #tpu.dot_dimension_numbers<[1], [0], [0], [1], [0, 0, 1, 1], [], []>} : vector<4x64xf32>, vector<64x256xf32>, vector<4x256xf32> -> vector<4x256xf32>
    %11 = vector.extract_strided_slice %5 {offsets = [0, 0], sizes = [4, 128], strides = [1, 1]} : vector<32x256xf32> to vector<4x128xf32>
    %12 = vector.extract_strided_slice %10 {offsets = [0, 0], sizes = [4, 128], strides = [1, 1]} : vector<4x256xf32> to vector<4x128xf32>
    %13 = arith.addf %11, %12 : vector<4x128xf32>
    %14 = vector.extract_strided_slice %5 {offsets = [28, 128], sizes = [4, 128], strides = [1, 1]} : vector<32x256xf32> to vector<4x128xf32>
    %15 = vector.extract_strided_slice %10 {offsets = [0, 128], sizes = [4, 128], strides = [1, 1]} : vector<4x256xf32> to vector<4x128xf32>
    %16 = arith.addf %14, %15 : vector<4x128xf32>
    %17 = vector.extract_strided_slice %13 {offsets = [0, 0], sizes = [4, 32], strides = [1, 1]} : vector<4x128xf32> to vector<4x32xf32>
    %cst_11 = arith.constant 0.000000e+00 : f32
    %18 = vector.broadcast %cst_11 : f32 to vector<4x32xf32>
    %19 = arith.subf %18, %17 : vector<4x32xf32>
    %20 = math.exp %19 : vector<4x32xf32>
    %cst_12 = arith.constant 1.000000e+00 : f32
    %21 = vector.broadcast %cst_12 : f32 to vector<4x32xf32>
    %22 = arith.addf %21, %20 : vector<4x32xf32>
    %cst_13 = arith.constant 1.000000e+00 : f32
    %23 = vector.broadcast %cst_13 : f32 to vector<4x32xf32>
    %24 = arith.divf %23, %22 : vector<4x32xf32>
    %25 = vector.extract_strided_slice %16 {offsets = [0, 0], sizes = [4, 32], strides = [1, 1]} : vector<4x128xf32> to vector<4x32xf32>
    %cst_14 = arith.constant 0.000000e+00 : f32
    %26 = vector.broadcast %cst_14 : f32 to vector<4x32xf32>
    %27 = arith.subf %26, %25 : vector<4x32xf32>
    %28 = math.exp %27 : vector<4x32xf32>
    %cst_15 = arith.constant 1.000000e+00 : f32
    %29 = vector.broadcast %cst_15 : f32 to vector<4x32xf32>
    %30 = arith.addf %29, %28 : vector<4x32xf32>
    %cst_16 = arith.constant 1.000000e+00 : f32
    %31 = vector.broadcast %cst_16 : f32 to vector<4x32xf32>
    %32 = arith.divf %31, %30 : vector<4x32xf32>
    %33 = vector.extract_strided_slice %13 {offsets = [0, 32], sizes = [4, 32], strides = [1, 1]} : vector<4x128xf32> to vector<4x32xf32>
    %cst_17 = arith.constant 0.000000e+00 : f32
    %34 = vector.broadcast %cst_17 : f32 to vector<4x32xf32>
    %35 = arith.subf %34, %33 : vector<4x32xf32>
    %36 = math.exp %35 : vector<4x32xf32>
    %cst_18 = arith.constant 1.000000e+00 : f32
    %37 = vector.broadcast %cst_18 : f32 to vector<4x32xf32>
    %38 = arith.addf %37, %36 : vector<4x32xf32>
    %cst_19 = arith.constant 1.000000e+00 : f32
    %39 = vector.broadcast %cst_19 : f32 to vector<4x32xf32>
    %40 = arith.divf %39, %38 : vector<4x32xf32>
    %41 = vector.extract_strided_slice %16 {offsets = [0, 32], sizes = [4, 32], strides = [1, 1]} : vector<4x128xf32> to vector<4x32xf32>
    %cst_20 = arith.constant 0.000000e+00 : f32
    %42 = vector.broadcast %cst_20 : f32 to vector<4x32xf32>
    %43 = arith.subf %42, %41 : vector<4x32xf32>
    %44 = math.exp %43 : vector<4x32xf32>
    %cst_21 = arith.constant 1.000000e+00 : f32
    %45 = vector.broadcast %cst_21 : f32 to vector<4x32xf32>
    %46 = arith.addf %45, %44 : vector<4x32xf32>
    %cst_22 = arith.constant 1.000000e+00 : f32
    %47 = vector.broadcast %cst_22 : f32 to vector<4x32xf32>
    %48 = arith.divf %47, %46 : vector<4x32xf32>
    %49 = vector.extract_strided_slice %13 {offsets = [0, 64], sizes = [4, 32], strides = [1, 1]} : vector<4x128xf32> to vector<4x32xf32>
    %50 = math.tanh %49 : vector<4x32xf32>
    %51 = vector.extract_strided_slice %16 {offsets = [0, 64], sizes = [4, 32], strides = [1, 1]} : vector<4x128xf32> to vector<4x32xf32>
    %52 = math.tanh %51 : vector<4x32xf32>
    %53 = vector.extract_strided_slice %13 {offsets = [0, 96], sizes = [4, 32], strides = [1, 1]} : vector<4x128xf32> to vector<4x32xf32>
    %cst_23 = arith.constant 0.000000e+00 : f32
    %54 = vector.broadcast %cst_23 : f32 to vector<4x32xf32>
    %55 = arith.subf %54, %53 : vector<4x32xf32>
    %56 = math.exp %55 : vector<4x32xf32>
    %cst_24 = arith.constant 1.000000e+00 : f32
    %57 = vector.broadcast %cst_24 : f32 to vector<4x32xf32>
    %58 = arith.addf %57, %56 : vector<4x32xf32>
    %cst_25 = arith.constant 1.000000e+00 : f32
    %59 = vector.broadcast %cst_25 : f32 to vector<4x32xf32>
    %60 = arith.divf %59, %58 : vector<4x32xf32>
    %61 = vector.extract_strided_slice %16 {offsets = [0, 96], sizes = [4, 32], strides = [1, 1]} : vector<4x128xf32> to vector<4x32xf32>
    %cst_26 = arith.constant 0.000000e+00 : f32
    %62 = vector.broadcast %cst_26 : f32 to vector<4x32xf32>
    %63 = arith.subf %62, %61 : vector<4x32xf32>
    %64 = math.exp %63 : vector<4x32xf32>
    %cst_27 = arith.constant 1.000000e+00 : f32
    %65 = vector.broadcast %cst_27 : f32 to vector<4x32xf32>
    %66 = arith.addf %65, %64 : vector<4x32xf32>
    %cst_28 = arith.constant 1.000000e+00 : f32
    %67 = vector.broadcast %cst_28 : f32 to vector<4x32xf32>
    %68 = arith.divf %67, %66 : vector<4x32xf32>
    %69 = arith.mulf %40, %8 : vector<4x32xf32>
    %70 = arith.mulf %24, %50 : vector<4x32xf32>
    %71 = arith.addf %69, %70 : vector<4x32xf32>
    %72 = arith.mulf %48, %9 : vector<4x32xf32>
    %73 = arith.mulf %32, %52 : vector<4x32xf32>
    %74 = arith.addf %72, %73 : vector<4x32xf32>
    %75 = math.tanh %71 : vector<4x32xf32>
    %76 = arith.mulf %60, %75 : vector<4x32xf32>
    %77 = math.tanh %74 : vector<4x32xf32>
    %78 = arith.mulf %68, %77 : vector<4x32xf32>
    %79 = tpu.concatenate %76, %78 in 1 : vector<4x32xf32>, vector<4x32xf32> -> vector<4x64xf32>
    %c0_29 = arith.constant 0 : index
    %c0_30 = arith.constant 0 : index
    %c0_31 = arith.constant 0 : index
    %80 = vector.load %arg4[%c0_29, %c0_30, %c0_31] : memref<8x4x64xf32, #tpu.memory_space<vmem>>, vector<1x4x32xf32>
    %81 = vector.shape_cast %80 : vector<1x4x32xf32> to vector<4x32xf32>
    %82 = vector.shape_cast %76 : vector<4x32xf32> to vector<1x4x32xf32>
    tpu.vector_store %arg4[%c0_29, %c0_30, %c0_31], %82 {strides = array<i32>} : memref<8x4x64xf32, #tpu.memory_space<vmem>>, vector<1x4x32xf32>,
    %c7 = arith.constant 7 : index
    %c0_32 = arith.constant 0 : index
    %c32 = arith.constant 32 : index
    %83 = vector.load %arg4[%c7, %c0_32, %c32] : memref<8x4x64xf32, #tpu.memory_space<vmem>>, vector<1x4x32xf32>
    %84 = vector.shape_cast %83 : vector<1x4x32xf32> to vector<4x32xf32>
    %85 = vector.shape_cast %78 : vector<4x32xf32> to vector<1x4x32xf32>
    tpu.vector_store %arg4[%c7, %c0_32, %c32], %85 {strides = array<i32>} : memref<8x4x64xf32, #tpu.memory_space<vmem>>, vector<1x4x32xf32>,
    %cst_33 = arith.constant dense<0.000000e+00> : vector<4x256xf32>
    %86 = tpu.matmul %79, %6, %cst_33 {dimension_numbers = #tpu.dot_dimension_numbers<[1], [0], [0], [1], [0, 0, 1, 1], [], []>} : vector<4x64xf32>, vector<64x256xf32>, vector<4x256xf32> -> vector<4x256xf32>
    %87 = vector.extract_strided_slice %5 {offsets = [4, 0], sizes = [4, 128], strides = [1, 1]} : vector<32x256xf32> to vector<4x128xf32>
    %88 = vector.extract_strided_slice %86 {offsets = [0, 0], sizes = [4, 128], strides = [1, 1]} : vector<4x256xf32> to vector<4x128xf32>
    %89 = arith.addf %87, %88 : vector<4x128xf32>
    %90 = vector.extract_strided_slice %5 {offsets = [24, 128], sizes = [4, 128], strides = [1, 1]} : vector<32x256xf32> to vector<4x128xf32>
    %91 = vector.extract_strided_slice %86 {offsets = [0, 128], sizes = [4, 128], strides = [1, 1]} : vector<4x256xf32> to vector<4x128xf32>
    %92 = arith.addf %90, %91 : vector<4x128xf32>
    %93 = vector.extract_strided_slice %89 {offsets = [0, 0], sizes = [4, 32], strides = [1, 1]} : vector<4x128xf32> to vector<4x32xf32>
    %cst_34 = arith.constant 0.000000e+00 : f32
    %94 = vector.broadcast %cst_34 : f32 to vector<4x32xf32>
    %95 = arith.subf %94, %93 : vector<4x32xf32>
    %96 = math.exp %95 : vector<4x32xf32>
    %cst_35 = arith.constant 1.000000e+00 : f32
    %97 = vector.broadcast %cst_35 : f32 to vector<4x32xf32>
    %98 = arith.addf %97, %96 : vector<4x32xf32>
    %cst_36 = arith.constant 1.000000e+00 : f32
    %99 = vector.broadcast %cst_36 : f32 to vector<4x32xf32>
    %100 = arith.divf %99, %98 : vector<4x32xf32>
    %101 = vector.extract_strided_slice %92 {offsets = [0, 0], sizes = [4, 32], strides = [1, 1]} : vector<4x128xf32> to vector<4x32xf32>
    %cst_37 = arith.constant 0.000000e+00 : f32
    %102 = vector.broadcast %cst_37 : f32 to vector<4x32xf32>
    %103 = arith.subf %102, %101 : vector<4x32xf32>
    %104 = math.exp %103 : vector<4x32xf32>
    %cst_38 = arith.constant 1.000000e+00 : f32
    %105 = vector.broadcast %cst_38 : f32 to vector<4x32xf32>
    %106 = arith.addf %105, %104 : vector<4x32xf32>
    %cst_39 = arith.constant 1.000000e+00 : f32
    %107 = vector.broadcast %cst_39 : f32 to vector<4x32xf32>
    %108 = arith.divf %107, %106 : vector<4x32xf32>
    %109 = vector.extract_strided_slice %89 {offsets = [0, 32], sizes = [4, 32], strides = [1, 1]} : vector<4x128xf32> to vector<4x32xf32>
    %cst_40 = arith.constant 0.000000e+00 : f32
    %110 = vector.broadcast %cst_40 : f32 to vector<4x32xf32>
    %111 = arith.subf %110, %109 : vector<4x32xf32>
    %112 = math.exp %111 : vector<4x32xf32>
    %cst_41 = arith.constant 1.000000e+00 : f32
    %113 = vector.broadcast %cst_41 : f32 to vector<4x32xf32>
    %114 = arith.addf %113, %112 : vector<4x32xf32>
    %cst_42 = arith.constant 1.000000e+00 : f32
    %115 = vector.broadcast %cst_42 : f32 to vector<4x32xf32>
    %116 = arith.divf %115, %114 : vector<4x32xf32>
    %117 = vector.extract_strided_slice %92 {offsets = [0, 32], sizes = [4, 32], strides = [1, 1]} : vector<4x128xf32> to vector<4x32xf32>
    %cst_43 = arith.constant 0.000000e+00 : f32
    %118 = vector.broadcast %cst_43 : f32 to vector<4x32xf32>
    %119 = arith.subf %118, %117 : vector<4x32xf32>
    %120 = math.exp %119 : vector<4x32xf32>
    %cst_44 = arith.constant 1.000000e+00 : f32
    %121 = vector.broadcast %cst_44 : f32 to vector<4x32xf32>
    %122 = arith.addf %121, %120 : vector<4x32xf32>
    %cst_45 = arith.constant 1.000000e+00 : f32
    %123 = vector.broadcast %cst_45 : f32 to vector<4x32xf32>
    %124 = arith.divf %123, %122 : vector<4x32xf32>
    %125 = vector.extract_strided_slice %89 {offsets = [0, 64], sizes = [4, 32], strides = [1, 1]} : vector<4x128xf32> to vector<4x32xf32>
    %126 = math.tanh %125 : vector<4x32xf32>
    %127 = vector.extract_strided_slice %92 {offsets = [0, 64], sizes = [4, 32], strides = [1, 1]} : vector<4x128xf32> to vector<4x32xf32>
    %128 = math.tanh %127 : vector<4x32xf32>
    %129 = vector.extract_strided_slice %89 {offsets = [0, 96], sizes = [4, 32], strides = [1, 1]} : vector<4x128xf32> to vector<4x32xf32>
    %cst_46 = arith.constant 0.000000e+00 : f32
    %130 = vector.broadcast %cst_46 : f32 to vector<4x32xf32>
    %131 = arith.subf %130, %129 : vector<4x32xf32>
    %132 = math.exp %131 : vector<4x32xf32>
    %cst_47 = arith.constant 1.000000e+00 : f32
    %133 = vector.broadcast %cst_47 : f32 to vector<4x32xf32>
    %134 = arith.addf %133, %132 : vector<4x32xf32>
    %cst_48 = arith.constant 1.000000e+00 : f32
    %135 = vector.broadcast %cst_48 : f32 to vector<4x32xf32>
    %136 = arith.divf %135, %134 : vector<4x32xf32>
    %137 = vector.extract_strided_slice %92 {offsets = [0, 96], sizes = [4, 32], strides = [1, 1]} : vector<4x128xf32> to vector<4x32xf32>
    %cst_49 = arith.constant 0.000000e+00 : f32
    %138 = vector.broadcast %cst_49 : f32 to vector<4x32xf32>
    %139 = arith.subf %138, %137 : vector<4x32xf32>
    %140 = math.exp %139 : vector<4x32xf32>
    %cst_50 = arith.constant 1.000000e+00 : f32
    %141 = vector.broadcast %cst_50 : f32 to vector<4x32xf32>
    %142 = arith.addf %141, %140 : vector<4x32xf32>
    %cst_51 = arith.constant 1.000000e+00 : f32
    %143 = vector.broadcast %cst_51 : f32 to vector<4x32xf32>
    %144 = arith.divf %143, %142 : vector<4x32xf32>
    %145 = arith.mulf %116, %71 : vector<4x32xf32>
    %146 = arith.mulf %100, %126 : vector<4x32xf32>
    %147 = arith.addf %145, %146 : vector<4x32xf32>
    %148 = arith.mulf %124, %74 : vector<4x32xf32>
    %149 = arith.mulf %108, %128 : vector<4x32xf32>
    %150 = arith.addf %148, %149 : vector<4x32xf32>
    %151 = math.tanh %147 : vector<4x32xf32>
    %152 = arith.mulf %136, %151 : vector<4x32xf32>
    %153 = math.tanh %150 : vector<4x32xf32>
    %154 = arith.mulf %144, %153 : vector<4x32xf32>
    %155 = tpu.concatenate %152, %154 in 1 : vector<4x32xf32>, vector<4x32xf32> -> vector<4x64xf32>
    %c1 = arith.constant 1 : index
    %c0_52 = arith.constant 0 : index
    %c0_53 = arith.constant 0 : index
    %156 = vector.load %arg4[%c1, %c0_52, %c0_53] : memref<8x4x64xf32, #tpu.memory_space<vmem>>, vector<1x4x32xf32>
    %157 = vector.shape_cast %156 : vector<1x4x32xf32> to vector<4x32xf32>
    %158 = vector.shape_cast %152 : vector<4x32xf32> to vector<1x4x32xf32>
    tpu.vector_store %arg4[%c1, %c0_52, %c0_53], %158 {strides = array<i32>} : memref<8x4x64xf32, #tpu.memory_space<vmem>>, vector<1x4x32xf32>,
    %c6 = arith.constant 6 : index
    %c0_54 = arith.constant 0 : index
    %c32_55 = arith.constant 32 : index
    %159 = vector.load %arg4[%c6, %c0_54, %c32_55] : memref<8x4x64xf32, #tpu.memory_space<vmem>>, vector<1x4x32xf32>
    %160 = vector.shape_cast %159 : vector<1x4x32xf32> to vector<4x32xf32>
    %161 = vector.shape_cast %154 : vector<4x32xf32> to vector<1x4x32xf32>
    tpu.vector_store %arg4[%c6, %c0_54, %c32_55], %161 {strides = array<i32>} : memref<8x4x64xf32, #tpu.memory_space<vmem>>, vector<1x4x32xf32>,
    %cst_56 = arith.constant dense<0.000000e+00> : vector<4x256xf32>
    %162 = tpu.matmul %155, %6, %cst_56 {dimension_numbers = #tpu.dot_dimension_numbers<[1], [0], [0], [1], [0, 0, 1, 1], [], []>} : vector<4x64xf32>, vector<64x256xf32>, vector<4x256xf32> -> vector<4x256xf32>
    %163 = vector.extract_strided_slice %5 {offsets = [8, 0], sizes = [4, 128], strides = [1, 1]} : vector<32x256xf32> to vector<4x128xf32>
    %164 = vector.extract_strided_slice %162 {offsets = [0, 0], sizes = [4, 128], strides = [1, 1]} : vector<4x256xf32> to vector<4x128xf32>
    %165 = arith.addf %163, %164 : vector<4x128xf32>
    %166 = vector.extract_strided_slice %5 {offsets = [20, 128], sizes = [4, 128], strides = [1, 1]} : vector<32x256xf32> to vector<4x128xf32>
    %167 = vector.extract_strided_slice %162 {offsets = [0, 128], sizes = [4, 128], strides = [1, 1]} : vector<4x256xf32> to vector<4x128xf32>
    %168 = arith.addf %166, %167 : vector<4x128xf32>
    %169 = vector.extract_strided_slice %165 {offsets = [0, 0], sizes = [4, 32], strides = [1, 1]} : vector<4x128xf32> to vector<4x32xf32>
    %cst_57 = arith.constant 0.000000e+00 : f32
    %170 = vector.broadcast %cst_57 : f32 to vector<4x32xf32>
    %171 = arith.subf %170, %169 : vector<4x32xf32>
    %172 = math.exp %171 : vector<4x32xf32>
    %cst_58 = arith.constant 1.000000e+00 : f32
    %173 = vector.broadcast %cst_58 : f32 to vector<4x32xf32>
    %174 = arith.addf %173, %172 : vector<4x32xf32>
    %cst_59 = arith.constant 1.000000e+00 : f32
    %175 = vector.broadcast %cst_59 : f32 to vector<4x32xf32>
    %176 = arith.divf %175, %174 : vector<4x32xf32>
    %177 = vector.extract_strided_slice %168 {offsets = [0, 0], sizes = [4, 32], strides = [1, 1]} : vector<4x128xf32> to vector<4x32xf32>
    %cst_60 = arith.constant 0.000000e+00 : f32
    %178 = vector.broadcast %cst_60 : f32 to vector<4x32xf32>
    %179 = arith.subf %178, %177 : vector<4x32xf32>
    %180 = math.exp %179 : vector<4x32xf32>
    %cst_61 = arith.constant 1.000000e+00 : f32
    %181 = vector.broadcast %cst_61 : f32 to vector<4x32xf32>
    %182 = arith.addf %181, %180 : vector<4x32xf32>
    %cst_62 = arith.constant 1.000000e+00 : f32
    %183 = vector.broadcast %cst_62 : f32 to vector<4x32xf32>
    %184 = arith.divf %183, %182 : vector<4x32xf32>
    %185 = vector.extract_strided_slice %165 {offsets = [0, 32], sizes = [4, 32], strides = [1, 1]} : vector<4x128xf32> to vector<4x32xf32>
    %cst_63 = arith.constant 0.000000e+00 : f32
    %186 = vector.broadcast %cst_63 : f32 to vector<4x32xf32>
    %187 = arith.subf %186, %185 : vector<4x32xf32>
    %188 = math.exp %187 : vector<4x32xf32>
    %cst_64 = arith.constant 1.000000e+00 : f32
    %189 = vector.broadcast %cst_64 : f32 to vector<4x32xf32>
    %190 = arith.addf %189, %188 : vector<4x32xf32>
    %cst_65 = arith.constant 1.000000e+00 : f32
    %191 = vector.broadcast %cst_65 : f32 to vector<4x32xf32>
    %192 = arith.divf %191, %190 : vector<4x32xf32>
    %193 = vector.extract_strided_slice %168 {offsets = [0, 32], sizes = [4, 32], strides = [1, 1]} : vector<4x128xf32> to vector<4x32xf32>
    %cst_66 = arith.constant 0.000000e+00 : f32
    %194 = vector.broadcast %cst_66 : f32 to vector<4x32xf32>
    %195 = arith.subf %194, %193 : vector<4x32xf32>
    %196 = math.exp %195 : vector<4x32xf32>
    %cst_67 = arith.constant 1.000000e+00 : f32
    %197 = vector.broadcast %cst_67 : f32 to vector<4x32xf32>
    %198 = arith.addf %197, %196 : vector<4x32xf32>
    %cst_68 = arith.constant 1.000000e+00 : f32
    %199 = vector.broadcast %cst_68 : f32 to vector<4x32xf32>
    %200 = arith.divf %199, %198 : vector<4x32xf32>
    %201 = vector.extract_strided_slice %165 {offsets = [0, 64], sizes = [4, 32], strides = [1, 1]} : vector<4x128xf32> to vector<4x32xf32>
    %202 = math.tanh %201 : vector<4x32xf32>
    %203 = vector.extract_strided_slice %168 {offsets = [0, 64], sizes = [4, 32], strides = [1, 1]} : vector<4x128xf32> to vector<4x32xf32>
    %204 = math.tanh %203 : vector<4x32xf32>
    %205 = vector.extract_strided_slice %165 {offsets = [0, 96], sizes = [4, 32], strides = [1, 1]} : vector<4x128xf32> to vector<4x32xf32>
    %cst_69 = arith.constant 0.000000e+00 : f32
    %206 = vector.broadcast %cst_69 : f32 to vector<4x32xf32>
    %207 = arith.subf %206, %205 : vector<4x32xf32>
    %208 = math.exp %207 : vector<4x32xf32>
    %cst_70 = arith.constant 1.000000e+00 : f32
    %209 = vector.broadcast %cst_70 : f32 to vector<4x32xf32>
    %210 = arith.addf %209, %208 : vector<4x32xf32>
    %cst_71 = arith.constant 1.000000e+00 : f32
    %211 = vector.broadcast %cst_71 : f32 to vector<4x32xf32>
    %212 = arith.divf %211, %210 : vector<4x32xf32>
    %213 = vector.extract_strided_slice %168 {offsets = [0, 96], sizes = [4, 32], strides = [1, 1]} : vector<4x128xf32> to vector<4x32xf32>
    %cst_72 = arith.constant 0.000000e+00 : f32
    %214 = vector.broadcast %cst_72 : f32 to vector<4x32xf32>
    %215 = arith.subf %214, %213 : vector<4x32xf32>
    %216 = math.exp %215 : vector<4x32xf32>
    %cst_73 = arith.constant 1.000000e+00 : f32
    %217 = vector.broadcast %cst_73 : f32 to vector<4x32xf32>
    %218 = arith.addf %217, %216 : vector<4x32xf32>
    %cst_74 = arith.constant 1.000000e+00 : f32
    %219 = vector.broadcast %cst_74 : f32 to vector<4x32xf32>
    %220 = arith.divf %219, %218 : vector<4x32xf32>
    %221 = arith.mulf %192, %147 : vector<4x32xf32>
    %222 = arith.mulf %176, %202 : vector<4x32xf32>
    %223 = arith.addf %221, %222 : vector<4x32xf32>
    %224 = arith.mulf %200, %150 : vector<4x32xf32>
    %225 = arith.mulf %184, %204 : vector<4x32xf32>
    %226 = arith.addf %224, %225 : vector<4x32xf32>
    %227 = math.tanh %223 : vector<4x32xf32>
    %228 = arith.mulf %212, %227 : vector<4x32xf32>
    %229 = math.tanh %226 : vector<4x32xf32>
    %230 = arith.mulf %220, %229 : vector<4x32xf32>
    %231 = tpu.concatenate %228, %230 in 1 : vector<4x32xf32>, vector<4x32xf32> -> vector<4x64xf32>
    %c2 = arith.constant 2 : index
    %c0_75 = arith.constant 0 : index
    %c0_76 = arith.constant 0 : index
    %232 = vector.load %arg4[%c2, %c0_75, %c0_76] : memref<8x4x64xf32, #tpu.memory_space<vmem>>, vector<1x4x32xf32>
    %233 = vector.shape_cast %232 : vector<1x4x32xf32> to vector<4x32xf32>
    %234 = vector.shape_cast %228 : vector<4x32xf32> to vector<1x4x32xf32>
    tpu.vector_store %arg4[%c2, %c0_75, %c0_76], %234 {strides = array<i32>} : memref<8x4x64xf32, #tpu.memory_space<vmem>>, vector<1x4x32xf32>,
    %c5 = arith.constant 5 : index
    %c0_77 = arith.constant 0 : index
    %c32_78 = arith.constant 32 : index
    %235 = vector.load %arg4[%c5, %c0_77, %c32_78] : memref<8x4x64xf32, #tpu.memory_space<vmem>>, vector<1x4x32xf32>
    %236 = vector.shape_cast %235 : vector<1x4x32xf32> to vector<4x32xf32>
    %237 = vector.shape_cast %230 : vector<4x32xf32> to vector<1x4x32xf32>
    tpu.vector_store %arg4[%c5, %c0_77, %c32_78], %237 {strides = array<i32>} : memref<8x4x64xf32, #tpu.memory_space<vmem>>, vector<1x4x32xf32>,
    %cst_79 = arith.constant dense<0.000000e+00> : vector<4x256xf32>
    %238 = tpu.matmul %231, %6, %cst_79 {dimension_numbers = #tpu.dot_dimension_numbers<[1], [0], [0], [1], [0, 0, 1, 1], [], []>} : vector<4x64xf32>, vector<64x256xf32>, vector<4x256xf32> -> vector<4x256xf32>
    %239 = vector.extract_strided_slice %5 {offsets = [12, 0], sizes = [4, 128], strides = [1, 1]} : vector<32x256xf32> to vector<4x128xf32>
    %240 = vector.extract_strided_slice %238 {offsets = [0, 0], sizes = [4, 128], strides = [1, 1]} : vector<4x256xf32> to vector<4x128xf32>
    %241 = arith.addf %239, %240 : vector<4x128xf32>
    %242 = vector.extract_strided_slice %5 {offsets = [16, 128], sizes = [4, 128], strides = [1, 1]} : vector<32x256xf32> to vector<4x128xf32>
    %243 = vector.extract_strided_slice %238 {offsets = [0, 128], sizes = [4, 128], strides = [1, 1]} : vector<4x256xf32> to vector<4x128xf32>
    %244 = arith.addf %242, %243 : vector<4x128xf32>
    %245 = vector.extract_strided_slice %241 {offsets = [0, 0], sizes = [4, 32], strides = [1, 1]} : vector<4x128xf32> to vector<4x32xf32>
    %cst_80 = arith.constant 0.000000e+00 : f32
    %246 = vector.broadcast %cst_80 : f32 to vector<4x32xf32>
    %247 = arith.subf %246, %245 : vector<4x32xf32>
    %248 = math.exp %247 : vector<4x32xf32>
    %cst_81 = arith.constant 1.000000e+00 : f32
    %249 = vector.broadcast %cst_81 : f32 to vector<4x32xf32>
    %250 = arith.addf %249, %248 : vector<4x32xf32>
    %cst_82 = arith.constant 1.000000e+00 : f32
    %251 = vector.broadcast %cst_82 : f32 to vector<4x32xf32>
    %252 = arith.divf %251, %250 : vector<4x32xf32>
    %253 = vector.extract_strided_slice %244 {offsets = [0, 0], sizes = [4, 32], strides = [1, 1]} : vector<4x128xf32> to vector<4x32xf32>
    %cst_83 = arith.constant 0.000000e+00 : f32
    %254 = vector.broadcast %cst_83 : f32 to vector<4x32xf32>
    %255 = arith.subf %254, %253 : vector<4x32xf32>
    %256 = math.exp %255 : vector<4x32xf32>
    %cst_84 = arith.constant 1.000000e+00 : f32
    %257 = vector.broadcast %cst_84 : f32 to vector<4x32xf32>
    %258 = arith.addf %257, %256 : vector<4x32xf32>
    %cst_85 = arith.constant 1.000000e+00 : f32
    %259 = vector.broadcast %cst_85 : f32 to vector<4x32xf32>
    %260 = arith.divf %259, %258 : vector<4x32xf32>
    %261 = vector.extract_strided_slice %241 {offsets = [0, 32], sizes = [4, 32], strides = [1, 1]} : vector<4x128xf32> to vector<4x32xf32>
    %cst_86 = arith.constant 0.000000e+00 : f32
    %262 = vector.broadcast %cst_86 : f32 to vector<4x32xf32>
    %263 = arith.subf %262, %261 : vector<4x32xf32>
    %264 = math.exp %263 : vector<4x32xf32>
    %cst_87 = arith.constant 1.000000e+00 : f32
    %265 = vector.broadcast %cst_87 : f32 to vector<4x32xf32>
    %266 = arith.addf %265, %264 : vector<4x32xf32>
    %cst_88 = arith.constant 1.000000e+00 : f32
    %267 = vector.broadcast %cst_88 : f32 to vector<4x32xf32>
    %268 = arith.divf %267, %266 : vector<4x32xf32>
    %269 = vector.extract_strided_slice %244 {offsets = [0, 32], sizes = [4, 32], strides = [1, 1]} : vector<4x128xf32> to vector<4x32xf32>
    %cst_89 = arith.constant 0.000000e+00 : f32
    %270 = vector.broadcast %cst_89 : f32 to vector<4x32xf32>
    %271 = arith.subf %270, %269 : vector<4x32xf32>
    %272 = math.exp %271 : vector<4x32xf32>
    %cst_90 = arith.constant 1.000000e+00 : f32
    %273 = vector.broadcast %cst_90 : f32 to vector<4x32xf32>
    %274 = arith.addf %273, %272 : vector<4x32xf32>
    %cst_91 = arith.constant 1.000000e+00 : f32
    %275 = vector.broadcast %cst_91 : f32 to vector<4x32xf32>
    %276 = arith.divf %275, %274 : vector<4x32xf32>
    %277 = vector.extract_strided_slice %241 {offsets = [0, 64], sizes = [4, 32], strides = [1, 1]} : vector<4x128xf32> to vector<4x32xf32>
    %278 = math.tanh %277 : vector<4x32xf32>
    %279 = vector.extract_strided_slice %244 {offsets = [0, 64], sizes = [4, 32], strides = [1, 1]} : vector<4x128xf32> to vector<4x32xf32>
    %280 = math.tanh %279 : vector<4x32xf32>
    %281 = vector.extract_strided_slice %241 {offsets = [0, 96], sizes = [4, 32], strides = [1, 1]} : vector<4x128xf32> to vector<4x32xf32>
    %cst_92 = arith.constant 0.000000e+00 : f32
    %282 = vector.broadcast %cst_92 : f32 to vector<4x32xf32>
    %283 = arith.subf %282, %281 : vector<4x32xf32>
    %284 = math.exp %283 : vector<4x32xf32>
    %cst_93 = arith.constant 1.000000e+00 : f32
    %285 = vector.broadcast %cst_93 : f32 to vector<4x32xf32>
    %286 = arith.addf %285, %284 : vector<4x32xf32>
    %cst_94 = arith.constant 1.000000e+00 : f32
    %287 = vector.broadcast %cst_94 : f32 to vector<4x32xf32>
    %288 = arith.divf %287, %286 : vector<4x32xf32>
    %289 = vector.extract_strided_slice %244 {offsets = [0, 96], sizes = [4, 32], strides = [1, 1]} : vector<4x128xf32> to vector<4x32xf32>
    %cst_95 = arith.constant 0.000000e+00 : f32
    %290 = vector.broadcast %cst_95 : f32 to vector<4x32xf32>
    %291 = arith.subf %290, %289 : vector<4x32xf32>
    %292 = math.exp %291 : vector<4x32xf32>
    %cst_96 = arith.constant 1.000000e+00 : f32
    %293 = vector.broadcast %cst_96 : f32 to vector<4x32xf32>
    %294 = arith.addf %293, %292 : vector<4x32xf32>
    %cst_97 = arith.constant 1.000000e+00 : f32
    %295 = vector.broadcast %cst_97 : f32 to vector<4x32xf32>
    %296 = arith.divf %295, %294 : vector<4x32xf32>
    %297 = arith.mulf %268, %223 : vector<4x32xf32>
    %298 = arith.mulf %252, %278 : vector<4x32xf32>
    %299 = arith.addf %297, %298 : vector<4x32xf32>
    %300 = arith.mulf %276, %226 : vector<4x32xf32>
    %301 = arith.mulf %260, %280 : vector<4x32xf32>
    %302 = arith.addf %300, %301 : vector<4x32xf32>
    %303 = math.tanh %299 : vector<4x32xf32>
    %304 = arith.mulf %288, %303 : vector<4x32xf32>
    %305 = math.tanh %302 : vector<4x32xf32>
    %306 = arith.mulf %296, %305 : vector<4x32xf32>
    %307 = tpu.concatenate %304, %306 in 1 : vector<4x32xf32>, vector<4x32xf32> -> vector<4x64xf32>
    %c3 = arith.constant 3 : index
    %c0_98 = arith.constant 0 : index
    %c0_99 = arith.constant 0 : index
    %308 = vector.load %arg4[%c3, %c0_98, %c0_99] : memref<8x4x64xf32, #tpu.memory_space<vmem>>, vector<1x4x32xf32>
    %309 = vector.shape_cast %308 : vector<1x4x32xf32> to vector<4x32xf32>
    %310 = vector.shape_cast %304 : vector<4x32xf32> to vector<1x4x32xf32>
    tpu.vector_store %arg4[%c3, %c0_98, %c0_99], %310 {strides = array<i32>} : memref<8x4x64xf32, #tpu.memory_space<vmem>>, vector<1x4x32xf32>,
    %c4 = arith.constant 4 : index
    %c0_100 = arith.constant 0 : index
    %c32_101 = arith.constant 32 : index
    %311 = vector.load %arg4[%c4, %c0_100, %c32_101] : memref<8x4x64xf32, #tpu.memory_space<vmem>>, vector<1x4x32xf32>
    %312 = vector.shape_cast %311 : vector<1x4x32xf32> to vector<4x32xf32>
    %313 = vector.shape_cast %306 : vector<4x32xf32> to vector<1x4x32xf32>
    tpu.vector_store %arg4[%c4, %c0_100, %c32_101], %313 {strides = array<i32>} : memref<8x4x64xf32, #tpu.memory_space<vmem>>, vector<1x4x32xf32>,
    %cst_102 = arith.constant dense<0.000000e+00> : vector<4x256xf32>
    %314 = tpu.matmul %307, %6, %cst_102 {dimension_numbers = #tpu.dot_dimension_numbers<[1], [0], [0], [1], [0, 0, 1, 1], [], []>} : vector<4x64xf32>, vector<64x256xf32>, vector<4x256xf32> -> vector<4x256xf32>
    %315 = vector.extract_strided_slice %5 {offsets = [16, 0], sizes = [4, 128], strides = [1, 1]} : vector<32x256xf32> to vector<4x128xf32>
    %316 = vector.extract_strided_slice %314 {offsets = [0, 0], sizes = [4, 128], strides = [1, 1]} : vector<4x256xf32> to vector<4x128xf32>
    %317 = arith.addf %315, %316 : vector<4x128xf32>
    %318 = vector.extract_strided_slice %5 {offsets = [12, 128], sizes = [4, 128], strides = [1, 1]} : vector<32x256xf32> to vector<4x128xf32>
    %319 = vector.extract_strided_slice %314 {offsets = [0, 128], sizes = [4, 128], strides = [1, 1]} : vector<4x256xf32> to vector<4x128xf32>
    %320 = arith.addf %318, %319 : vector<4x128xf32>
    %321 = vector.extract_strided_slice %317 {offsets = [0, 0], sizes = [4, 32], strides = [1, 1]} : vector<4x128xf32> to vector<4x32xf32>
    %cst_103 = arith.constant 0.000000e+00 : f32
    %322 = vector.broadcast %cst_103 : f32 to vector<4x32xf32>
    %323 = arith.subf %322, %321 : vector<4x32xf32>
    %324 = math.exp %323 : vector<4x32xf32>
    %cst_104 = arith.constant 1.000000e+00 : f32
    %325 = vector.broadcast %cst_104 : f32 to vector<4x32xf32>
    %326 = arith.addf %325, %324 : vector<4x32xf32>
    %cst_105 = arith.constant 1.000000e+00 : f32
    %327 = vector.broadcast %cst_105 : f32 to vector<4x32xf32>
    %328 = arith.divf %327, %326 : vector<4x32xf32>
    %329 = vector.extract_strided_slice %320 {offsets = [0, 0], sizes = [4, 32], strides = [1, 1]} : vector<4x128xf32> to vector<4x32xf32>
    %cst_106 = arith.constant 0.000000e+00 : f32
    %330 = vector.broadcast %cst_106 : f32 to vector<4x32xf32>
    %331 = arith.subf %330, %329 : vector<4x32xf32>
    %332 = math.exp %331 : vector<4x32xf32>
    %cst_107 = arith.constant 1.000000e+00 : f32
    %333 = vector.broadcast %cst_107 : f32 to vector<4x32xf32>
    %334 = arith.addf %333, %332 : vector<4x32xf32>
    %cst_108 = arith.constant 1.000000e+00 : f32
    %335 = vector.broadcast %cst_108 : f32 to vector<4x32xf32>
    %336 = arith.divf %335, %334 : vector<4x32xf32>
    %337 = vector.extract_strided_slice %317 {offsets = [0, 32], sizes = [4, 32], strides = [1, 1]} : vector<4x128xf32> to vector<4x32xf32>
    %cst_109 = arith.constant 0.000000e+00 : f32
    %338 = vector.broadcast %cst_109 : f32 to vector<4x32xf32>
    %339 = arith.subf %338, %337 : vector<4x32xf32>
    %340 = math.exp %339 : vector<4x32xf32>
    %cst_110 = arith.constant 1.000000e+00 : f32
    %341 = vector.broadcast %cst_110 : f32 to vector<4x32xf32>
    %342 = arith.addf %341, %340 : vector<4x32xf32>
    %cst_111 = arith.constant 1.000000e+00 : f32
    %343 = vector.broadcast %cst_111 : f32 to vector<4x32xf32>
    %344 = arith.divf %343, %342 : vector<4x32xf32>
    %345 = vector.extract_strided_slice %320 {offsets = [0, 32], sizes = [4, 32], strides = [1, 1]} : vector<4x128xf32> to vector<4x32xf32>
    %cst_112 = arith.constant 0.000000e+00 : f32
    %346 = vector.broadcast %cst_112 : f32 to vector<4x32xf32>
    %347 = arith.subf %346, %345 : vector<4x32xf32>
    %348 = math.exp %347 : vector<4x32xf32>
    %cst_113 = arith.constant 1.000000e+00 : f32
    %349 = vector.broadcast %cst_113 : f32 to vector<4x32xf32>
    %350 = arith.addf %349, %348 : vector<4x32xf32>
    %cst_114 = arith.constant 1.000000e+00 : f32
    %351 = vector.broadcast %cst_114 : f32 to vector<4x32xf32>
    %352 = arith.divf %351, %350 : vector<4x32xf32>
    %353 = vector.extract_strided_slice %317 {offsets = [0, 64], sizes = [4, 32], strides = [1, 1]} : vector<4x128xf32> to vector<4x32xf32>
    %354 = math.tanh %353 : vector<4x32xf32>
    %355 = vector.extract_strided_slice %320 {offsets = [0, 64], sizes = [4, 32], strides = [1, 1]} : vector<4x128xf32> to vector<4x32xf32>
    %356 = math.tanh %355 : vector<4x32xf32>
    %357 = vector.extract_strided_slice %317 {offsets = [0, 96], sizes = [4, 32], strides = [1, 1]} : vector<4x128xf32> to vector<4x32xf32>
    %cst_115 = arith.constant 0.000000e+00 : f32
    %358 = vector.broadcast %cst_115 : f32 to vector<4x32xf32>
    %359 = arith.subf %358, %357 : vector<4x32xf32>
    %360 = math.exp %359 : vector<4x32xf32>
    %cst_116 = arith.constant 1.000000e+00 : f32
    %361 = vector.broadcast %cst_116 : f32 to vector<4x32xf32>
    %362 = arith.addf %361, %360 : vector<4x32xf32>
    %cst_117 = arith.constant 1.000000e+00 : f32
    %363 = vector.broadcast %cst_117 : f32 to vector<4x32xf32>
    %364 = arith.divf %363, %362 : vector<4x32xf32>
    %365 = vector.extract_strided_slice %320 {offsets = [0, 96], sizes = [4, 32], strides = [1, 1]} : vector<4x128xf32> to vector<4x32xf32>
    %cst_118 = arith.constant 0.000000e+00 : f32
    %366 = vector.broadcast %cst_118 : f32 to vector<4x32xf32>
    %367 = arith.subf %366, %365 : vector<4x32xf32>
    %368 = math.exp %367 : vector<4x32xf32>
    %cst_119 = arith.constant 1.000000e+00 : f32
    %369 = vector.broadcast %cst_119 : f32 to vector<4x32xf32>
    %370 = arith.addf %369, %368 : vector<4x32xf32>
    %cst_120 = arith.constant 1.000000e+00 : f32
    %371 = vector.broadcast %cst_120 : f32 to vector<4x32xf32>
    %372 = arith.divf %371, %370 : vector<4x32xf32>
    %373 = arith.mulf %344, %299 : vector<4x32xf32>
    %374 = arith.mulf %328, %354 : vector<4x32xf32>
    %375 = arith.addf %373, %374 : vector<4x32xf32>
    %376 = arith.mulf %352, %302 : vector<4x32xf32>
    %377 = arith.mulf %336, %356 : vector<4x32xf32>
    %378 = arith.addf %376, %377 : vector<4x32xf32>
    %379 = math.tanh %375 : vector<4x32xf32>
    %380 = arith.mulf %364, %379 : vector<4x32xf32>
    %381 = math.tanh %378 : vector<4x32xf32>
    %382 = arith.mulf %372, %381 : vector<4x32xf32>
    %383 = tpu.concatenate %380, %382 in 1 : vector<4x32xf32>, vector<4x32xf32> -> vector<4x64xf32>
    %c4_121 = arith.constant 4 : index
    %c0_122 = arith.constant 0 : index
    %c0_123 = arith.constant 0 : index
    %384 = vector.load %arg4[%c4_121, %c0_122, %c0_123] : memref<8x4x64xf32, #tpu.memory_space<vmem>>, vector<1x4x32xf32>
    %385 = vector.shape_cast %384 : vector<1x4x32xf32> to vector<4x32xf32>
    %386 = vector.shape_cast %380 : vector<4x32xf32> to vector<1x4x32xf32>
    tpu.vector_store %arg4[%c4_121, %c0_122, %c0_123], %386 {strides = array<i32>} : memref<8x4x64xf32, #tpu.memory_space<vmem>>, vector<1x4x32xf32>,
    %c3_124 = arith.constant 3 : index
    %c0_125 = arith.constant 0 : index
    %c32_126 = arith.constant 32 : index
    %387 = vector.load %arg4[%c3_124, %c0_125, %c32_126] : memref<8x4x64xf32, #tpu.memory_space<vmem>>, vector<1x4x32xf32>
    %388 = vector.shape_cast %387 : vector<1x4x32xf32> to vector<4x32xf32>
    %389 = vector.shape_cast %382 : vector<4x32xf32> to vector<1x4x32xf32>
    tpu.vector_store %arg4[%c3_124, %c0_125, %c32_126], %389 {strides = array<i32>} : memref<8x4x64xf32, #tpu.memory_space<vmem>>, vector<1x4x32xf32>,
    %cst_127 = arith.constant dense<0.000000e+00> : vector<4x256xf32>
    %390 = tpu.matmul %383, %6, %cst_127 {dimension_numbers = #tpu.dot_dimension_numbers<[1], [0], [0], [1], [0, 0, 1, 1], [], []>} : vector<4x64xf32>, vector<64x256xf32>, vector<4x256xf32> -> vector<4x256xf32>
    %391 = vector.extract_strided_slice %5 {offsets = [20, 0], sizes = [4, 128], strides = [1, 1]} : vector<32x256xf32> to vector<4x128xf32>
    %392 = vector.extract_strided_slice %390 {offsets = [0, 0], sizes = [4, 128], strides = [1, 1]} : vector<4x256xf32> to vector<4x128xf32>
    %393 = arith.addf %391, %392 : vector<4x128xf32>
    %394 = vector.extract_strided_slice %5 {offsets = [8, 128], sizes = [4, 128], strides = [1, 1]} : vector<32x256xf32> to vector<4x128xf32>
    %395 = vector.extract_strided_slice %390 {offsets = [0, 128], sizes = [4, 128], strides = [1, 1]} : vector<4x256xf32> to vector<4x128xf32>
    %396 = arith.addf %394, %395 : vector<4x128xf32>
    %397 = vector.extract_strided_slice %393 {offsets = [0, 0], sizes = [4, 32], strides = [1, 1]} : vector<4x128xf32> to vector<4x32xf32>
    %cst_128 = arith.constant 0.000000e+00 : f32
    %398 = vector.broadcast %cst_128 : f32 to vector<4x32xf32>
    %399 = arith.subf %398, %397 : vector<4x32xf32>
    %400 = math.exp %399 : vector<4x32xf32>
    %cst_129 = arith.constant 1.000000e+00 : f32
    %401 = vector.broadcast %cst_129 : f32 to vector<4x32xf32>
    %402 = arith.addf %401, %400 : vector<4x32xf32>
    %cst_130 = arith.constant 1.000000e+00 : f32
    %403 = vector.broadcast %cst_130 : f32 to vector<4x32xf32>
    %404 = arith.divf %403, %402 : vector<4x32xf32>
    %405 = vector.extract_strided_slice %396 {offsets = [0, 0], sizes = [4, 32], strides = [1, 1]} : vector<4x128xf32> to vector<4x32xf32>
    %cst_131 = arith.constant 0.000000e+00 : f32
    %406 = vector.broadcast %cst_131 : f32 to vector<4x32xf32>
    %407 = arith.subf %406, %405 : vector<4x32xf32>
    %408 = math.exp %407 : vector<4x32xf32>
    %cst_132 = arith.constant 1.000000e+00 : f32
    %409 = vector.broadcast %cst_132 : f32 to vector<4x32xf32>
    %410 = arith.addf %409, %408 : vector<4x32xf32>
    %cst_133 = arith.constant 1.000000e+00 : f32
    %411 = vector.broadcast %cst_133 : f32 to vector<4x32xf32>
    %412 = arith.divf %411, %410 : vector<4x32xf32>
    %413 = vector.extract_strided_slice %393 {offsets = [0, 32], sizes = [4, 32], strides = [1, 1]} : vector<4x128xf32> to vector<4x32xf32>
    %cst_134 = arith.constant 0.000000e+00 : f32
    %414 = vector.broadcast %cst_134 : f32 to vector<4x32xf32>
    %415 = arith.subf %414, %413 : vector<4x32xf32>
    %416 = math.exp %415 : vector<4x32xf32>
    %cst_135 = arith.constant 1.000000e+00 : f32
    %417 = vector.broadcast %cst_135 : f32 to vector<4x32xf32>
    %418 = arith.addf %417, %416 : vector<4x32xf32>
    %cst_136 = arith.constant 1.000000e+00 : f32
    %419 = vector.broadcast %cst_136 : f32 to vector<4x32xf32>
    %420 = arith.divf %419, %418 : vector<4x32xf32>
    %421 = vector.extract_strided_slice %396 {offsets = [0, 32], sizes = [4, 32], strides = [1, 1]} : vector<4x128xf32> to vector<4x32xf32>
    %cst_137 = arith.constant 0.000000e+00 : f32
    %422 = vector.broadcast %cst_137 : f32 to vector<4x32xf32>
    %423 = arith.subf %422, %421 : vector<4x32xf32>
    %424 = math.exp %423 : vector<4x32xf32>
    %cst_138 = arith.constant 1.000000e+00 : f32
    %425 = vector.broadcast %cst_138 : f32 to vector<4x32xf32>
    %426 = arith.addf %425, %424 : vector<4x32xf32>
    %cst_139 = arith.constant 1.000000e+00 : f32
    %427 = vector.broadcast %cst_139 : f32 to vector<4x32xf32>
    %428 = arith.divf %427, %426 : vector<4x32xf32>
    %429 = vector.extract_strided_slice %393 {offsets = [0, 64], sizes = [4, 32], strides = [1, 1]} : vector<4x128xf32> to vector<4x32xf32>
    %430 = math.tanh %429 : vector<4x32xf32>
    %431 = vector.extract_strided_slice %396 {offsets = [0, 64], sizes = [4, 32], strides = [1, 1]} : vector<4x128xf32> to vector<4x32xf32>
    %432 = math.tanh %431 : vector<4x32xf32>
    %433 = vector.extract_strided_slice %393 {offsets = [0, 96], sizes = [4, 32], strides = [1, 1]} : vector<4x128xf32> to vector<4x32xf32>
    %cst_140 = arith.constant 0.000000e+00 : f32
    %434 = vector.broadcast %cst_140 : f32 to vector<4x32xf32>
    %435 = arith.subf %434, %433 : vector<4x32xf32>
    %436 = math.exp %435 : vector<4x32xf32>
    %cst_141 = arith.constant 1.000000e+00 : f32
    %437 = vector.broadcast %cst_141 : f32 to vector<4x32xf32>
    %438 = arith.addf %437, %436 : vector<4x32xf32>
    %cst_142 = arith.constant 1.000000e+00 : f32
    %439 = vector.broadcast %cst_142 : f32 to vector<4x32xf32>
    %440 = arith.divf %439, %438 : vector<4x32xf32>
    %441 = vector.extract_strided_slice %396 {offsets = [0, 96], sizes = [4, 32], strides = [1, 1]} : vector<4x128xf32> to vector<4x32xf32>
    %cst_143 = arith.constant 0.000000e+00 : f32
    %442 = vector.broadcast %cst_143 : f32 to vector<4x32xf32>
    %443 = arith.subf %442, %441 : vector<4x32xf32>
    %444 = math.exp %443 : vector<4x32xf32>
    %cst_144 = arith.constant 1.000000e+00 : f32
    %445 = vector.broadcast %cst_144 : f32 to vector<4x32xf32>
    %446 = arith.addf %445, %444 : vector<4x32xf32>
    %cst_145 = arith.constant 1.000000e+00 : f32
    %447 = vector.broadcast %cst_145 : f32 to vector<4x32xf32>
    %448 = arith.divf %447, %446 : vector<4x32xf32>
    %449 = arith.mulf %420, %375 : vector<4x32xf32>
    %450 = arith.mulf %404, %430 : vector<4x32xf32>
    %451 = arith.addf %449, %450 : vector<4x32xf32>
    %452 = arith.mulf %428, %378 : vector<4x32xf32>
    %453 = arith.mulf %412, %432 : vector<4x32xf32>
    %454 = arith.addf %452, %453 : vector<4x32xf32>
    %455 = math.tanh %451 : vector<4x32xf32>
    %456 = arith.mulf %440, %455 : vector<4x32xf32>
    %457 = math.tanh %454 : vector<4x32xf32>
    %458 = arith.mulf %448, %457 : vector<4x32xf32>
    %459 = tpu.concatenate %456, %458 in 1 : vector<4x32xf32>, vector<4x32xf32> -> vector<4x64xf32>
    %c5_146 = arith.constant 5 : index
    %c0_147 = arith.constant 0 : index
    %c0_148 = arith.constant 0 : index
    %460 = vector.load %arg4[%c5_146, %c0_147, %c0_148] : memref<8x4x64xf32, #tpu.memory_space<vmem>>, vector<1x4x32xf32>
    %461 = vector.shape_cast %460 : vector<1x4x32xf32> to vector<4x32xf32>
    %462 = vector.shape_cast %456 : vector<4x32xf32> to vector<1x4x32xf32>
    tpu.vector_store %arg4[%c5_146, %c0_147, %c0_148], %462 {strides = array<i32>} : memref<8x4x64xf32, #tpu.memory_space<vmem>>, vector<1x4x32xf32>,
    %c2_149 = arith.constant 2 : index
    %c0_150 = arith.constant 0 : index
    %c32_151 = arith.constant 32 : index
    %463 = vector.load %arg4[%c2_149, %c0_150, %c32_151] : memref<8x4x64xf32, #tpu.memory_space<vmem>>, vector<1x4x32xf32>
    %464 = vector.shape_cast %463 : vector<1x4x32xf32> to vector<4x32xf32>
    %465 = vector.shape_cast %458 : vector<4x32xf32> to vector<1x4x32xf32>
    tpu.vector_store %arg4[%c2_149, %c0_150, %c32_151], %465 {strides = array<i32>} : memref<8x4x64xf32, #tpu.memory_space<vmem>>, vector<1x4x32xf32>,
    %cst_152 = arith.constant dense<0.000000e+00> : vector<4x256xf32>
    %466 = tpu.matmul %459, %6, %cst_152 {dimension_numbers = #tpu.dot_dimension_numbers<[1], [0], [0], [1], [0, 0, 1, 1], [], []>} : vector<4x64xf32>, vector<64x256xf32>, vector<4x256xf32> -> vector<4x256xf32>
    %467 = vector.extract_strided_slice %5 {offsets = [24, 0], sizes = [4, 128], strides = [1, 1]} : vector<32x256xf32> to vector<4x128xf32>
    %468 = vector.extract_strided_slice %466 {offsets = [0, 0], sizes = [4, 128], strides = [1, 1]} : vector<4x256xf32> to vector<4x128xf32>
    %469 = arith.addf %467, %468 : vector<4x128xf32>
    %470 = vector.extract_strided_slice %5 {offsets = [4, 128], sizes = [4, 128], strides = [1, 1]} : vector<32x256xf32> to vector<4x128xf32>
    %471 = vector.extract_strided_slice %466 {offsets = [0, 128], sizes = [4, 128], strides = [1, 1]} : vector<4x256xf32> to vector<4x128xf32>
    %472 = arith.addf %470, %471 : vector<4x128xf32>
    %473 = vector.extract_strided_slice %469 {offsets = [0, 0], sizes = [4, 32], strides = [1, 1]} : vector<4x128xf32> to vector<4x32xf32>
    %cst_153 = arith.constant 0.000000e+00 : f32
    %474 = vector.broadcast %cst_153 : f32 to vector<4x32xf32>
    %475 = arith.subf %474, %473 : vector<4x32xf32>
    %476 = math.exp %475 : vector<4x32xf32>
    %cst_154 = arith.constant 1.000000e+00 : f32
    %477 = vector.broadcast %cst_154 : f32 to vector<4x32xf32>
    %478 = arith.addf %477, %476 : vector<4x32xf32>
    %cst_155 = arith.constant 1.000000e+00 : f32
    %479 = vector.broadcast %cst_155 : f32 to vector<4x32xf32>
    %480 = arith.divf %479, %478 : vector<4x32xf32>
    %481 = vector.extract_strided_slice %472 {offsets = [0, 0], sizes = [4, 32], strides = [1, 1]} : vector<4x128xf32> to vector<4x32xf32>
    %cst_156 = arith.constant 0.000000e+00 : f32
    %482 = vector.broadcast %cst_156 : f32 to vector<4x32xf32>
    %483 = arith.subf %482, %481 : vector<4x32xf32>
    %484 = math.exp %483 : vector<4x32xf32>
    %cst_157 = arith.constant 1.000000e+00 : f32
    %485 = vector.broadcast %cst_157 : f32 to vector<4x32xf32>
    %486 = arith.addf %485, %484 : vector<4x32xf32>
    %cst_158 = arith.constant 1.000000e+00 : f32
    %487 = vector.broadcast %cst_158 : f32 to vector<4x32xf32>
    %488 = arith.divf %487, %486 : vector<4x32xf32>
    %489 = vector.extract_strided_slice %469 {offsets = [0, 32], sizes = [4, 32], strides = [1, 1]} : vector<4x128xf32> to vector<4x32xf32>
    %cst_159 = arith.constant 0.000000e+00 : f32
    %490 = vector.broadcast %cst_159 : f32 to vector<4x32xf32>
    %491 = arith.subf %490, %489 : vector<4x32xf32>
    %492 = math.exp %491 : vector<4x32xf32>
    %cst_160 = arith.constant 1.000000e+00 : f32
    %493 = vector.broadcast %cst_160 : f32 to vector<4x32xf32>
    %494 = arith.addf %493, %492 : vector<4x32xf32>
    %cst_161 = arith.constant 1.000000e+00 : f32
    %495 = vector.broadcast %cst_161 : f32 to vector<4x32xf32>
    %496 = arith.divf %495, %494 : vector<4x32xf32>
    %497 = vector.extract_strided_slice %472 {offsets = [0, 32], sizes = [4, 32], strides = [1, 1]} : vector<4x128xf32> to vector<4x32xf32>
    %cst_162 = arith.constant 0.000000e+00 : f32
    %498 = vector.broadcast %cst_162 : f32 to vector<4x32xf32>
    %499 = arith.subf %498, %497 : vector<4x32xf32>
    %500 = math.exp %499 : vector<4x32xf32>
    %cst_163 = arith.constant 1.000000e+00 : f32
    %501 = vector.broadcast %cst_163 : f32 to vector<4x32xf32>
    %502 = arith.addf %501, %500 : vector<4x32xf32>
    %cst_164 = arith.constant 1.000000e+00 : f32
    %503 = vector.broadcast %cst_164 : f32 to vector<4x32xf32>
    %504 = arith.divf %503, %502 : vector<4x32xf32>
    %505 = vector.extract_strided_slice %469 {offsets = [0, 64], sizes = [4, 32], strides = [1, 1]} : vector<4x128xf32> to vector<4x32xf32>
    %506 = math.tanh %505 : vector<4x32xf32>
    %507 = vector.extract_strided_slice %472 {offsets = [0, 64], sizes = [4, 32], strides = [1, 1]} : vector<4x128xf32> to vector<4x32xf32>
    %508 = math.tanh %507 : vector<4x32xf32>
    %509 = vector.extract_strided_slice %469 {offsets = [0, 96], sizes = [4, 32], strides = [1, 1]} : vector<4x128xf32> to vector<4x32xf32>
    %cst_165 = arith.constant 0.000000e+00 : f32
    %510 = vector.broadcast %cst_165 : f32 to vector<4x32xf32>
    %511 = arith.subf %510, %509 : vector<4x32xf32>
    %512 = math.exp %511 : vector<4x32xf32>
    %cst_166 = arith.constant 1.000000e+00 : f32
    %513 = vector.broadcast %cst_166 : f32 to vector<4x32xf32>
    %514 = arith.addf %513, %512 : vector<4x32xf32>
    %cst_167 = arith.constant 1.000000e+00 : f32
    %515 = vector.broadcast %cst_167 : f32 to vector<4x32xf32>
    %516 = arith.divf %515, %514 : vector<4x32xf32>
    %517 = vector.extract_strided_slice %472 {offsets = [0, 96], sizes = [4, 32], strides = [1, 1]} : vector<4x128xf32> to vector<4x32xf32>
    %cst_168 = arith.constant 0.000000e+00 : f32
    %518 = vector.broadcast %cst_168 : f32 to vector<4x32xf32>
    %519 = arith.subf %518, %517 : vector<4x32xf32>
    %520 = math.exp %519 : vector<4x32xf32>
    %cst_169 = arith.constant 1.000000e+00 : f32
    %521 = vector.broadcast %cst_169 : f32 to vector<4x32xf32>
    %522 = arith.addf %521, %520 : vector<4x32xf32>
    %cst_170 = arith.constant 1.000000e+00 : f32
    %523 = vector.broadcast %cst_170 : f32 to vector<4x32xf32>
    %524 = arith.divf %523, %522 : vector<4x32xf32>
    %525 = arith.mulf %496, %451 : vector<4x32xf32>
    %526 = arith.mulf %480, %506 : vector<4x32xf32>
    %527 = arith.addf %525, %526 : vector<4x32xf32>
    %528 = arith.mulf %504, %454 : vector<4x32xf32>
    %529 = arith.mulf %488, %508 : vector<4x32xf32>
    %530 = arith.addf %528, %529 : vector<4x32xf32>
    %531 = math.tanh %527 : vector<4x32xf32>
    %532 = arith.mulf %516, %531 : vector<4x32xf32>
    %533 = math.tanh %530 : vector<4x32xf32>
    %534 = arith.mulf %524, %533 : vector<4x32xf32>
    %535 = tpu.concatenate %532, %534 in 1 : vector<4x32xf32>, vector<4x32xf32> -> vector<4x64xf32>
    %c6_171 = arith.constant 6 : index
    %c0_172 = arith.constant 0 : index
    %c0_173 = arith.constant 0 : index
    %536 = vector.load %arg4[%c6_171, %c0_172, %c0_173] : memref<8x4x64xf32, #tpu.memory_space<vmem>>, vector<1x4x32xf32>
    %537 = vector.shape_cast %536 : vector<1x4x32xf32> to vector<4x32xf32>
    %538 = vector.shape_cast %532 : vector<4x32xf32> to vector<1x4x32xf32>
    tpu.vector_store %arg4[%c6_171, %c0_172, %c0_173], %538 {strides = array<i32>} : memref<8x4x64xf32, #tpu.memory_space<vmem>>, vector<1x4x32xf32>,
    %c1_174 = arith.constant 1 : index
    %c0_175 = arith.constant 0 : index
    %c32_176 = arith.constant 32 : index
    %539 = vector.load %arg4[%c1_174, %c0_175, %c32_176] : memref<8x4x64xf32, #tpu.memory_space<vmem>>, vector<1x4x32xf32>
    %540 = vector.shape_cast %539 : vector<1x4x32xf32> to vector<4x32xf32>
    %541 = vector.shape_cast %534 : vector<4x32xf32> to vector<1x4x32xf32>
    tpu.vector_store %arg4[%c1_174, %c0_175, %c32_176], %541 {strides = array<i32>} : memref<8x4x64xf32, #tpu.memory_space<vmem>>, vector<1x4x32xf32>,
    %cst_177 = arith.constant dense<0.000000e+00> : vector<4x256xf32>
    %542 = tpu.matmul %535, %6, %cst_177 {dimension_numbers = #tpu.dot_dimension_numbers<[1], [0], [0], [1], [0, 0, 1, 1], [], []>} : vector<4x64xf32>, vector<64x256xf32>, vector<4x256xf32> -> vector<4x256xf32>
    %543 = vector.extract_strided_slice %5 {offsets = [28, 0], sizes = [4, 128], strides = [1, 1]} : vector<32x256xf32> to vector<4x128xf32>
    %544 = vector.extract_strided_slice %542 {offsets = [0, 0], sizes = [4, 128], strides = [1, 1]} : vector<4x256xf32> to vector<4x128xf32>
    %545 = arith.addf %543, %544 : vector<4x128xf32>
    %546 = vector.extract_strided_slice %5 {offsets = [0, 128], sizes = [4, 128], strides = [1, 1]} : vector<32x256xf32> to vector<4x128xf32>
    %547 = vector.extract_strided_slice %542 {offsets = [0, 128], sizes = [4, 128], strides = [1, 1]} : vector<4x256xf32> to vector<4x128xf32>
    %548 = arith.addf %546, %547 : vector<4x128xf32>
    %549 = vector.extract_strided_slice %545 {offsets = [0, 0], sizes = [4, 32], strides = [1, 1]} : vector<4x128xf32> to vector<4x32xf32>
    %cst_178 = arith.constant 0.000000e+00 : f32
    %550 = vector.broadcast %cst_178 : f32 to vector<4x32xf32>
    %551 = arith.subf %550, %549 : vector<4x32xf32>
    %552 = math.exp %551 : vector<4x32xf32>
    %cst_179 = arith.constant 1.000000e+00 : f32
    %553 = vector.broadcast %cst_179 : f32 to vector<4x32xf32>
    %554 = arith.addf %553, %552 : vector<4x32xf32>
    %cst_180 = arith.constant 1.000000e+00 : f32
    %555 = vector.broadcast %cst_180 : f32 to vector<4x32xf32>
    %556 = arith.divf %555, %554 : vector<4x32xf32>
    %557 = vector.extract_strided_slice %548 {offsets = [0, 0], sizes = [4, 32], strides = [1, 1]} : vector<4x128xf32> to vector<4x32xf32>
    %cst_181 = arith.constant 0.000000e+00 : f32
    %558 = vector.broadcast %cst_181 : f32 to vector<4x32xf32>
    %559 = arith.subf %558, %557 : vector<4x32xf32>
    %560 = math.exp %559 : vector<4x32xf32>
    %cst_182 = arith.constant 1.000000e+00 : f32
    %561 = vector.broadcast %cst_182 : f32 to vector<4x32xf32>
    %562 = arith.addf %561, %560 : vector<4x32xf32>
    %cst_183 = arith.constant 1.000000e+00 : f32
    %563 = vector.broadcast %cst_183 : f32 to vector<4x32xf32>
    %564 = arith.divf %563, %562 : vector<4x32xf32>
    %565 = vector.extract_strided_slice %545 {offsets = [0, 32], sizes = [4, 32], strides = [1, 1]} : vector<4x128xf32> to vector<4x32xf32>
    %cst_184 = arith.constant 0.000000e+00 : f32
    %566 = vector.broadcast %cst_184 : f32 to vector<4x32xf32>
    %567 = arith.subf %566, %565 : vector<4x32xf32>
    %568 = math.exp %567 : vector<4x32xf32>
    %cst_185 = arith.constant 1.000000e+00 : f32
    %569 = vector.broadcast %cst_185 : f32 to vector<4x32xf32>
    %570 = arith.addf %569, %568 : vector<4x32xf32>
    %cst_186 = arith.constant 1.000000e+00 : f32
    %571 = vector.broadcast %cst_186 : f32 to vector<4x32xf32>
    %572 = arith.divf %571, %570 : vector<4x32xf32>
    %573 = vector.extract_strided_slice %548 {offsets = [0, 32], sizes = [4, 32], strides = [1, 1]} : vector<4x128xf32> to vector<4x32xf32>
    %cst_187 = arith.constant 0.000000e+00 : f32
    %574 = vector.broadcast %cst_187 : f32 to vector<4x32xf32>
    %575 = arith.subf %574, %573 : vector<4x32xf32>
    %576 = math.exp %575 : vector<4x32xf32>
    %cst_188 = arith.constant 1.000000e+00 : f32
    %577 = vector.broadcast %cst_188 : f32 to vector<4x32xf32>
    %578 = arith.addf %577, %576 : vector<4x32xf32>
    %cst_189 = arith.constant 1.000000e+00 : f32
    %579 = vector.broadcast %cst_189 : f32 to vector<4x32xf32>
    %580 = arith.divf %579, %578 : vector<4x32xf32>
    %581 = vector.extract_strided_slice %545 {offsets = [0, 64], sizes = [4, 32], strides = [1, 1]} : vector<4x128xf32> to vector<4x32xf32>
    %582 = math.tanh %581 : vector<4x32xf32>
    %583 = vector.extract_strided_slice %548 {offsets = [0, 64], sizes = [4, 32], strides = [1, 1]} : vector<4x128xf32> to vector<4x32xf32>
    %584 = math.tanh %583 : vector<4x32xf32>
    %585 = vector.extract_strided_slice %545 {offsets = [0, 96], sizes = [4, 32], strides = [1, 1]} : vector<4x128xf32> to vector<4x32xf32>
    %cst_190 = arith.constant 0.000000e+00 : f32
    %586 = vector.broadcast %cst_190 : f32 to vector<4x32xf32>
    %587 = arith.subf %586, %585 : vector<4x32xf32>
    %588 = math.exp %587 : vector<4x32xf32>
    %cst_191 = arith.constant 1.000000e+00 : f32
    %589 = vector.broadcast %cst_191 : f32 to vector<4x32xf32>
    %590 = arith.addf %589, %588 : vector<4x32xf32>
    %cst_192 = arith.constant 1.000000e+00 : f32
    %591 = vector.broadcast %cst_192 : f32 to vector<4x32xf32>
    %592 = arith.divf %591, %590 : vector<4x32xf32>
    %593 = vector.extract_strided_slice %548 {offsets = [0, 96], sizes = [4, 32], strides = [1, 1]} : vector<4x128xf32> to vector<4x32xf32>
    %cst_193 = arith.constant 0.000000e+00 : f32
    %594 = vector.broadcast %cst_193 : f32 to vector<4x32xf32>
    %595 = arith.subf %594, %593 : vector<4x32xf32>
    %596 = math.exp %595 : vector<4x32xf32>
    %cst_194 = arith.constant 1.000000e+00 : f32
    %597 = vector.broadcast %cst_194 : f32 to vector<4x32xf32>
    %598 = arith.addf %597, %596 : vector<4x32xf32>
    %cst_195 = arith.constant 1.000000e+00 : f32
    %599 = vector.broadcast %cst_195 : f32 to vector<4x32xf32>
    %600 = arith.divf %599, %598 : vector<4x32xf32>
    %601 = arith.mulf %572, %527 : vector<4x32xf32>
    %602 = arith.mulf %556, %582 : vector<4x32xf32>
    %603 = arith.addf %601, %602 : vector<4x32xf32>
    %604 = arith.mulf %580, %530 : vector<4x32xf32>
    %605 = arith.mulf %564, %584 : vector<4x32xf32>
    %606 = arith.addf %604, %605 : vector<4x32xf32>
    %607 = math.tanh %603 : vector<4x32xf32>
    %608 = arith.mulf %592, %607 : vector<4x32xf32>
    %609 = math.tanh %606 : vector<4x32xf32>
    %610 = arith.mulf %600, %609 : vector<4x32xf32>
    %c7_196 = arith.constant 7 : index
    %c0_197 = arith.constant 0 : index
    %c0_198 = arith.constant 0 : index
    %611 = vector.load %arg4[%c7_196, %c0_197, %c0_198] : memref<8x4x64xf32, #tpu.memory_space<vmem>>, vector<1x4x32xf32>
    %612 = vector.shape_cast %611 : vector<1x4x32xf32> to vector<4x32xf32>
    %613 = vector.shape_cast %608 : vector<4x32xf32> to vector<1x4x32xf32>
    tpu.vector_store %arg4[%c7_196, %c0_197, %c0_198], %613 {strides = array<i32>} : memref<8x4x64xf32, #tpu.memory_space<vmem>>, vector<1x4x32xf32>,
    %c0_199 = arith.constant 0 : index
    %c0_200 = arith.constant 0 : index
    %c32_201 = arith.constant 32 : index
    %614 = vector.load %arg4[%c0_199, %c0_200, %c32_201] : memref<8x4x64xf32, #tpu.memory_space<vmem>>, vector<1x4x32xf32>
    %615 = vector.shape_cast %614 : vector<1x4x32xf32> to vector<4x32xf32>
    %616 = vector.shape_cast %610 : vector<4x32xf32> to vector<1x4x32xf32>
    tpu.vector_store %arg4[%c0_199, %c0_200, %c32_201], %616 {strides = array<i32>} : memref<8x4x64xf32, #tpu.memory_space<vmem>>, vector<1x4x32xf32>,
    return
  }
}

module attributes {stable_mosaic.version = 11 : i64} {
  func.func @_bilstm_layer_kernel(%arg0: memref<32x64xf32, #tpu.memory_space<vmem>>, %arg1: memref<64x256xf32, #tpu.memory_space<vmem>>, %arg2: memref<64x256xf32, #tpu.memory_space<vmem>>, %arg3: memref<1x256xf32, #tpu.memory_space<vmem>>, %arg4: memref<4x64xf32, #tpu.memory_space<vmem>>) attributes {dimension_semantics = [], scalar_prefetch = 0 : i64, scratch_operands = 0 : i64, tpu.core_type = #tpu.core_type<tc>} {
    %c0 = arith.constant 0 : index
    %c0_0 = arith.constant 0 : index
    %0 = vector.load %arg0[%c0, %c0_0] : memref<32x64xf32, #tpu.memory_space<vmem>>, vector<32x64xf32>
    %c0_1 = arith.constant 0 : index
    %c0_2 = arith.constant 0 : index
    %1 = vector.load %arg1[%c0_1, %c0_2] : memref<64x256xf32, #tpu.memory_space<vmem>>, vector<64x256xf32>
    %cst = arith.constant dense<0.000000e+00> : vector<32x256xf32>
    %2 = tpu.matmul %0, %1, %cst {dimension_numbers = #tpu.dot_dimension_numbers<[1], [0], [0], [1], [0, 0, 1, 1], [], []>} : vector<32x64xf32>, vector<64x256xf32>, vector<32x256xf32> -> vector<32x256xf32>
    %c0_3 = arith.constant 0 : index
    %c0_4 = arith.constant 0 : index
    %3 = vector.load %arg3[%c0_3, %c0_4] : memref<1x256xf32, #tpu.memory_space<vmem>>, vector<1x256xf32>
    %4 = vector.broadcast %3 : vector<1x256xf32> to vector<32x256xf32>
    %5 = arith.addf %2, %4 : vector<32x256xf32>
    %c0_5 = arith.constant 0 : index
    %c0_6 = arith.constant 0 : index
    %6 = vector.load %arg2[%c0_5, %c0_6] : memref<64x256xf32, #tpu.memory_space<vmem>>, vector<64x256xf32>
    %cst_7 = arith.constant 0.000000e+00 : f32
    %7 = vector.broadcast %cst_7 : f32 to vector<4x64xf32>
    %cst_8 = arith.constant 0.000000e+00 : f32
    %8 = vector.broadcast %cst_8 : f32 to vector<4x32xf32>
    %cst_9 = arith.constant 0.000000e+00 : f32
    %9 = vector.broadcast %cst_9 : f32 to vector<4x32xf32>
    %cst_10 = arith.constant dense<0.000000e+00> : vector<4x256xf32>
    %10 = tpu.matmul %7, %6, %cst_10 {dimension_numbers = #tpu.dot_dimension_numbers<[1], [0], [0], [1], [0, 0, 1, 1], [], []>} : vector<4x64xf32>, vector<64x256xf32>, vector<4x256xf32> -> vector<4x256xf32>
    %11 = vector.extract_strided_slice %5 {offsets = [0, 0], sizes = [4, 128], strides = [1, 1]} : vector<32x256xf32> to vector<4x128xf32>
    %12 = vector.extract_strided_slice %10 {offsets = [0, 0], sizes = [4, 128], strides = [1, 1]} : vector<4x256xf32> to vector<4x128xf32>
    %13 = arith.addf %11, %12 : vector<4x128xf32>
    %14 = vector.extract_strided_slice %5 {offsets = [28, 128], sizes = [4, 128], strides = [1, 1]} : vector<32x256xf32> to vector<4x128xf32>
    %15 = vector.extract_strided_slice %10 {offsets = [0, 128], sizes = [4, 128], strides = [1, 1]} : vector<4x256xf32> to vector<4x128xf32>
    %16 = arith.addf %14, %15 : vector<4x128xf32>
    %17 = vector.extract_strided_slice %13 {offsets = [0, 0], sizes = [4, 32], strides = [1, 1]} : vector<4x128xf32> to vector<4x32xf32>
    %cst_11 = arith.constant 0.000000e+00 : f32
    %18 = vector.broadcast %cst_11 : f32 to vector<4x32xf32>
    %19 = arith.subf %18, %17 : vector<4x32xf32>
    %20 = math.exp %19 : vector<4x32xf32>
    %cst_12 = arith.constant 1.000000e+00 : f32
    %21 = vector.broadcast %cst_12 : f32 to vector<4x32xf32>
    %22 = arith.addf %21, %20 : vector<4x32xf32>
    %cst_13 = arith.constant 1.000000e+00 : f32
    %23 = vector.broadcast %cst_13 : f32 to vector<4x32xf32>
    %24 = arith.divf %23, %22 : vector<4x32xf32>
    %25 = vector.extract_strided_slice %16 {offsets = [0, 0], sizes = [4, 32], strides = [1, 1]} : vector<4x128xf32> to vector<4x32xf32>
    %cst_14 = arith.constant 0.000000e+00 : f32
    %26 = vector.broadcast %cst_14 : f32 to vector<4x32xf32>
    %27 = arith.subf %26, %25 : vector<4x32xf32>
    %28 = math.exp %27 : vector<4x32xf32>
    %cst_15 = arith.constant 1.000000e+00 : f32
    %29 = vector.broadcast %cst_15 : f32 to vector<4x32xf32>
    %30 = arith.addf %29, %28 : vector<4x32xf32>
    %cst_16 = arith.constant 1.000000e+00 : f32
    %31 = vector.broadcast %cst_16 : f32 to vector<4x32xf32>
    %32 = arith.divf %31, %30 : vector<4x32xf32>
    %33 = vector.extract_strided_slice %13 {offsets = [0, 32], sizes = [4, 32], strides = [1, 1]} : vector<4x128xf32> to vector<4x32xf32>
    %cst_17 = arith.constant 0.000000e+00 : f32
    %34 = vector.broadcast %cst_17 : f32 to vector<4x32xf32>
    %35 = arith.subf %34, %33 : vector<4x32xf32>
    %36 = math.exp %35 : vector<4x32xf32>
    %cst_18 = arith.constant 1.000000e+00 : f32
    %37 = vector.broadcast %cst_18 : f32 to vector<4x32xf32>
    %38 = arith.addf %37, %36 : vector<4x32xf32>
    %cst_19 = arith.constant 1.000000e+00 : f32
    %39 = vector.broadcast %cst_19 : f32 to vector<4x32xf32>
    %40 = arith.divf %39, %38 : vector<4x32xf32>
    %41 = vector.extract_strided_slice %16 {offsets = [0, 32], sizes = [4, 32], strides = [1, 1]} : vector<4x128xf32> to vector<4x32xf32>
    %cst_20 = arith.constant 0.000000e+00 : f32
    %42 = vector.broadcast %cst_20 : f32 to vector<4x32xf32>
    %43 = arith.subf %42, %41 : vector<4x32xf32>
    %44 = math.exp %43 : vector<4x32xf32>
    %cst_21 = arith.constant 1.000000e+00 : f32
    %45 = vector.broadcast %cst_21 : f32 to vector<4x32xf32>
    %46 = arith.addf %45, %44 : vector<4x32xf32>
    %cst_22 = arith.constant 1.000000e+00 : f32
    %47 = vector.broadcast %cst_22 : f32 to vector<4x32xf32>
    %48 = arith.divf %47, %46 : vector<4x32xf32>
    %49 = vector.extract_strided_slice %13 {offsets = [0, 64], sizes = [4, 32], strides = [1, 1]} : vector<4x128xf32> to vector<4x32xf32>
    %50 = math.tanh %49 : vector<4x32xf32>
    %51 = vector.extract_strided_slice %16 {offsets = [0, 64], sizes = [4, 32], strides = [1, 1]} : vector<4x128xf32> to vector<4x32xf32>
    %52 = math.tanh %51 : vector<4x32xf32>
    %53 = vector.extract_strided_slice %13 {offsets = [0, 96], sizes = [4, 32], strides = [1, 1]} : vector<4x128xf32> to vector<4x32xf32>
    %cst_23 = arith.constant 0.000000e+00 : f32
    %54 = vector.broadcast %cst_23 : f32 to vector<4x32xf32>
    %55 = arith.subf %54, %53 : vector<4x32xf32>
    %56 = math.exp %55 : vector<4x32xf32>
    %cst_24 = arith.constant 1.000000e+00 : f32
    %57 = vector.broadcast %cst_24 : f32 to vector<4x32xf32>
    %58 = arith.addf %57, %56 : vector<4x32xf32>
    %cst_25 = arith.constant 1.000000e+00 : f32
    %59 = vector.broadcast %cst_25 : f32 to vector<4x32xf32>
    %60 = arith.divf %59, %58 : vector<4x32xf32>
    %61 = vector.extract_strided_slice %16 {offsets = [0, 96], sizes = [4, 32], strides = [1, 1]} : vector<4x128xf32> to vector<4x32xf32>
    %cst_26 = arith.constant 0.000000e+00 : f32
    %62 = vector.broadcast %cst_26 : f32 to vector<4x32xf32>
    %63 = arith.subf %62, %61 : vector<4x32xf32>
    %64 = math.exp %63 : vector<4x32xf32>
    %cst_27 = arith.constant 1.000000e+00 : f32
    %65 = vector.broadcast %cst_27 : f32 to vector<4x32xf32>
    %66 = arith.addf %65, %64 : vector<4x32xf32>
    %cst_28 = arith.constant 1.000000e+00 : f32
    %67 = vector.broadcast %cst_28 : f32 to vector<4x32xf32>
    %68 = arith.divf %67, %66 : vector<4x32xf32>
    %69 = arith.mulf %40, %8 : vector<4x32xf32>
    %70 = arith.mulf %24, %50 : vector<4x32xf32>
    %71 = arith.addf %69, %70 : vector<4x32xf32>
    %72 = arith.mulf %48, %9 : vector<4x32xf32>
    %73 = arith.mulf %32, %52 : vector<4x32xf32>
    %74 = arith.addf %72, %73 : vector<4x32xf32>
    %75 = math.tanh %71 : vector<4x32xf32>
    %76 = arith.mulf %60, %75 : vector<4x32xf32>
    %77 = math.tanh %74 : vector<4x32xf32>
    %78 = arith.mulf %68, %77 : vector<4x32xf32>
    %79 = tpu.concatenate %76, %78 in 1 : vector<4x32xf32>, vector<4x32xf32> -> vector<4x64xf32>
    %cst_29 = arith.constant dense<0.000000e+00> : vector<4x256xf32>
    %80 = tpu.matmul %79, %6, %cst_29 {dimension_numbers = #tpu.dot_dimension_numbers<[1], [0], [0], [1], [0, 0, 1, 1], [], []>} : vector<4x64xf32>, vector<64x256xf32>, vector<4x256xf32> -> vector<4x256xf32>
    %81 = vector.extract_strided_slice %5 {offsets = [4, 0], sizes = [4, 128], strides = [1, 1]} : vector<32x256xf32> to vector<4x128xf32>
    %82 = vector.extract_strided_slice %80 {offsets = [0, 0], sizes = [4, 128], strides = [1, 1]} : vector<4x256xf32> to vector<4x128xf32>
    %83 = arith.addf %81, %82 : vector<4x128xf32>
    %84 = vector.extract_strided_slice %5 {offsets = [24, 128], sizes = [4, 128], strides = [1, 1]} : vector<32x256xf32> to vector<4x128xf32>
    %85 = vector.extract_strided_slice %80 {offsets = [0, 128], sizes = [4, 128], strides = [1, 1]} : vector<4x256xf32> to vector<4x128xf32>
    %86 = arith.addf %84, %85 : vector<4x128xf32>
    %87 = vector.extract_strided_slice %83 {offsets = [0, 0], sizes = [4, 32], strides = [1, 1]} : vector<4x128xf32> to vector<4x32xf32>
    %cst_30 = arith.constant 0.000000e+00 : f32
    %88 = vector.broadcast %cst_30 : f32 to vector<4x32xf32>
    %89 = arith.subf %88, %87 : vector<4x32xf32>
    %90 = math.exp %89 : vector<4x32xf32>
    %cst_31 = arith.constant 1.000000e+00 : f32
    %91 = vector.broadcast %cst_31 : f32 to vector<4x32xf32>
    %92 = arith.addf %91, %90 : vector<4x32xf32>
    %cst_32 = arith.constant 1.000000e+00 : f32
    %93 = vector.broadcast %cst_32 : f32 to vector<4x32xf32>
    %94 = arith.divf %93, %92 : vector<4x32xf32>
    %95 = vector.extract_strided_slice %86 {offsets = [0, 0], sizes = [4, 32], strides = [1, 1]} : vector<4x128xf32> to vector<4x32xf32>
    %cst_33 = arith.constant 0.000000e+00 : f32
    %96 = vector.broadcast %cst_33 : f32 to vector<4x32xf32>
    %97 = arith.subf %96, %95 : vector<4x32xf32>
    %98 = math.exp %97 : vector<4x32xf32>
    %cst_34 = arith.constant 1.000000e+00 : f32
    %99 = vector.broadcast %cst_34 : f32 to vector<4x32xf32>
    %100 = arith.addf %99, %98 : vector<4x32xf32>
    %cst_35 = arith.constant 1.000000e+00 : f32
    %101 = vector.broadcast %cst_35 : f32 to vector<4x32xf32>
    %102 = arith.divf %101, %100 : vector<4x32xf32>
    %103 = vector.extract_strided_slice %83 {offsets = [0, 32], sizes = [4, 32], strides = [1, 1]} : vector<4x128xf32> to vector<4x32xf32>
    %cst_36 = arith.constant 0.000000e+00 : f32
    %104 = vector.broadcast %cst_36 : f32 to vector<4x32xf32>
    %105 = arith.subf %104, %103 : vector<4x32xf32>
    %106 = math.exp %105 : vector<4x32xf32>
    %cst_37 = arith.constant 1.000000e+00 : f32
    %107 = vector.broadcast %cst_37 : f32 to vector<4x32xf32>
    %108 = arith.addf %107, %106 : vector<4x32xf32>
    %cst_38 = arith.constant 1.000000e+00 : f32
    %109 = vector.broadcast %cst_38 : f32 to vector<4x32xf32>
    %110 = arith.divf %109, %108 : vector<4x32xf32>
    %111 = vector.extract_strided_slice %86 {offsets = [0, 32], sizes = [4, 32], strides = [1, 1]} : vector<4x128xf32> to vector<4x32xf32>
    %cst_39 = arith.constant 0.000000e+00 : f32
    %112 = vector.broadcast %cst_39 : f32 to vector<4x32xf32>
    %113 = arith.subf %112, %111 : vector<4x32xf32>
    %114 = math.exp %113 : vector<4x32xf32>
    %cst_40 = arith.constant 1.000000e+00 : f32
    %115 = vector.broadcast %cst_40 : f32 to vector<4x32xf32>
    %116 = arith.addf %115, %114 : vector<4x32xf32>
    %cst_41 = arith.constant 1.000000e+00 : f32
    %117 = vector.broadcast %cst_41 : f32 to vector<4x32xf32>
    %118 = arith.divf %117, %116 : vector<4x32xf32>
    %119 = vector.extract_strided_slice %83 {offsets = [0, 64], sizes = [4, 32], strides = [1, 1]} : vector<4x128xf32> to vector<4x32xf32>
    %120 = math.tanh %119 : vector<4x32xf32>
    %121 = vector.extract_strided_slice %86 {offsets = [0, 64], sizes = [4, 32], strides = [1, 1]} : vector<4x128xf32> to vector<4x32xf32>
    %122 = math.tanh %121 : vector<4x32xf32>
    %123 = vector.extract_strided_slice %83 {offsets = [0, 96], sizes = [4, 32], strides = [1, 1]} : vector<4x128xf32> to vector<4x32xf32>
    %cst_42 = arith.constant 0.000000e+00 : f32
    %124 = vector.broadcast %cst_42 : f32 to vector<4x32xf32>
    %125 = arith.subf %124, %123 : vector<4x32xf32>
    %126 = math.exp %125 : vector<4x32xf32>
    %cst_43 = arith.constant 1.000000e+00 : f32
    %127 = vector.broadcast %cst_43 : f32 to vector<4x32xf32>
    %128 = arith.addf %127, %126 : vector<4x32xf32>
    %cst_44 = arith.constant 1.000000e+00 : f32
    %129 = vector.broadcast %cst_44 : f32 to vector<4x32xf32>
    %130 = arith.divf %129, %128 : vector<4x32xf32>
    %131 = vector.extract_strided_slice %86 {offsets = [0, 96], sizes = [4, 32], strides = [1, 1]} : vector<4x128xf32> to vector<4x32xf32>
    %cst_45 = arith.constant 0.000000e+00 : f32
    %132 = vector.broadcast %cst_45 : f32 to vector<4x32xf32>
    %133 = arith.subf %132, %131 : vector<4x32xf32>
    %134 = math.exp %133 : vector<4x32xf32>
    %cst_46 = arith.constant 1.000000e+00 : f32
    %135 = vector.broadcast %cst_46 : f32 to vector<4x32xf32>
    %136 = arith.addf %135, %134 : vector<4x32xf32>
    %cst_47 = arith.constant 1.000000e+00 : f32
    %137 = vector.broadcast %cst_47 : f32 to vector<4x32xf32>
    %138 = arith.divf %137, %136 : vector<4x32xf32>
    %139 = arith.mulf %110, %71 : vector<4x32xf32>
    %140 = arith.mulf %94, %120 : vector<4x32xf32>
    %141 = arith.addf %139, %140 : vector<4x32xf32>
    %142 = arith.mulf %118, %74 : vector<4x32xf32>
    %143 = arith.mulf %102, %122 : vector<4x32xf32>
    %144 = arith.addf %142, %143 : vector<4x32xf32>
    %145 = math.tanh %141 : vector<4x32xf32>
    %146 = arith.mulf %130, %145 : vector<4x32xf32>
    %147 = math.tanh %144 : vector<4x32xf32>
    %148 = arith.mulf %138, %147 : vector<4x32xf32>
    %149 = tpu.concatenate %146, %148 in 1 : vector<4x32xf32>, vector<4x32xf32> -> vector<4x64xf32>
    %cst_48 = arith.constant dense<0.000000e+00> : vector<4x256xf32>
    %150 = tpu.matmul %149, %6, %cst_48 {dimension_numbers = #tpu.dot_dimension_numbers<[1], [0], [0], [1], [0, 0, 1, 1], [], []>} : vector<4x64xf32>, vector<64x256xf32>, vector<4x256xf32> -> vector<4x256xf32>
    %151 = vector.extract_strided_slice %5 {offsets = [8, 0], sizes = [4, 128], strides = [1, 1]} : vector<32x256xf32> to vector<4x128xf32>
    %152 = vector.extract_strided_slice %150 {offsets = [0, 0], sizes = [4, 128], strides = [1, 1]} : vector<4x256xf32> to vector<4x128xf32>
    %153 = arith.addf %151, %152 : vector<4x128xf32>
    %154 = vector.extract_strided_slice %5 {offsets = [20, 128], sizes = [4, 128], strides = [1, 1]} : vector<32x256xf32> to vector<4x128xf32>
    %155 = vector.extract_strided_slice %150 {offsets = [0, 128], sizes = [4, 128], strides = [1, 1]} : vector<4x256xf32> to vector<4x128xf32>
    %156 = arith.addf %154, %155 : vector<4x128xf32>
    %157 = vector.extract_strided_slice %153 {offsets = [0, 0], sizes = [4, 32], strides = [1, 1]} : vector<4x128xf32> to vector<4x32xf32>
    %cst_49 = arith.constant 0.000000e+00 : f32
    %158 = vector.broadcast %cst_49 : f32 to vector<4x32xf32>
    %159 = arith.subf %158, %157 : vector<4x32xf32>
    %160 = math.exp %159 : vector<4x32xf32>
    %cst_50 = arith.constant 1.000000e+00 : f32
    %161 = vector.broadcast %cst_50 : f32 to vector<4x32xf32>
    %162 = arith.addf %161, %160 : vector<4x32xf32>
    %cst_51 = arith.constant 1.000000e+00 : f32
    %163 = vector.broadcast %cst_51 : f32 to vector<4x32xf32>
    %164 = arith.divf %163, %162 : vector<4x32xf32>
    %165 = vector.extract_strided_slice %156 {offsets = [0, 0], sizes = [4, 32], strides = [1, 1]} : vector<4x128xf32> to vector<4x32xf32>
    %cst_52 = arith.constant 0.000000e+00 : f32
    %166 = vector.broadcast %cst_52 : f32 to vector<4x32xf32>
    %167 = arith.subf %166, %165 : vector<4x32xf32>
    %168 = math.exp %167 : vector<4x32xf32>
    %cst_53 = arith.constant 1.000000e+00 : f32
    %169 = vector.broadcast %cst_53 : f32 to vector<4x32xf32>
    %170 = arith.addf %169, %168 : vector<4x32xf32>
    %cst_54 = arith.constant 1.000000e+00 : f32
    %171 = vector.broadcast %cst_54 : f32 to vector<4x32xf32>
    %172 = arith.divf %171, %170 : vector<4x32xf32>
    %173 = vector.extract_strided_slice %153 {offsets = [0, 32], sizes = [4, 32], strides = [1, 1]} : vector<4x128xf32> to vector<4x32xf32>
    %cst_55 = arith.constant 0.000000e+00 : f32
    %174 = vector.broadcast %cst_55 : f32 to vector<4x32xf32>
    %175 = arith.subf %174, %173 : vector<4x32xf32>
    %176 = math.exp %175 : vector<4x32xf32>
    %cst_56 = arith.constant 1.000000e+00 : f32
    %177 = vector.broadcast %cst_56 : f32 to vector<4x32xf32>
    %178 = arith.addf %177, %176 : vector<4x32xf32>
    %cst_57 = arith.constant 1.000000e+00 : f32
    %179 = vector.broadcast %cst_57 : f32 to vector<4x32xf32>
    %180 = arith.divf %179, %178 : vector<4x32xf32>
    %181 = vector.extract_strided_slice %156 {offsets = [0, 32], sizes = [4, 32], strides = [1, 1]} : vector<4x128xf32> to vector<4x32xf32>
    %cst_58 = arith.constant 0.000000e+00 : f32
    %182 = vector.broadcast %cst_58 : f32 to vector<4x32xf32>
    %183 = arith.subf %182, %181 : vector<4x32xf32>
    %184 = math.exp %183 : vector<4x32xf32>
    %cst_59 = arith.constant 1.000000e+00 : f32
    %185 = vector.broadcast %cst_59 : f32 to vector<4x32xf32>
    %186 = arith.addf %185, %184 : vector<4x32xf32>
    %cst_60 = arith.constant 1.000000e+00 : f32
    %187 = vector.broadcast %cst_60 : f32 to vector<4x32xf32>
    %188 = arith.divf %187, %186 : vector<4x32xf32>
    %189 = vector.extract_strided_slice %153 {offsets = [0, 64], sizes = [4, 32], strides = [1, 1]} : vector<4x128xf32> to vector<4x32xf32>
    %190 = math.tanh %189 : vector<4x32xf32>
    %191 = vector.extract_strided_slice %156 {offsets = [0, 64], sizes = [4, 32], strides = [1, 1]} : vector<4x128xf32> to vector<4x32xf32>
    %192 = math.tanh %191 : vector<4x32xf32>
    %193 = vector.extract_strided_slice %153 {offsets = [0, 96], sizes = [4, 32], strides = [1, 1]} : vector<4x128xf32> to vector<4x32xf32>
    %cst_61 = arith.constant 0.000000e+00 : f32
    %194 = vector.broadcast %cst_61 : f32 to vector<4x32xf32>
    %195 = arith.subf %194, %193 : vector<4x32xf32>
    %196 = math.exp %195 : vector<4x32xf32>
    %cst_62 = arith.constant 1.000000e+00 : f32
    %197 = vector.broadcast %cst_62 : f32 to vector<4x32xf32>
    %198 = arith.addf %197, %196 : vector<4x32xf32>
    %cst_63 = arith.constant 1.000000e+00 : f32
    %199 = vector.broadcast %cst_63 : f32 to vector<4x32xf32>
    %200 = arith.divf %199, %198 : vector<4x32xf32>
    %201 = vector.extract_strided_slice %156 {offsets = [0, 96], sizes = [4, 32], strides = [1, 1]} : vector<4x128xf32> to vector<4x32xf32>
    %cst_64 = arith.constant 0.000000e+00 : f32
    %202 = vector.broadcast %cst_64 : f32 to vector<4x32xf32>
    %203 = arith.subf %202, %201 : vector<4x32xf32>
    %204 = math.exp %203 : vector<4x32xf32>
    %cst_65 = arith.constant 1.000000e+00 : f32
    %205 = vector.broadcast %cst_65 : f32 to vector<4x32xf32>
    %206 = arith.addf %205, %204 : vector<4x32xf32>
    %cst_66 = arith.constant 1.000000e+00 : f32
    %207 = vector.broadcast %cst_66 : f32 to vector<4x32xf32>
    %208 = arith.divf %207, %206 : vector<4x32xf32>
    %209 = arith.mulf %180, %141 : vector<4x32xf32>
    %210 = arith.mulf %164, %190 : vector<4x32xf32>
    %211 = arith.addf %209, %210 : vector<4x32xf32>
    %212 = arith.mulf %188, %144 : vector<4x32xf32>
    %213 = arith.mulf %172, %192 : vector<4x32xf32>
    %214 = arith.addf %212, %213 : vector<4x32xf32>
    %215 = math.tanh %211 : vector<4x32xf32>
    %216 = arith.mulf %200, %215 : vector<4x32xf32>
    %217 = math.tanh %214 : vector<4x32xf32>
    %218 = arith.mulf %208, %217 : vector<4x32xf32>
    %219 = tpu.concatenate %216, %218 in 1 : vector<4x32xf32>, vector<4x32xf32> -> vector<4x64xf32>
    %cst_67 = arith.constant dense<0.000000e+00> : vector<4x256xf32>
    %220 = tpu.matmul %219, %6, %cst_67 {dimension_numbers = #tpu.dot_dimension_numbers<[1], [0], [0], [1], [0, 0, 1, 1], [], []>} : vector<4x64xf32>, vector<64x256xf32>, vector<4x256xf32> -> vector<4x256xf32>
    %221 = vector.extract_strided_slice %5 {offsets = [12, 0], sizes = [4, 128], strides = [1, 1]} : vector<32x256xf32> to vector<4x128xf32>
    %222 = vector.extract_strided_slice %220 {offsets = [0, 0], sizes = [4, 128], strides = [1, 1]} : vector<4x256xf32> to vector<4x128xf32>
    %223 = arith.addf %221, %222 : vector<4x128xf32>
    %224 = vector.extract_strided_slice %5 {offsets = [16, 128], sizes = [4, 128], strides = [1, 1]} : vector<32x256xf32> to vector<4x128xf32>
    %225 = vector.extract_strided_slice %220 {offsets = [0, 128], sizes = [4, 128], strides = [1, 1]} : vector<4x256xf32> to vector<4x128xf32>
    %226 = arith.addf %224, %225 : vector<4x128xf32>
    %227 = vector.extract_strided_slice %223 {offsets = [0, 0], sizes = [4, 32], strides = [1, 1]} : vector<4x128xf32> to vector<4x32xf32>
    %cst_68 = arith.constant 0.000000e+00 : f32
    %228 = vector.broadcast %cst_68 : f32 to vector<4x32xf32>
    %229 = arith.subf %228, %227 : vector<4x32xf32>
    %230 = math.exp %229 : vector<4x32xf32>
    %cst_69 = arith.constant 1.000000e+00 : f32
    %231 = vector.broadcast %cst_69 : f32 to vector<4x32xf32>
    %232 = arith.addf %231, %230 : vector<4x32xf32>
    %cst_70 = arith.constant 1.000000e+00 : f32
    %233 = vector.broadcast %cst_70 : f32 to vector<4x32xf32>
    %234 = arith.divf %233, %232 : vector<4x32xf32>
    %235 = vector.extract_strided_slice %226 {offsets = [0, 0], sizes = [4, 32], strides = [1, 1]} : vector<4x128xf32> to vector<4x32xf32>
    %cst_71 = arith.constant 0.000000e+00 : f32
    %236 = vector.broadcast %cst_71 : f32 to vector<4x32xf32>
    %237 = arith.subf %236, %235 : vector<4x32xf32>
    %238 = math.exp %237 : vector<4x32xf32>
    %cst_72 = arith.constant 1.000000e+00 : f32
    %239 = vector.broadcast %cst_72 : f32 to vector<4x32xf32>
    %240 = arith.addf %239, %238 : vector<4x32xf32>
    %cst_73 = arith.constant 1.000000e+00 : f32
    %241 = vector.broadcast %cst_73 : f32 to vector<4x32xf32>
    %242 = arith.divf %241, %240 : vector<4x32xf32>
    %243 = vector.extract_strided_slice %223 {offsets = [0, 32], sizes = [4, 32], strides = [1, 1]} : vector<4x128xf32> to vector<4x32xf32>
    %cst_74 = arith.constant 0.000000e+00 : f32
    %244 = vector.broadcast %cst_74 : f32 to vector<4x32xf32>
    %245 = arith.subf %244, %243 : vector<4x32xf32>
    %246 = math.exp %245 : vector<4x32xf32>
    %cst_75 = arith.constant 1.000000e+00 : f32
    %247 = vector.broadcast %cst_75 : f32 to vector<4x32xf32>
    %248 = arith.addf %247, %246 : vector<4x32xf32>
    %cst_76 = arith.constant 1.000000e+00 : f32
    %249 = vector.broadcast %cst_76 : f32 to vector<4x32xf32>
    %250 = arith.divf %249, %248 : vector<4x32xf32>
    %251 = vector.extract_strided_slice %226 {offsets = [0, 32], sizes = [4, 32], strides = [1, 1]} : vector<4x128xf32> to vector<4x32xf32>
    %cst_77 = arith.constant 0.000000e+00 : f32
    %252 = vector.broadcast %cst_77 : f32 to vector<4x32xf32>
    %253 = arith.subf %252, %251 : vector<4x32xf32>
    %254 = math.exp %253 : vector<4x32xf32>
    %cst_78 = arith.constant 1.000000e+00 : f32
    %255 = vector.broadcast %cst_78 : f32 to vector<4x32xf32>
    %256 = arith.addf %255, %254 : vector<4x32xf32>
    %cst_79 = arith.constant 1.000000e+00 : f32
    %257 = vector.broadcast %cst_79 : f32 to vector<4x32xf32>
    %258 = arith.divf %257, %256 : vector<4x32xf32>
    %259 = vector.extract_strided_slice %223 {offsets = [0, 64], sizes = [4, 32], strides = [1, 1]} : vector<4x128xf32> to vector<4x32xf32>
    %260 = math.tanh %259 : vector<4x32xf32>
    %261 = vector.extract_strided_slice %226 {offsets = [0, 64], sizes = [4, 32], strides = [1, 1]} : vector<4x128xf32> to vector<4x32xf32>
    %262 = math.tanh %261 : vector<4x32xf32>
    %263 = vector.extract_strided_slice %223 {offsets = [0, 96], sizes = [4, 32], strides = [1, 1]} : vector<4x128xf32> to vector<4x32xf32>
    %cst_80 = arith.constant 0.000000e+00 : f32
    %264 = vector.broadcast %cst_80 : f32 to vector<4x32xf32>
    %265 = arith.subf %264, %263 : vector<4x32xf32>
    %266 = math.exp %265 : vector<4x32xf32>
    %cst_81 = arith.constant 1.000000e+00 : f32
    %267 = vector.broadcast %cst_81 : f32 to vector<4x32xf32>
    %268 = arith.addf %267, %266 : vector<4x32xf32>
    %cst_82 = arith.constant 1.000000e+00 : f32
    %269 = vector.broadcast %cst_82 : f32 to vector<4x32xf32>
    %270 = arith.divf %269, %268 : vector<4x32xf32>
    %271 = vector.extract_strided_slice %226 {offsets = [0, 96], sizes = [4, 32], strides = [1, 1]} : vector<4x128xf32> to vector<4x32xf32>
    %cst_83 = arith.constant 0.000000e+00 : f32
    %272 = vector.broadcast %cst_83 : f32 to vector<4x32xf32>
    %273 = arith.subf %272, %271 : vector<4x32xf32>
    %274 = math.exp %273 : vector<4x32xf32>
    %cst_84 = arith.constant 1.000000e+00 : f32
    %275 = vector.broadcast %cst_84 : f32 to vector<4x32xf32>
    %276 = arith.addf %275, %274 : vector<4x32xf32>
    %cst_85 = arith.constant 1.000000e+00 : f32
    %277 = vector.broadcast %cst_85 : f32 to vector<4x32xf32>
    %278 = arith.divf %277, %276 : vector<4x32xf32>
    %279 = arith.mulf %250, %211 : vector<4x32xf32>
    %280 = arith.mulf %234, %260 : vector<4x32xf32>
    %281 = arith.addf %279, %280 : vector<4x32xf32>
    %282 = arith.mulf %258, %214 : vector<4x32xf32>
    %283 = arith.mulf %242, %262 : vector<4x32xf32>
    %284 = arith.addf %282, %283 : vector<4x32xf32>
    %285 = math.tanh %281 : vector<4x32xf32>
    %286 = arith.mulf %270, %285 : vector<4x32xf32>
    %287 = math.tanh %284 : vector<4x32xf32>
    %288 = arith.mulf %278, %287 : vector<4x32xf32>
    %289 = tpu.concatenate %286, %288 in 1 : vector<4x32xf32>, vector<4x32xf32> -> vector<4x64xf32>
    %cst_86 = arith.constant dense<0.000000e+00> : vector<4x256xf32>
    %290 = tpu.matmul %289, %6, %cst_86 {dimension_numbers = #tpu.dot_dimension_numbers<[1], [0], [0], [1], [0, 0, 1, 1], [], []>} : vector<4x64xf32>, vector<64x256xf32>, vector<4x256xf32> -> vector<4x256xf32>
    %291 = vector.extract_strided_slice %5 {offsets = [16, 0], sizes = [4, 128], strides = [1, 1]} : vector<32x256xf32> to vector<4x128xf32>
    %292 = vector.extract_strided_slice %290 {offsets = [0, 0], sizes = [4, 128], strides = [1, 1]} : vector<4x256xf32> to vector<4x128xf32>
    %293 = arith.addf %291, %292 : vector<4x128xf32>
    %294 = vector.extract_strided_slice %5 {offsets = [12, 128], sizes = [4, 128], strides = [1, 1]} : vector<32x256xf32> to vector<4x128xf32>
    %295 = vector.extract_strided_slice %290 {offsets = [0, 128], sizes = [4, 128], strides = [1, 1]} : vector<4x256xf32> to vector<4x128xf32>
    %296 = arith.addf %294, %295 : vector<4x128xf32>
    %297 = vector.extract_strided_slice %293 {offsets = [0, 0], sizes = [4, 32], strides = [1, 1]} : vector<4x128xf32> to vector<4x32xf32>
    %cst_87 = arith.constant 0.000000e+00 : f32
    %298 = vector.broadcast %cst_87 : f32 to vector<4x32xf32>
    %299 = arith.subf %298, %297 : vector<4x32xf32>
    %300 = math.exp %299 : vector<4x32xf32>
    %cst_88 = arith.constant 1.000000e+00 : f32
    %301 = vector.broadcast %cst_88 : f32 to vector<4x32xf32>
    %302 = arith.addf %301, %300 : vector<4x32xf32>
    %cst_89 = arith.constant 1.000000e+00 : f32
    %303 = vector.broadcast %cst_89 : f32 to vector<4x32xf32>
    %304 = arith.divf %303, %302 : vector<4x32xf32>
    %305 = vector.extract_strided_slice %296 {offsets = [0, 0], sizes = [4, 32], strides = [1, 1]} : vector<4x128xf32> to vector<4x32xf32>
    %cst_90 = arith.constant 0.000000e+00 : f32
    %306 = vector.broadcast %cst_90 : f32 to vector<4x32xf32>
    %307 = arith.subf %306, %305 : vector<4x32xf32>
    %308 = math.exp %307 : vector<4x32xf32>
    %cst_91 = arith.constant 1.000000e+00 : f32
    %309 = vector.broadcast %cst_91 : f32 to vector<4x32xf32>
    %310 = arith.addf %309, %308 : vector<4x32xf32>
    %cst_92 = arith.constant 1.000000e+00 : f32
    %311 = vector.broadcast %cst_92 : f32 to vector<4x32xf32>
    %312 = arith.divf %311, %310 : vector<4x32xf32>
    %313 = vector.extract_strided_slice %293 {offsets = [0, 32], sizes = [4, 32], strides = [1, 1]} : vector<4x128xf32> to vector<4x32xf32>
    %cst_93 = arith.constant 0.000000e+00 : f32
    %314 = vector.broadcast %cst_93 : f32 to vector<4x32xf32>
    %315 = arith.subf %314, %313 : vector<4x32xf32>
    %316 = math.exp %315 : vector<4x32xf32>
    %cst_94 = arith.constant 1.000000e+00 : f32
    %317 = vector.broadcast %cst_94 : f32 to vector<4x32xf32>
    %318 = arith.addf %317, %316 : vector<4x32xf32>
    %cst_95 = arith.constant 1.000000e+00 : f32
    %319 = vector.broadcast %cst_95 : f32 to vector<4x32xf32>
    %320 = arith.divf %319, %318 : vector<4x32xf32>
    %321 = vector.extract_strided_slice %296 {offsets = [0, 32], sizes = [4, 32], strides = [1, 1]} : vector<4x128xf32> to vector<4x32xf32>
    %cst_96 = arith.constant 0.000000e+00 : f32
    %322 = vector.broadcast %cst_96 : f32 to vector<4x32xf32>
    %323 = arith.subf %322, %321 : vector<4x32xf32>
    %324 = math.exp %323 : vector<4x32xf32>
    %cst_97 = arith.constant 1.000000e+00 : f32
    %325 = vector.broadcast %cst_97 : f32 to vector<4x32xf32>
    %326 = arith.addf %325, %324 : vector<4x32xf32>
    %cst_98 = arith.constant 1.000000e+00 : f32
    %327 = vector.broadcast %cst_98 : f32 to vector<4x32xf32>
    %328 = arith.divf %327, %326 : vector<4x32xf32>
    %329 = vector.extract_strided_slice %293 {offsets = [0, 64], sizes = [4, 32], strides = [1, 1]} : vector<4x128xf32> to vector<4x32xf32>
    %330 = math.tanh %329 : vector<4x32xf32>
    %331 = vector.extract_strided_slice %296 {offsets = [0, 64], sizes = [4, 32], strides = [1, 1]} : vector<4x128xf32> to vector<4x32xf32>
    %332 = math.tanh %331 : vector<4x32xf32>
    %333 = vector.extract_strided_slice %293 {offsets = [0, 96], sizes = [4, 32], strides = [1, 1]} : vector<4x128xf32> to vector<4x32xf32>
    %cst_99 = arith.constant 0.000000e+00 : f32
    %334 = vector.broadcast %cst_99 : f32 to vector<4x32xf32>
    %335 = arith.subf %334, %333 : vector<4x32xf32>
    %336 = math.exp %335 : vector<4x32xf32>
    %cst_100 = arith.constant 1.000000e+00 : f32
    %337 = vector.broadcast %cst_100 : f32 to vector<4x32xf32>
    %338 = arith.addf %337, %336 : vector<4x32xf32>
    %cst_101 = arith.constant 1.000000e+00 : f32
    %339 = vector.broadcast %cst_101 : f32 to vector<4x32xf32>
    %340 = arith.divf %339, %338 : vector<4x32xf32>
    %341 = vector.extract_strided_slice %296 {offsets = [0, 96], sizes = [4, 32], strides = [1, 1]} : vector<4x128xf32> to vector<4x32xf32>
    %cst_102 = arith.constant 0.000000e+00 : f32
    %342 = vector.broadcast %cst_102 : f32 to vector<4x32xf32>
    %343 = arith.subf %342, %341 : vector<4x32xf32>
    %344 = math.exp %343 : vector<4x32xf32>
    %cst_103 = arith.constant 1.000000e+00 : f32
    %345 = vector.broadcast %cst_103 : f32 to vector<4x32xf32>
    %346 = arith.addf %345, %344 : vector<4x32xf32>
    %cst_104 = arith.constant 1.000000e+00 : f32
    %347 = vector.broadcast %cst_104 : f32 to vector<4x32xf32>
    %348 = arith.divf %347, %346 : vector<4x32xf32>
    %349 = arith.mulf %320, %281 : vector<4x32xf32>
    %350 = arith.mulf %304, %330 : vector<4x32xf32>
    %351 = arith.addf %349, %350 : vector<4x32xf32>
    %352 = arith.mulf %328, %284 : vector<4x32xf32>
    %353 = arith.mulf %312, %332 : vector<4x32xf32>
    %354 = arith.addf %352, %353 : vector<4x32xf32>
    %355 = math.tanh %351 : vector<4x32xf32>
    %356 = arith.mulf %340, %355 : vector<4x32xf32>
    %357 = math.tanh %354 : vector<4x32xf32>
    %358 = arith.mulf %348, %357 : vector<4x32xf32>
    %359 = tpu.concatenate %356, %358 in 1 : vector<4x32xf32>, vector<4x32xf32> -> vector<4x64xf32>
    %cst_105 = arith.constant dense<0.000000e+00> : vector<4x256xf32>
    %360 = tpu.matmul %359, %6, %cst_105 {dimension_numbers = #tpu.dot_dimension_numbers<[1], [0], [0], [1], [0, 0, 1, 1], [], []>} : vector<4x64xf32>, vector<64x256xf32>, vector<4x256xf32> -> vector<4x256xf32>
    %361 = vector.extract_strided_slice %5 {offsets = [20, 0], sizes = [4, 128], strides = [1, 1]} : vector<32x256xf32> to vector<4x128xf32>
    %362 = vector.extract_strided_slice %360 {offsets = [0, 0], sizes = [4, 128], strides = [1, 1]} : vector<4x256xf32> to vector<4x128xf32>
    %363 = arith.addf %361, %362 : vector<4x128xf32>
    %364 = vector.extract_strided_slice %5 {offsets = [8, 128], sizes = [4, 128], strides = [1, 1]} : vector<32x256xf32> to vector<4x128xf32>
    %365 = vector.extract_strided_slice %360 {offsets = [0, 128], sizes = [4, 128], strides = [1, 1]} : vector<4x256xf32> to vector<4x128xf32>
    %366 = arith.addf %364, %365 : vector<4x128xf32>
    %367 = vector.extract_strided_slice %363 {offsets = [0, 0], sizes = [4, 32], strides = [1, 1]} : vector<4x128xf32> to vector<4x32xf32>
    %cst_106 = arith.constant 0.000000e+00 : f32
    %368 = vector.broadcast %cst_106 : f32 to vector<4x32xf32>
    %369 = arith.subf %368, %367 : vector<4x32xf32>
    %370 = math.exp %369 : vector<4x32xf32>
    %cst_107 = arith.constant 1.000000e+00 : f32
    %371 = vector.broadcast %cst_107 : f32 to vector<4x32xf32>
    %372 = arith.addf %371, %370 : vector<4x32xf32>
    %cst_108 = arith.constant 1.000000e+00 : f32
    %373 = vector.broadcast %cst_108 : f32 to vector<4x32xf32>
    %374 = arith.divf %373, %372 : vector<4x32xf32>
    %375 = vector.extract_strided_slice %366 {offsets = [0, 0], sizes = [4, 32], strides = [1, 1]} : vector<4x128xf32> to vector<4x32xf32>
    %cst_109 = arith.constant 0.000000e+00 : f32
    %376 = vector.broadcast %cst_109 : f32 to vector<4x32xf32>
    %377 = arith.subf %376, %375 : vector<4x32xf32>
    %378 = math.exp %377 : vector<4x32xf32>
    %cst_110 = arith.constant 1.000000e+00 : f32
    %379 = vector.broadcast %cst_110 : f32 to vector<4x32xf32>
    %380 = arith.addf %379, %378 : vector<4x32xf32>
    %cst_111 = arith.constant 1.000000e+00 : f32
    %381 = vector.broadcast %cst_111 : f32 to vector<4x32xf32>
    %382 = arith.divf %381, %380 : vector<4x32xf32>
    %383 = vector.extract_strided_slice %363 {offsets = [0, 32], sizes = [4, 32], strides = [1, 1]} : vector<4x128xf32> to vector<4x32xf32>
    %cst_112 = arith.constant 0.000000e+00 : f32
    %384 = vector.broadcast %cst_112 : f32 to vector<4x32xf32>
    %385 = arith.subf %384, %383 : vector<4x32xf32>
    %386 = math.exp %385 : vector<4x32xf32>
    %cst_113 = arith.constant 1.000000e+00 : f32
    %387 = vector.broadcast %cst_113 : f32 to vector<4x32xf32>
    %388 = arith.addf %387, %386 : vector<4x32xf32>
    %cst_114 = arith.constant 1.000000e+00 : f32
    %389 = vector.broadcast %cst_114 : f32 to vector<4x32xf32>
    %390 = arith.divf %389, %388 : vector<4x32xf32>
    %391 = vector.extract_strided_slice %366 {offsets = [0, 32], sizes = [4, 32], strides = [1, 1]} : vector<4x128xf32> to vector<4x32xf32>
    %cst_115 = arith.constant 0.000000e+00 : f32
    %392 = vector.broadcast %cst_115 : f32 to vector<4x32xf32>
    %393 = arith.subf %392, %391 : vector<4x32xf32>
    %394 = math.exp %393 : vector<4x32xf32>
    %cst_116 = arith.constant 1.000000e+00 : f32
    %395 = vector.broadcast %cst_116 : f32 to vector<4x32xf32>
    %396 = arith.addf %395, %394 : vector<4x32xf32>
    %cst_117 = arith.constant 1.000000e+00 : f32
    %397 = vector.broadcast %cst_117 : f32 to vector<4x32xf32>
    %398 = arith.divf %397, %396 : vector<4x32xf32>
    %399 = vector.extract_strided_slice %363 {offsets = [0, 64], sizes = [4, 32], strides = [1, 1]} : vector<4x128xf32> to vector<4x32xf32>
    %400 = math.tanh %399 : vector<4x32xf32>
    %401 = vector.extract_strided_slice %366 {offsets = [0, 64], sizes = [4, 32], strides = [1, 1]} : vector<4x128xf32> to vector<4x32xf32>
    %402 = math.tanh %401 : vector<4x32xf32>
    %403 = vector.extract_strided_slice %363 {offsets = [0, 96], sizes = [4, 32], strides = [1, 1]} : vector<4x128xf32> to vector<4x32xf32>
    %cst_118 = arith.constant 0.000000e+00 : f32
    %404 = vector.broadcast %cst_118 : f32 to vector<4x32xf32>
    %405 = arith.subf %404, %403 : vector<4x32xf32>
    %406 = math.exp %405 : vector<4x32xf32>
    %cst_119 = arith.constant 1.000000e+00 : f32
    %407 = vector.broadcast %cst_119 : f32 to vector<4x32xf32>
    %408 = arith.addf %407, %406 : vector<4x32xf32>
    %cst_120 = arith.constant 1.000000e+00 : f32
    %409 = vector.broadcast %cst_120 : f32 to vector<4x32xf32>
    %410 = arith.divf %409, %408 : vector<4x32xf32>
    %411 = vector.extract_strided_slice %366 {offsets = [0, 96], sizes = [4, 32], strides = [1, 1]} : vector<4x128xf32> to vector<4x32xf32>
    %cst_121 = arith.constant 0.000000e+00 : f32
    %412 = vector.broadcast %cst_121 : f32 to vector<4x32xf32>
    %413 = arith.subf %412, %411 : vector<4x32xf32>
    %414 = math.exp %413 : vector<4x32xf32>
    %cst_122 = arith.constant 1.000000e+00 : f32
    %415 = vector.broadcast %cst_122 : f32 to vector<4x32xf32>
    %416 = arith.addf %415, %414 : vector<4x32xf32>
    %cst_123 = arith.constant 1.000000e+00 : f32
    %417 = vector.broadcast %cst_123 : f32 to vector<4x32xf32>
    %418 = arith.divf %417, %416 : vector<4x32xf32>
    %419 = arith.mulf %390, %351 : vector<4x32xf32>
    %420 = arith.mulf %374, %400 : vector<4x32xf32>
    %421 = arith.addf %419, %420 : vector<4x32xf32>
    %422 = arith.mulf %398, %354 : vector<4x32xf32>
    %423 = arith.mulf %382, %402 : vector<4x32xf32>
    %424 = arith.addf %422, %423 : vector<4x32xf32>
    %425 = math.tanh %421 : vector<4x32xf32>
    %426 = arith.mulf %410, %425 : vector<4x32xf32>
    %427 = math.tanh %424 : vector<4x32xf32>
    %428 = arith.mulf %418, %427 : vector<4x32xf32>
    %429 = tpu.concatenate %426, %428 in 1 : vector<4x32xf32>, vector<4x32xf32> -> vector<4x64xf32>
    %cst_124 = arith.constant dense<0.000000e+00> : vector<4x256xf32>
    %430 = tpu.matmul %429, %6, %cst_124 {dimension_numbers = #tpu.dot_dimension_numbers<[1], [0], [0], [1], [0, 0, 1, 1], [], []>} : vector<4x64xf32>, vector<64x256xf32>, vector<4x256xf32> -> vector<4x256xf32>
    %431 = vector.extract_strided_slice %5 {offsets = [24, 0], sizes = [4, 128], strides = [1, 1]} : vector<32x256xf32> to vector<4x128xf32>
    %432 = vector.extract_strided_slice %430 {offsets = [0, 0], sizes = [4, 128], strides = [1, 1]} : vector<4x256xf32> to vector<4x128xf32>
    %433 = arith.addf %431, %432 : vector<4x128xf32>
    %434 = vector.extract_strided_slice %5 {offsets = [4, 128], sizes = [4, 128], strides = [1, 1]} : vector<32x256xf32> to vector<4x128xf32>
    %435 = vector.extract_strided_slice %430 {offsets = [0, 128], sizes = [4, 128], strides = [1, 1]} : vector<4x256xf32> to vector<4x128xf32>
    %436 = arith.addf %434, %435 : vector<4x128xf32>
    %437 = vector.extract_strided_slice %433 {offsets = [0, 0], sizes = [4, 32], strides = [1, 1]} : vector<4x128xf32> to vector<4x32xf32>
    %cst_125 = arith.constant 0.000000e+00 : f32
    %438 = vector.broadcast %cst_125 : f32 to vector<4x32xf32>
    %439 = arith.subf %438, %437 : vector<4x32xf32>
    %440 = math.exp %439 : vector<4x32xf32>
    %cst_126 = arith.constant 1.000000e+00 : f32
    %441 = vector.broadcast %cst_126 : f32 to vector<4x32xf32>
    %442 = arith.addf %441, %440 : vector<4x32xf32>
    %cst_127 = arith.constant 1.000000e+00 : f32
    %443 = vector.broadcast %cst_127 : f32 to vector<4x32xf32>
    %444 = arith.divf %443, %442 : vector<4x32xf32>
    %445 = vector.extract_strided_slice %436 {offsets = [0, 0], sizes = [4, 32], strides = [1, 1]} : vector<4x128xf32> to vector<4x32xf32>
    %cst_128 = arith.constant 0.000000e+00 : f32
    %446 = vector.broadcast %cst_128 : f32 to vector<4x32xf32>
    %447 = arith.subf %446, %445 : vector<4x32xf32>
    %448 = math.exp %447 : vector<4x32xf32>
    %cst_129 = arith.constant 1.000000e+00 : f32
    %449 = vector.broadcast %cst_129 : f32 to vector<4x32xf32>
    %450 = arith.addf %449, %448 : vector<4x32xf32>
    %cst_130 = arith.constant 1.000000e+00 : f32
    %451 = vector.broadcast %cst_130 : f32 to vector<4x32xf32>
    %452 = arith.divf %451, %450 : vector<4x32xf32>
    %453 = vector.extract_strided_slice %433 {offsets = [0, 32], sizes = [4, 32], strides = [1, 1]} : vector<4x128xf32> to vector<4x32xf32>
    %cst_131 = arith.constant 0.000000e+00 : f32
    %454 = vector.broadcast %cst_131 : f32 to vector<4x32xf32>
    %455 = arith.subf %454, %453 : vector<4x32xf32>
    %456 = math.exp %455 : vector<4x32xf32>
    %cst_132 = arith.constant 1.000000e+00 : f32
    %457 = vector.broadcast %cst_132 : f32 to vector<4x32xf32>
    %458 = arith.addf %457, %456 : vector<4x32xf32>
    %cst_133 = arith.constant 1.000000e+00 : f32
    %459 = vector.broadcast %cst_133 : f32 to vector<4x32xf32>
    %460 = arith.divf %459, %458 : vector<4x32xf32>
    %461 = vector.extract_strided_slice %436 {offsets = [0, 32], sizes = [4, 32], strides = [1, 1]} : vector<4x128xf32> to vector<4x32xf32>
    %cst_134 = arith.constant 0.000000e+00 : f32
    %462 = vector.broadcast %cst_134 : f32 to vector<4x32xf32>
    %463 = arith.subf %462, %461 : vector<4x32xf32>
    %464 = math.exp %463 : vector<4x32xf32>
    %cst_135 = arith.constant 1.000000e+00 : f32
    %465 = vector.broadcast %cst_135 : f32 to vector<4x32xf32>
    %466 = arith.addf %465, %464 : vector<4x32xf32>
    %cst_136 = arith.constant 1.000000e+00 : f32
    %467 = vector.broadcast %cst_136 : f32 to vector<4x32xf32>
    %468 = arith.divf %467, %466 : vector<4x32xf32>
    %469 = vector.extract_strided_slice %433 {offsets = [0, 64], sizes = [4, 32], strides = [1, 1]} : vector<4x128xf32> to vector<4x32xf32>
    %470 = math.tanh %469 : vector<4x32xf32>
    %471 = vector.extract_strided_slice %436 {offsets = [0, 64], sizes = [4, 32], strides = [1, 1]} : vector<4x128xf32> to vector<4x32xf32>
    %472 = math.tanh %471 : vector<4x32xf32>
    %473 = vector.extract_strided_slice %433 {offsets = [0, 96], sizes = [4, 32], strides = [1, 1]} : vector<4x128xf32> to vector<4x32xf32>
    %cst_137 = arith.constant 0.000000e+00 : f32
    %474 = vector.broadcast %cst_137 : f32 to vector<4x32xf32>
    %475 = arith.subf %474, %473 : vector<4x32xf32>
    %476 = math.exp %475 : vector<4x32xf32>
    %cst_138 = arith.constant 1.000000e+00 : f32
    %477 = vector.broadcast %cst_138 : f32 to vector<4x32xf32>
    %478 = arith.addf %477, %476 : vector<4x32xf32>
    %cst_139 = arith.constant 1.000000e+00 : f32
    %479 = vector.broadcast %cst_139 : f32 to vector<4x32xf32>
    %480 = arith.divf %479, %478 : vector<4x32xf32>
    %481 = vector.extract_strided_slice %436 {offsets = [0, 96], sizes = [4, 32], strides = [1, 1]} : vector<4x128xf32> to vector<4x32xf32>
    %cst_140 = arith.constant 0.000000e+00 : f32
    %482 = vector.broadcast %cst_140 : f32 to vector<4x32xf32>
    %483 = arith.subf %482, %481 : vector<4x32xf32>
    %484 = math.exp %483 : vector<4x32xf32>
    %cst_141 = arith.constant 1.000000e+00 : f32
    %485 = vector.broadcast %cst_141 : f32 to vector<4x32xf32>
    %486 = arith.addf %485, %484 : vector<4x32xf32>
    %cst_142 = arith.constant 1.000000e+00 : f32
    %487 = vector.broadcast %cst_142 : f32 to vector<4x32xf32>
    %488 = arith.divf %487, %486 : vector<4x32xf32>
    %489 = arith.mulf %460, %421 : vector<4x32xf32>
    %490 = arith.mulf %444, %470 : vector<4x32xf32>
    %491 = arith.addf %489, %490 : vector<4x32xf32>
    %492 = arith.mulf %468, %424 : vector<4x32xf32>
    %493 = arith.mulf %452, %472 : vector<4x32xf32>
    %494 = arith.addf %492, %493 : vector<4x32xf32>
    %495 = math.tanh %491 : vector<4x32xf32>
    %496 = arith.mulf %480, %495 : vector<4x32xf32>
    %497 = math.tanh %494 : vector<4x32xf32>
    %498 = arith.mulf %488, %497 : vector<4x32xf32>
    %499 = tpu.concatenate %496, %498 in 1 : vector<4x32xf32>, vector<4x32xf32> -> vector<4x64xf32>
    %cst_143 = arith.constant dense<0.000000e+00> : vector<4x256xf32>
    %500 = tpu.matmul %499, %6, %cst_143 {dimension_numbers = #tpu.dot_dimension_numbers<[1], [0], [0], [1], [0, 0, 1, 1], [], []>} : vector<4x64xf32>, vector<64x256xf32>, vector<4x256xf32> -> vector<4x256xf32>
    %501 = vector.extract_strided_slice %5 {offsets = [28, 0], sizes = [4, 128], strides = [1, 1]} : vector<32x256xf32> to vector<4x128xf32>
    %502 = vector.extract_strided_slice %500 {offsets = [0, 0], sizes = [4, 128], strides = [1, 1]} : vector<4x256xf32> to vector<4x128xf32>
    %503 = arith.addf %501, %502 : vector<4x128xf32>
    %504 = vector.extract_strided_slice %5 {offsets = [0, 128], sizes = [4, 128], strides = [1, 1]} : vector<32x256xf32> to vector<4x128xf32>
    %505 = vector.extract_strided_slice %500 {offsets = [0, 128], sizes = [4, 128], strides = [1, 1]} : vector<4x256xf32> to vector<4x128xf32>
    %506 = arith.addf %504, %505 : vector<4x128xf32>
    %507 = vector.extract_strided_slice %503 {offsets = [0, 0], sizes = [4, 32], strides = [1, 1]} : vector<4x128xf32> to vector<4x32xf32>
    %cst_144 = arith.constant 0.000000e+00 : f32
    %508 = vector.broadcast %cst_144 : f32 to vector<4x32xf32>
    %509 = arith.subf %508, %507 : vector<4x32xf32>
    %510 = math.exp %509 : vector<4x32xf32>
    %cst_145 = arith.constant 1.000000e+00 : f32
    %511 = vector.broadcast %cst_145 : f32 to vector<4x32xf32>
    %512 = arith.addf %511, %510 : vector<4x32xf32>
    %cst_146 = arith.constant 1.000000e+00 : f32
    %513 = vector.broadcast %cst_146 : f32 to vector<4x32xf32>
    %514 = arith.divf %513, %512 : vector<4x32xf32>
    %515 = vector.extract_strided_slice %506 {offsets = [0, 0], sizes = [4, 32], strides = [1, 1]} : vector<4x128xf32> to vector<4x32xf32>
    %cst_147 = arith.constant 0.000000e+00 : f32
    %516 = vector.broadcast %cst_147 : f32 to vector<4x32xf32>
    %517 = arith.subf %516, %515 : vector<4x32xf32>
    %518 = math.exp %517 : vector<4x32xf32>
    %cst_148 = arith.constant 1.000000e+00 : f32
    %519 = vector.broadcast %cst_148 : f32 to vector<4x32xf32>
    %520 = arith.addf %519, %518 : vector<4x32xf32>
    %cst_149 = arith.constant 1.000000e+00 : f32
    %521 = vector.broadcast %cst_149 : f32 to vector<4x32xf32>
    %522 = arith.divf %521, %520 : vector<4x32xf32>
    %523 = vector.extract_strided_slice %503 {offsets = [0, 32], sizes = [4, 32], strides = [1, 1]} : vector<4x128xf32> to vector<4x32xf32>
    %cst_150 = arith.constant 0.000000e+00 : f32
    %524 = vector.broadcast %cst_150 : f32 to vector<4x32xf32>
    %525 = arith.subf %524, %523 : vector<4x32xf32>
    %526 = math.exp %525 : vector<4x32xf32>
    %cst_151 = arith.constant 1.000000e+00 : f32
    %527 = vector.broadcast %cst_151 : f32 to vector<4x32xf32>
    %528 = arith.addf %527, %526 : vector<4x32xf32>
    %cst_152 = arith.constant 1.000000e+00 : f32
    %529 = vector.broadcast %cst_152 : f32 to vector<4x32xf32>
    %530 = arith.divf %529, %528 : vector<4x32xf32>
    %531 = vector.extract_strided_slice %506 {offsets = [0, 32], sizes = [4, 32], strides = [1, 1]} : vector<4x128xf32> to vector<4x32xf32>
    %cst_153 = arith.constant 0.000000e+00 : f32
    %532 = vector.broadcast %cst_153 : f32 to vector<4x32xf32>
    %533 = arith.subf %532, %531 : vector<4x32xf32>
    %534 = math.exp %533 : vector<4x32xf32>
    %cst_154 = arith.constant 1.000000e+00 : f32
    %535 = vector.broadcast %cst_154 : f32 to vector<4x32xf32>
    %536 = arith.addf %535, %534 : vector<4x32xf32>
    %cst_155 = arith.constant 1.000000e+00 : f32
    %537 = vector.broadcast %cst_155 : f32 to vector<4x32xf32>
    %538 = arith.divf %537, %536 : vector<4x32xf32>
    %539 = vector.extract_strided_slice %503 {offsets = [0, 64], sizes = [4, 32], strides = [1, 1]} : vector<4x128xf32> to vector<4x32xf32>
    %540 = math.tanh %539 : vector<4x32xf32>
    %541 = vector.extract_strided_slice %506 {offsets = [0, 64], sizes = [4, 32], strides = [1, 1]} : vector<4x128xf32> to vector<4x32xf32>
    %542 = math.tanh %541 : vector<4x32xf32>
    %543 = vector.extract_strided_slice %503 {offsets = [0, 96], sizes = [4, 32], strides = [1, 1]} : vector<4x128xf32> to vector<4x32xf32>
    %cst_156 = arith.constant 0.000000e+00 : f32
    %544 = vector.broadcast %cst_156 : f32 to vector<4x32xf32>
    %545 = arith.subf %544, %543 : vector<4x32xf32>
    %546 = math.exp %545 : vector<4x32xf32>
    %cst_157 = arith.constant 1.000000e+00 : f32
    %547 = vector.broadcast %cst_157 : f32 to vector<4x32xf32>
    %548 = arith.addf %547, %546 : vector<4x32xf32>
    %cst_158 = arith.constant 1.000000e+00 : f32
    %549 = vector.broadcast %cst_158 : f32 to vector<4x32xf32>
    %550 = arith.divf %549, %548 : vector<4x32xf32>
    %551 = vector.extract_strided_slice %506 {offsets = [0, 96], sizes = [4, 32], strides = [1, 1]} : vector<4x128xf32> to vector<4x32xf32>
    %cst_159 = arith.constant 0.000000e+00 : f32
    %552 = vector.broadcast %cst_159 : f32 to vector<4x32xf32>
    %553 = arith.subf %552, %551 : vector<4x32xf32>
    %554 = math.exp %553 : vector<4x32xf32>
    %cst_160 = arith.constant 1.000000e+00 : f32
    %555 = vector.broadcast %cst_160 : f32 to vector<4x32xf32>
    %556 = arith.addf %555, %554 : vector<4x32xf32>
    %cst_161 = arith.constant 1.000000e+00 : f32
    %557 = vector.broadcast %cst_161 : f32 to vector<4x32xf32>
    %558 = arith.divf %557, %556 : vector<4x32xf32>
    %559 = arith.mulf %530, %491 : vector<4x32xf32>
    %560 = arith.mulf %514, %540 : vector<4x32xf32>
    %561 = arith.addf %559, %560 : vector<4x32xf32>
    %562 = arith.mulf %538, %494 : vector<4x32xf32>
    %563 = arith.mulf %522, %542 : vector<4x32xf32>
    %564 = arith.addf %562, %563 : vector<4x32xf32>
    %565 = math.tanh %561 : vector<4x32xf32>
    %566 = arith.mulf %550, %565 : vector<4x32xf32>
    %567 = math.tanh %564 : vector<4x32xf32>
    %568 = arith.mulf %558, %567 : vector<4x32xf32>
    %569 = tpu.concatenate %566, %568 in 1 : vector<4x32xf32>, vector<4x32xf32> -> vector<4x64xf32>
    %570 = vector.extract_strided_slice %569 {offsets = [0, 32], sizes = [4, 32], strides = [1, 1]} : vector<4x64xf32> to vector<4x32xf32>
    %c0_162 = arith.constant 0 : index
    %c0_163 = arith.constant 0 : index
    %571 = vector.load %arg4[%c0_162, %c0_163] : memref<4x64xf32, #tpu.memory_space<vmem>>, vector<4x32xf32>
    tpu.vector_store %arg4[%c0_162, %c0_163], %570 {strides = array<i32>} : memref<4x64xf32, #tpu.memory_space<vmem>>, vector<4x32xf32>,
    %572 = vector.extract_strided_slice %569 {offsets = [0, 0], sizes = [4, 32], strides = [1, 1]} : vector<4x64xf32> to vector<4x32xf32>
    %c0_164 = arith.constant 0 : index
    %c32 = arith.constant 32 : index
    %573 = vector.load %arg4[%c0_164, %c32] : memref<4x64xf32, #tpu.memory_space<vmem>>, vector<4x32xf32>
    tpu.vector_store %arg4[%c0_164, %c32], %572 {strides = array<i32>} : memref<4x64xf32, #tpu.memory_space<vmem>>, vector<4x32xf32>,
    return
  }
}

module attributes {stable_mosaic.version = 11 : i64} {
  func.func @_head_kernel(%arg0: memref<2x48xf32, #tpu.memory_space<vmem>>, %arg1: memref<4x64xf32, #tpu.memory_space<vmem>>, %arg2: memref<48x64xf32, #tpu.memory_space<vmem>>, %arg3: memref<1x64xf32, #tpu.memory_space<vmem>>, %arg4: memref<64x32xf32, #tpu.memory_space<vmem>>, %arg5: memref<1x32xf32, #tpu.memory_space<vmem>>, %arg6: memref<64x64xf32, #tpu.memory_space<vmem>>, %arg7: memref<32x32xf32, #tpu.memory_space<vmem>>, %arg8: memref<1x32xf32, #tpu.memory_space<vmem>>, %arg9: memref<2x96xf32, #tpu.memory_space<vmem>>) attributes {dimension_semantics = [], scalar_prefetch = 0 : i64, scratch_operands = 0 : i64, tpu.core_type = #tpu.core_type<tc>} {
    %c0 = arith.constant 0 : index
    %c0_0 = arith.constant 0 : index
    %0 = vector.load %arg0[%c0, %c0_0] : memref<2x48xf32, #tpu.memory_space<vmem>>, vector<2x48xf32>
    %c0_1 = arith.constant 0 : index
    %c0_2 = arith.constant 0 : index
    %1 = vector.load %arg2[%c0_1, %c0_2] : memref<48x64xf32, #tpu.memory_space<vmem>>, vector<48x64xf32>
    %cst = arith.constant dense<0.000000e+00> : vector<2x64xf32>
    %2 = tpu.matmul %0, %1, %cst {dimension_numbers = #tpu.dot_dimension_numbers<[1], [0], [0], [1], [0, 0, 1, 1], [], []>} : vector<2x48xf32>, vector<48x64xf32>, vector<2x64xf32> -> vector<2x64xf32>
    %c0_3 = arith.constant 0 : index
    %c0_4 = arith.constant 0 : index
    %3 = vector.load %arg3[%c0_3, %c0_4] : memref<1x64xf32, #tpu.memory_space<vmem>>, vector<1x64xf32>
    %4 = vector.broadcast %3 : vector<1x64xf32> to vector<2x64xf32>
    %5 = arith.addf %2, %4 : vector<2x64xf32>
    %cst_5 = arith.constant 0.000000e+00 : f32
    %6 = vector.broadcast %cst_5 : f32 to vector<2x64xf32>
    %7 = arith.maximumf %5, %6 : vector<2x64xf32>
    %c0_6 = arith.constant 0 : index
    %c0_7 = arith.constant 0 : index
    %8 = vector.load %arg4[%c0_6, %c0_7] : memref<64x32xf32, #tpu.memory_space<vmem>>, vector<64x32xf32>
    %cst_8 = arith.constant dense<0.000000e+00> : vector<2x32xf32>
    %9 = tpu.matmul %7, %8, %cst_8 {dimension_numbers = #tpu.dot_dimension_numbers<[1], [0], [0], [1], [0, 0, 1, 1], [], []>} : vector<2x64xf32>, vector<64x32xf32>, vector<2x32xf32> -> vector<2x32xf32>
    %c0_9 = arith.constant 0 : index
    %c0_10 = arith.constant 0 : index
    %10 = vector.load %arg5[%c0_9, %c0_10] : memref<1x32xf32, #tpu.memory_space<vmem>>, vector<1x32xf32>
    %11 = vector.broadcast %10 : vector<1x32xf32> to vector<2x32xf32>
    %12 = arith.addf %9, %11 : vector<2x32xf32>
    %cst_11 = arith.constant 0.000000e+00 : f32
    %13 = vector.broadcast %cst_11 : f32 to vector<2x32xf32>
    %14 = arith.maximumf %12, %13 : vector<2x32xf32>
    %c0_12 = arith.constant 0 : index
    %c0_13 = arith.constant 0 : index
    %15 = vector.load %arg1[%c0_12, %c0_13] : memref<4x64xf32, #tpu.memory_space<vmem>>, vector<4x64xf32>
    %c0_14 = arith.constant 0 : index
    %c0_15 = arith.constant 0 : index
    %16 = vector.load %arg6[%c0_14, %c0_15] : memref<64x64xf32, #tpu.memory_space<vmem>>, vector<64x64xf32>
    %cst_16 = arith.constant dense<0.000000e+00> : vector<4x64xf32>
    %17 = tpu.matmul %15, %16, %cst_16 {dimension_numbers = #tpu.dot_dimension_numbers<[1], [0], [0], [1], [0, 0, 1, 1], [], []>} : vector<4x64xf32>, vector<64x64xf32>, vector<4x64xf32> -> vector<4x64xf32>
    %18 = vector.extract_strided_slice %17 {offsets = [0, 0], sizes = [4, 32], strides = [1, 1]} : vector<4x64xf32> to vector<4x32xf32>
    %19 = vector.extract_strided_slice %17 {offsets = [0, 32], sizes = [4, 32], strides = [1, 1]} : vector<4x64xf32> to vector<4x32xf32>
    %20 = arith.maximumf %18, %19 : vector<4x32xf32>
    %c0_17 = arith.constant 0 : index
    %c0_18 = arith.constant 0 : index
    %21 = vector.load %arg7[%c0_17, %c0_18] : memref<32x32xf32, #tpu.memory_space<vmem>>, vector<32x32xf32>
    %cst_19 = arith.constant dense<0.000000e+00> : vector<4x32xf32>
    %22 = tpu.matmul %20, %21, %cst_19 {dimension_numbers = #tpu.dot_dimension_numbers<[1], [0], [0], [1], [0, 0, 1, 1], [], []>} : vector<4x32xf32>, vector<32x32xf32>, vector<4x32xf32> -> vector<4x32xf32>
    %c0_20 = arith.constant 0 : index
    %c0_21 = arith.constant 0 : index
    %23 = vector.load %arg8[%c0_20, %c0_21] : memref<1x32xf32, #tpu.memory_space<vmem>>, vector<1x32xf32>
    %24 = vector.broadcast %23 : vector<1x32xf32> to vector<4x32xf32>
    %25 = arith.addf %22, %24 : vector<4x32xf32>
    %cst_22 = arith.constant 0.000000e+00 : f32
    %26 = vector.broadcast %cst_22 : f32 to vector<4x32xf32>
    %27 = arith.maximumf %25, %26 : vector<4x32xf32>
    %c0_23 = arith.constant 0 : index
    %c0_24 = arith.constant 0 : index
    %28 = vector.load %arg9[%c0_23, %c0_24] : memref<2x96xf32, #tpu.memory_space<vmem>>, vector<2x32xf32>
    tpu.vector_store %arg9[%c0_23, %c0_24], %14 {strides = array<i32>} : memref<2x96xf32, #tpu.memory_space<vmem>>, vector<2x32xf32>,
    %29 = vector.extract_strided_slice %27 {offsets = [0, 0], sizes = [2, 32], strides = [1, 1]} : vector<4x32xf32> to vector<2x32xf32>
    %c0_25 = arith.constant 0 : index
    %c32 = arith.constant 32 : index
    %30 = vector.load %arg9[%c0_25, %c32] : memref<2x96xf32, #tpu.memory_space<vmem>>, vector<2x32xf32>
    tpu.vector_store %arg9[%c0_25, %c32], %29 {strides = array<i32>} : memref<2x96xf32, #tpu.memory_space<vmem>>, vector<2x32xf32>,
    %31 = vector.extract_strided_slice %27 {offsets = [2, 0], sizes = [2, 32], strides = [1, 1]} : vector<4x32xf32> to vector<2x32xf32>
    %c0_26 = arith.constant 0 : index
    %c64 = arith.constant 64 : index
    %32 = vector.load %arg9[%c0_26, %c64] : memref<2x96xf32, #tpu.memory_space<vmem>>, vector<2x32xf32>
    tpu.vector_store %arg9[%c0_26, %c64], %31 {strides = array<i32>} : memref<2x96xf32, #tpu.memory_space<vmem>>, vector<2x32xf32>,
    return
  }
}

</mosaic_0001>

<bundles_post_ra>
// kernel: _lambda_.5
= control target key start
LH: loop header
LB: loop body
LE: loop exit
PB: predicated region body
PF: predicated region fallthrough
CT: control target
= control target key end

     0   :  { %14 = vsyncpa [#allocation3], 0  ;;  %s434_s0 = inlined_call_operand.vmem [shape: f32[2,48], index: 0, kind: input, shape index: {}]   ;;  %s435_s1 = inlined_call_operand.vmem [shape: f32[4,64], index: 1, kind: input, shape index: {}]   ;;  %s436_s2 = inlined_call_operand.vmem [shape: f32[48,64], index: 2, kind: input, shape index: {}]   ;;  %s437_s3 = inlined_call_operand.vmem [shape: f32[1,64], index: 3, kind: input, shape index: {}]   ;;  %s438_s4 = inlined_call_operand.vmem [shape: f32[64,32], index: 4, kind: input, shape index: {}]   ;;  %s439_s5 = inlined_call_operand.vmem [shape: f32[1,32], index: 5, kind: input, shape index: {}]   ;;  %s440_s6 = inlined_call_operand.vmem [shape: f32[64,64], index: 6, kind: input, shape index: {}]   ;;  %s441_s7 = inlined_call_operand.hbm [shape: f32[32,32], index: 7, kind: input, shape index: {}]   ;;  %s442_s8 = inlined_call_operand.vmem [shape: f32[1,32], index: 8, kind: input, shape index: {}]   ;;  %s443_s9 = inlined_call_operand.hbm [shape: f32[2,96], index: 9, kind: output, shape index: {}]  }
   0x1   :  { %15 = vsyncpa [#allocation4], 0  ;;  %s34_s11 = sshll.u32 %s441_s7, 4  ;;  %s288_s12 = smov [#allocation2]   ;;  %s35_s11 = int_to_ptr.hbm [resolvable:$true] %s34_s11 }
   0x2   :  { %s36_s13 = sshll.u32 %s288_s12, 4  ;;  %s289_s14 = smov 128   ;;  %s37_s13 = int_to_ptr.vmem [resolvable:$true] %s36_s13 }
   0x3   :  { %s290_s15 = smov 8  }
   0x4   :  { %42 = dma.hbm_to_vmem [thread:$0]  %s35_s11, 512, %s37_s13, [#allocation3], %s289_s14, %s289_s14, %s290_s15  }
   0x5   :  { %284 = dma.done.wait [#allocation3], 512  }
   0x6   :  { %285 = vsyncadd [#allocation3], 4294966784  ;;  %v130_v0 = vld [vmem:[%s440_s6 + $0x38] sm:$0xff]  ;;  %v129_v1 = vld [vmem:[%s440_s6 + $0x30] sm:$0xff]  ;;  %vm97_vm0 = vcmask 523264   ;;  %vm60_vm1 = vcmask 392192  }
   0x7   :  { %142 = vmatpush.msra.mxu2 %v130_v0  ;;  %v128_v2 = vld [vmem:[%s440_s6 + $0x28] sm:$0xff]  ;;  %v127_v3 = vld [vmem:[%s440_s6 + $0x20] sm:$0xff]  ;;  %v126_v4 = vld [vmem:[%s440_s6 + $0x18] sm:$0xff]  ;;  %s291_s23 = smov 96   ;;  %vm167_vm2 = vcmask 261120   ;;  %vm192_vm3 = vcmask 254976  }
   0x8   :  { %v125_v5 = vld [vmem:[%s440_s6 + $0x10] sm:$0xff]  ;;  %v124_v6 = vld [vmem:[%s440_s6 + $0x8] sm:$0xff]  ;;  %v123_v7 = vld [vmem:[%s440_s6] sm:$0xff]  ;;  %s292_s19 = smov 64   ;;  %s293_s20 = smov 32   ;;  %vm198_vm4 = vcmask 517376  }
   0x9   :  { %143 = vmatpush.msra.mxu2 %v129_v1  ;;  %v122_v8 = vld [vmem:[%s435_s1] sm:$0xf]  ;;  %v55_v9 = vld [vmem:[%s436_s2 + $0x28] sm:$0xff]  ;;  %v53_v11 = vld [vmem:[%s436_s2 + $0x18] sm:$0xff]  ;;  %s294_s7 = smov [#allocation5]   ;;  %vm203_vm5 = vcmask 781826  }
   0xa   :  { %v54_v10 = vld [vmem:[%s436_s2 + $0x20] sm:$0xff]  ;;  %74 = vmatpush.msra.mxu0 %v55_v9  ;;  %v162_v12 = vld [vmem:[#allocation2 + $0x18] sm:$0xff]  ;;  %v161_v13 = vld [vmem:[#allocation2 + $0x10] sm:$0xff]  ;;  %s210_s21 = sshll.u32 %s294_s7, 4  ;;  %s211_s21 = int_to_ptr.vmem [resolvable:$true] %s210_s21 }
   0xb   :  { %144 = vmatpush.msra.mxu2 %v128_v2  ;;  %183 = vmatpush.msra.mxu3 %v162_v12  ;;  %v52_v14 = vld [vmem:[%s436_s2 + $0x10] sm:$0xff]  ;;  %v160_v15 = vld [vmem:[#allocation2 + $0x8] sm:$0xff]  ;;  %v50_v17 = vld [vmem:[%s436_s2] sm:$0xff] }
   0xc   :  { %75 = vmatpush.msra.mxu0 %v54_v10  ;;  %v51_v16 = vld [vmem:[%s436_s2 + $0x8] sm:$0xff]  ;;  %v49_v18 = vld [vmem:[%s434_s0] sm:$0x3]  ;;  %v92_v21 = vld [vmem:[%s438_s4 + $0x38] sm:$0xff] }
   0xd   :  { %145 = vmatpush.msra.mxu2 %v127_v3  ;;  %184 = vmatpush.msra.mxu3 %v161_v13  ;;  %v159_v20 = vld [vmem:[#allocation2] sm:$0xff]  ;;  %v91_v22 = vld [vmem:[%s438_s4 + $0x30] sm:$0xff]  ;;  %v90_v23 = vld [vmem:[%s438_s4 + $0x28] sm:$0xff] }
   0xe   :  { %76 = vmatpush.msra.mxu0 %v53_v11  ;;  %109 = vmatpush.msra.mxu1 %v92_v21  ;;  %v89_v24 = vld [vmem:[%s438_s4 + $0x20] sm:$0xff]  ;;  %v88_v25 = vld [vmem:[%s438_s4 + $0x18] sm:$0xff]  ;;  %v87_v26 = vld [vmem:[%s438_s4 + $0x10] sm:$0xff] }
   0xf   :  { %146 = vmatpush.msra.mxu2 %v126_v4  ;;  %185 = vmatpush.msra.mxu3 %v160_v15  ;;  %v86_v27 = vld [vmem:[%s438_s4 + $0x8] sm:$0xff]  ;;  %v85_v28 = vld [vmem:[%s438_s4] sm:$0xff] }
  0x10   :  { %77 = vmatpush.msra.mxu0 %v52_v14  ;;  %110 = vmatpush.msra.mxu1 %v91_v22  ;;  %v233_v29 = vld [vmem:[%s437_s3] ss:$0 sm:$0xff] }
  0x11   :  { %147 = vmatpush.msra.mxu2 %v125_v5  ;;  %186 = vmatpush.msra.mxu3 %v159_v20  ;;  %v235_v35 = vld [vmem:[%s439_s5] ss:$0 sm:$0xff] }
  0x12   :  { %78 = vmatpush.msra.mxu0 %v51_v16  ;;  %111 = vmatpush.msra.mxu1 %v90_v23  ;;  %v234_v39 = vld [vmem:[%s442_s8] ss:$0 sm:$0xff] }
  0x13   :  { %148 = vmatpush.msra.mxu2 %v124_v6 }
  0x14   :  { %79 = vmatpush.msra.mxu0 %v50_v17  ;;  %112 = vmatpush.msra.mxu1 %v89_v24 }
  0x15   :  { %149 = vmatpush.msra.mxu2 %v123_v7  ;;  %222 = vmatmul.msk.f32.vlgmr.msra.gmra.mxu0 %vm60_vm1, %v49_v18 }
  0x16   :  { %224 = vmatmul.msk.f32.vlgmr.msra.gmra.mxu2 %vm97_vm0, %v122_v8  ;;  %113 = vmatpush.msra.mxu1 %v88_v25 }
  0x18   :  { %114 = vmatpush.msra.mxu1 %v87_v26 }
  0x1a   :  { %115 = vmatpush.msra.mxu1 %v86_v27 }
  0x1c   :  { %116 = vmatpush.msra.mxu1 %v85_v28 }
  0x92   :  { %v81_v30 = vpop.f32.mrf.mxu0 }
  0x93   :  { %v82_v31 = vadd.f32 %v233_v29, %v81_v30 }
  0x95   :  { %v84_v32 = vmax.f32 %v82_v31, 0.0 }
  0x97   :  { %223 = vmatmul.msk.f32.vlgmr.msra.gmra.mxu1 %vm97_vm0, %v84_v32 }
  0x99   :  { %v151_v19 = vpop.f32.mrf.mxu2 }
  0x9a   :  { %155 = vrot.lane.b32.xlu0 %v151_v19, %s291_s23  ;;  %s212_s23 = sshll.u32 %s443_s9, 4  ;;  %s213_s23 = int_to_ptr.hbm [resolvable:$true] %s212_s23 }
 0x10c   :  { %v156_v33 = vpop.permute.xlu0 %155 }
 0x10d   :  { %v158_v34 = vmax.f32 %v151_v19, %v156_v33 }
 0x10f   :  { %225 = vmatmul.msk.f32.vlgmr.msra.gmra.mxu3 %vm167_vm2, %v158_v34 }
 0x114   :  { %v118_v36 = vpop.f32.mrf.mxu1 }
 0x115   :  { %v119_v37 = vadd.f32 %v235_v35, %v118_v36 }
 0x117   :  { %v121_v38 = vmax.f32 %v119_v37, 0.0 }
 0x119   :  { %193 = vst.msk [vmem:[#allocation5] sm:$0x3] %vm192_vm3, %v121_v38 }
 0x192   :  { %v188_v40 = vpop.f32.mrf.mxu3 }
 0x193   :  { %v189_v41 = vadd.f32 %v234_v39, %v188_v40 }
 0x195   :  { %v191_v42 = vmax.f32 %v189_v41, 0.0 }
 0x197   :  { %200 = vrot.lane.b32.xlu1 %v191_v42, %s292_s19  ;;  %195 = vrot.lane.b32.xlu0 %v191_v42, %s293_s20 }
 0x209   :  { %v201_v43 = vpop.permute.xlu1 %200  ;;  %v196_v44 = vpop.permute.xlu0 %195 }
 0x20a   :  { %199 = vst.msk [vmem:[#allocation5] sm:$0x3] %vm198_vm4, %v196_v44 }
 0x20b   :  { %204 = vst.msk [vmem:[#allocation5 - $0x2] sm:$0xc] %vm203_vm5, %v201_v43 }
 0x20c   :  { %215 = dma.vmem_to_hbm [thread:$0]  %s211_s21, 32, %s213_s23, [#allocation4]  }
 0x20d   :  { %286 = dma.done.wait [#allocation4], 32  }
 0x20e   :  { %287 = vsyncadd [#allocation4], 4294967264 }
 0x20f   :  { %220 = vsyncpa [#allocation3], 1 }
 0x210   :  { %221 = vsyncpa [#allocation4], 1 }

// kernel: _lambda_.4
= control target key start
LH: loop header
LB: loop body
LE: loop exit
PB: predicated region body
PF: predicated region fallthrough
CT: control target
= control target key end

     0   :  { %9 = vsyncpa [#allocation3], 0  ;;  %s1447_s18 = smov [#allocation2]   ;;  %s1448_s20 = smov 256   ;;  %s1906_s0 = inlined_call_operand.vmem [shape: f32[32,64], index: 0, kind: input, shape index: {}]   ;;  %s1907_s1 = inlined_call_operand.vmem [shape: f32[64,256], index: 1, kind: input, shape index: {}]   ;;  %s1908_s2 = inlined_call_operand.hbm [shape: f32[64,256], index: 2, kind: input, shape index: {}]   ;;  %s1909_s3 = inlined_call_operand.vmem [shape: f32[1,256], index: 3, kind: input, shape index: {}]   ;;  %s1910_s4 = inlined_call_operand.vmem [shape: f32[4,64], index: 4, kind: output, shape index: {}]  }
   0x1   :  { %s18_s17 = sshll.u32 %s1908_s2, 4  ;;  %s20_s19 = sshll.u32 %s1447_s18, 4  ;;  %s19_s17 = int_to_ptr.hbm [resolvable:$true] %s18_s17  ;;  %s21_s19 = int_to_ptr.vmem [resolvable:$true] %s20_s19 }
   0x2   :  { %s1449_s21 = smov 16  }
   0x3   :  { %26 = dma.hbm_to_vmem [thread:$0]  %s19_s17, 2048, %s21_s19, [#allocation3], %s1448_s20, %s1448_s20, %s1449_s21  }
   0x4   :  { %1445 = dma.done.wait [#allocation3], 2048  }
   0x5   :  { %1446 = vsyncadd [#allocation3], 4294965248  ;;  %v52_v0 = vld [vmem:[%s1907_s1 + $0x78] sm:$0xff]  ;;  %v50_v1 = vld [vmem:[%s1907_s1 + $0x68] sm:$0xff]  ;;  %vm59_vm0 = vcmask 523264   ;;  %v1450_v33 = vmov 0.0  }
   0x6   :  { %109 = vmatpush.msra.mxu1 %v52_v0  ;;  %v48_v2 = vld [vmem:[%s1907_s1 + $0x58] sm:$0xff]  ;;  %v1491_v3 = vld [vmem:[#allocation2 + $0x70] sm:$0xff]  ;;  %v1493_v4 = vld [vmem:[#allocation2 + $0x60] sm:$0xff]  ;;  %s1452_s8 = smov 32   ;;  %vm277_vm9 = vcmask 261120   ;;  %s1453_s9 = smov 96  }
   0x7   :  { %v1495_v5 = vld [vmem:[#allocation2 + $0x78] sm:$0xff]  ;;  %v46_v6 = vld [vmem:[%s1907_s1 + $0x48] sm:$0xff]  ;;  %157 = vmatpush.msra.mxu2 %v1491_v3  ;;  %v51_v7 = vld [vmem:[%s1907_s1 + $0x70] sm:$0xff] }
   0x8   :  { %110 = vmatpush.msra.mxu1 %v50_v1  ;;  %177 = vmatpush.msra.mxu3 %v1495_v5  ;;  %v1505_v8 = vld [vmem:[#allocation2 + $0x68] sm:$0xff]  ;;  %v1507_v9 = vld [vmem:[#allocation2 + $0x50] sm:$0xff]  ;;  %v49_v10 = vld [vmem:[%s1907_s1 + $0x60] sm:$0xff] }
   0x9   :  { %80 = vmatpush.msra.mxu0 %v51_v7  ;;  %v1512_v11 = vld [vmem:[#allocation2 + $0x58] sm:$0xff]  ;;  %158 = vmatpush.msra.mxu2 %v1493_v4  ;;  %v47_v13 = vld [vmem:[%s1907_s1 + $0x50] sm:$0xff]  ;;  %v1522_v14 = vld [vmem:[#allocation2 + $0x40] sm:$0xff] }
   0xa   :  { %111 = vmatpush.msra.mxu1 %v48_v2  ;;  %v44_v12 = vld [vmem:[%s1907_s1 + $0x38] sm:$0xff]  ;;  %178 = vmatpush.msra.mxu3 %v1505_v8  ;;  %v1524_v15 = vld [vmem:[#allocation2 + $0x48] sm:$0xff]  ;;  %v45_v17 = vld [vmem:[%s1907_s1 + $0x40] sm:$0xff] }
   0xb   :  { %81 = vmatpush.msra.mxu0 %v49_v10  ;;  %v42_v16 = vld [vmem:[%s1907_s1 + $0x28] sm:$0xff]  ;;  %159 = vmatpush.msra.mxu2 %v1507_v9  ;;  %v1534_v18 = vld [vmem:[#allocation2 + $0x30] sm:$0xff]  ;;  %v1536_v19 = vld [vmem:[#allocation2 + $0x38] sm:$0xff] }
   0xc   :  { %112 = vmatpush.msra.mxu1 %v46_v6  ;;  %179 = vmatpush.msra.mxu3 %v1512_v11  ;;  %v40_v20 = vld [vmem:[%s1907_s1 + $0x18] sm:$0xff]  ;;  %v43_v21 = vld [vmem:[%s1907_s1 + $0x30] sm:$0xff]  ;;  %v1546_v22 = vld [vmem:[#allocation2 + $0x20] sm:$0xff] }
   0xd   :  { %82 = vmatpush.msra.mxu0 %v47_v13  ;;  %160 = vmatpush.msra.mxu2 %v1522_v14  ;;  %v1548_v23 = vld [vmem:[#allocation2 + $0x28] sm:$0xff]  ;;  %v41_v25 = vld [vmem:[%s1907_s1 + $0x20] sm:$0xff]  ;;  %v1561_v27 = vld [vmem:[#allocation2 + $0x10] sm:$0xff] }
   0xe   :  { %113 = vmatpush.msra.mxu1 %v44_v12  ;;  %180 = vmatpush.msra.mxu3 %v1524_v15  ;;  %v38_v24 = vld [vmem:[%s1907_s1 + $0x8] sm:$0xff]  ;;  %v33_v26 = vld [vmem:[%s1906_s0] sm:$0xff]  ;;  %v1565_v28 = vld [vmem:[#allocation2 + $0x18] sm:$0xff] }
   0xf   :  { %83 = vmatpush.msra.mxu0 %v45_v17  ;;  %161 = vmatpush.msra.mxu2 %v1534_v18  ;;  %v39_v29 = vld [vmem:[%s1907_s1 + $0x10] sm:$0xff]  ;;  %v1570_v30 = vld [vmem:[#allocation2] sm:$0xff]  ;;  %v1574_v31 = vld [vmem:[#allocation2 + $0x8] sm:$0xff] }
  0x10   :  { %114 = vmatpush.msra.mxu1 %v42_v16  ;;  %181 = vmatpush.msra.mxu3 %v1536_v19  ;;  %v37_v32 = vld [vmem:[%s1907_s1] sm:$0xff]  ;;  %v34_v34 = vld [vmem:[%s1906_s0 + $0x8] sm:$0xff]  ;;  %v35_v35 = vld [vmem:[%s1906_s0 + $0x10] sm:$0xff] }
  0x11   :  { %84 = vmatpush.msra.mxu0 %v43_v21  ;;  %162 = vmatpush.msra.mxu2 %v1546_v22  ;;  %v36_v36 = vld [vmem:[%s1906_s0 + $0x18] sm:$0xff]  ;;  %v53_v37 = vld [vmem:[%s1909_s3] sm:$0x3]  ;;  %s1451_s3 = smov 64  }
  0x12   :  { %115 = vmatpush.msra.mxu1 %v40_v20  ;;  %182 = vmatpush.msra.mxu3 %v1548_v23  ;;  %v56_v38 = vperm.slane %v53_v37, 1  ;;  %v1671_v48 = vperm.slane %v53_v37, 0 }
  0x13   :  { %85 = vmatpush.msra.mxu0 %v41_v25  ;;  %163 = vmatpush.msra.mxu2 %v1561_v27 }
  0x14   :  { %116 = vmatpush.msra.mxu1 %v38_v24  ;;  %183 = vmatpush.msra.mxu3 %v1565_v28 }
  0x15   :  { %1268 = vmatmul.msk.f32.vlgmr.msra.gmra.mxu1 %vm59_vm0, %v33_v26  ;;  %86 = vmatpush.msra.mxu0 %v39_v29 }
  0x16   :  { %164 = vmatpush.msra.mxu2 %v1570_v30  ;;  %449 = vmatpush.msrb.mxu1 %v1495_v5 }
  0x17   :  { %165 = vmatmul.f32.vlgmr.msra.gmra.mxu2 %v1450_v33  ;;  %184 = vmatpush.msra.mxu3 %v1574_v31 }
  0x18   :  { %87 = vmatpush.msra.mxu0 %v37_v32  ;;  %185 = vmatmul.f32.vlgmr.msra.gmra.mxu3 %v1450_v33 }
  0x19   :  { %1264 = vmatmul.msk.f32.vlgmr.msra.gmra.mxu0 %vm59_vm0, %v33_v26  ;;  %290 = vmatpush.msrb.mxu2 %v1491_v3 }
  0x1a   :  { %310 = vmatpush.msrb.mxu3 %v1495_v5  ;;  %429 = vmatpush.msrb.mxu0 %v1491_v3 }
  0x1b   :  { %291 = vmatpush.msrb.mxu2 %v1493_v4  ;;  %450 = vmatpush.msrb.mxu1 %v1505_v8 }
  0x1c   :  { %311 = vmatpush.msrb.mxu3 %v1505_v8  ;;  %430 = vmatpush.msrb.mxu0 %v1493_v4 }
  0x1d   :  { %1269 = vmatmul.msk.f32.gmra.mxu1 %vm59_vm0, %v34_v34  ;;  %292 = vmatpush.msrb.mxu2 %v1507_v9 }
  0x1e   :  { %312 = vmatpush.msrb.mxu3 %v1512_v11  ;;  %451 = vmatpush.msrb.mxu1 %v1512_v11 }
  0x1f   :  { %293 = vmatpush.msrb.mxu2 %v1522_v14  ;;  %431 = vmatpush.msrb.mxu0 %v1507_v9 }
  0x20   :  { %313 = vmatpush.msrb.mxu3 %v1524_v15  ;;  %452 = vmatpush.msrb.mxu1 %v1524_v15 }
  0x21   :  { %294 = vmatpush.msrb.mxu2 %v1534_v18  ;;  %1265 = vmatmul.msk.f32.gmra.mxu0 %vm59_vm0, %v34_v34 }
  0x22   :  { %314 = vmatpush.msrb.mxu3 %v1536_v19  ;;  %432 = vmatpush.msrb.mxu0 %v1522_v14 }
  0x23   :  { %295 = vmatpush.msrb.mxu2 %v1546_v22  ;;  %453 = vmatpush.msrb.mxu1 %v1536_v19 }
  0x24   :  { %315 = vmatpush.msrb.mxu3 %v1548_v23  ;;  %433 = vmatpush.msrb.mxu0 %v1534_v18 }
  0x25   :  { %1270 = vmatmul.msk.f32.gmra.mxu1 %vm59_vm0, %v35_v35  ;;  %296 = vmatpush.msrb.mxu2 %v1561_v27 }
  0x26   :  { %316 = vmatpush.msrb.mxu3 %v1565_v28  ;;  %454 = vmatpush.msrb.mxu1 %v1548_v23 }
  0x27   :  { %297 = vmatpush.msrb.mxu2 %v1570_v30  ;;  %434 = vmatpush.msrb.mxu0 %v1546_v22 }
  0x28   :  { %317 = vmatpush.msrb.mxu3 %v1574_v31  ;;  %455 = vmatpush.msrb.mxu1 %v1565_v28 }
  0x29   :  { %1266 = vmatmul.msk.f32.gmra.mxu0 %vm59_vm0, %v35_v35  ;;  %567 = vmatpush.msra.mxu2 %v1491_v3 }
  0x2a   :  { %435 = vmatpush.msrb.mxu0 %v1561_v27  ;;  %456 = vmatpush.msrb.mxu1 %v1574_v31 }
  0x2b   :  { %587 = vmatpush.msra.mxu3 %v1495_v5  ;;  %568 = vmatpush.msra.mxu2 %v1493_v4 }
  0x2c   :  { %436 = vmatpush.msrb.mxu0 %v1570_v30  ;;  %726 = vmatpush.msra.mxu1 %v1495_v5 }
  0x2d   :  { %1271 = vmatmul.msk.f32.gmra.mxu1 %vm59_vm0, %v36_v36  ;;  %588 = vmatpush.msra.mxu3 %v1505_v8 }
  0x2e   :  { %569 = vmatpush.msra.mxu2 %v1507_v9  ;;  %706 = vmatpush.msra.mxu0 %v1491_v3 }
  0x2f   :  { %589 = vmatpush.msra.mxu3 %v1512_v11  ;;  %727 = vmatpush.msra.mxu1 %v1505_v8 }
  0x30   :  { %570 = vmatpush.msra.mxu2 %v1522_v14  ;;  %707 = vmatpush.msra.mxu0 %v1493_v4 }
  0x31   :  { %1267 = vmatmul.msk.f32.gmra.mxu0 %vm59_vm0, %v36_v36  ;;  %590 = vmatpush.msra.mxu3 %v1524_v15 }
  0x32   :  { %571 = vmatpush.msra.mxu2 %v1534_v18  ;;  %708 = vmatpush.msra.mxu0 %v1507_v9 }
  0x33   :  { %591 = vmatpush.msra.mxu3 %v1536_v19  ;;  %728 = vmatpush.msra.mxu1 %v1512_v11 }
  0x34   :  { %572 = vmatpush.msra.mxu2 %v1546_v22  ;;  %709 = vmatpush.msra.mxu0 %v1522_v14 }
  0x35   :  { %592 = vmatpush.msra.mxu3 %v1548_v23  ;;  %729 = vmatpush.msra.mxu1 %v1524_v15 }
  0x36   :  { %573 = vmatpush.msra.mxu2 %v1561_v27  ;;  %710 = vmatpush.msra.mxu0 %v1534_v18 }
  0x37   :  { %593 = vmatpush.msra.mxu3 %v1565_v28  ;;  %730 = vmatpush.msra.mxu1 %v1536_v19 }
  0x38   :  { %574 = vmatpush.msra.mxu2 %v1570_v30  ;;  %711 = vmatpush.msra.mxu0 %v1546_v22 }
  0x39   :  { %594 = vmatpush.msra.mxu3 %v1574_v31  ;;  %731 = vmatpush.msra.mxu1 %v1548_v23 }
  0x3a   :  { %712 = vmatpush.msra.mxu0 %v1561_v27 }
  0x3b   :  { %732 = vmatpush.msra.mxu1 %v1565_v28 }
  0x3c   :  { %713 = vmatpush.msra.mxu0 %v1570_v30 }
  0x3d   :  { %733 = vmatpush.msra.mxu1 %v1574_v31 }
  0x92   :  { %v118_v39 = vpop.f32.mrf.mxu1 }
  0x93   :  { %v1665_v40 = vadd.f32 %v118_v39, %v56_v38 }
  0x96   :  { %v89_v50 = vpop.f32.mrf.mxu0 }
  0x97   :  { %v1677_v52 = vadd.f32 %v89_v50, %v1671_v48 }
  0x9a   :  { %v121_v41 = vpop.f32.mrf.mxu1  ;;  %v166_v53 = vpop.f32.mrf.mxu2 }
  0x9b   :  { %v1667_v42 = vadd.f32 %v121_v41, %v56_v38  ;;  %v186_v45 = vpop.f32.mrf.mxu3  ;;  %v189_v54 = vadd.f32 %v166_v53, %v1677_v52 }
  0x9c   :  { %v191_v46 = vrot.slane %v186_v45, 4 }
  0x9d   :  { %v194_v59 = vsub.f32 0.0, %v189_v54 }
  0x9f   :  { %v195_v60 = vmul.f32 1.442695, %v194_v59 }
  0xa2   :  { %v124_v43 = vpop.f32.mrf.mxu1 }
  0xa3   :  { %v1669_v44 = vadd.f32 %v124_v43, %v56_v38 }
  0xaa   :  { %v127_v47 = vpop.f32.mrf.mxu1 }
  0xab   :  { %v1673_v49 = vadd.f32 %v127_v47, %v56_v38 }
  0xad   :  { %v193_v51 = vadd.f32 %v191_v46, %v1673_v49 }
  0xaf   :  { %1293 = vtanh.f32 %v193_v51  ;;  %v213_v57 = vsub.f32 0.0, %v193_v51 }
  0xb0   :  { %1295 = vtanh.f32 %v189_v54 }
  0xb1   :  { %v214_v58 = vmul.f32 1.442695, %v213_v57 }
  0xb3   :  { %1297 = vpow2.f32 %v214_v58 }
  0xb4   :  { %1299 = vpow2.f32 %v195_v60 }
  0xb5   :  { %v1294_v55 = vpop.eup %1293 }
  0xb6   :  { %247 = vrot.lane.b32.xlu0 %v1294_v55, %s1451_s3  ;;  %v1296_v56 = vpop.eup %1295 }
  0xb9   :  { %v1298_v61 = vpop.eup %1297 }
  0xba   :  { %v216_v62 = vadd.f32 1.0, %v1298_v61  ;;  %v1300_v63 = vpop.eup %1299 }
  0xbb   :  { %v197_v0 = vadd.f32 1.0, %v1300_v63 }
  0xbc   :  { %1301 = vrcp.f32 %v216_v62  ;;  %v228_v17 = vand.u32 2147483648, %v216_v62  ;;  %vm222_vm2 = vweird.f32 %v216_v62  ;;  %v226_v20 = vand.u32 2147483647, %v216_v62 }
  0xbd   :  { %1303 = vrcp.f32 %v197_v0  ;;  %vm203_vm5 = vweird.f32 %v197_v0  ;;  %v209_v32 = vand.u32 2147483648, %v197_v0  ;;  %v207_v35 = vand.u32 2147483647, %v197_v0 }
  0xbe   :  { %236 = vrot.lane.b32.xlu0 %v1296_v56, %s1451_s3  ;;  %v229_v25 = vor.u32 1.1754944e-38, %v228_v17  ;;  %vm227_vm4 = vcmp.eq.f32.partialorder %v226_v20, 8.507059e+37 }
  0xbf   :  { %v210_v36 = vor.u32 1.1754944e-38, %v209_v32  ;;  %vm208_vm8 = vcmp.eq.f32.partialorder %v207_v35, 8.507059e+37 }
  0xc2   :  { %v1302_v1 = vpop.eup %1301 }
  0xc3   :  { %v218_v2 = vmul.f32 %v1302_v1, %v216_v62  ;;  %v1304_v7 = vpop.eup %1303  ;;  %vm223_vm1 = vweird.f32 %v1302_v1 }
  0xc4   :  { %v199_v12 = vmul.f32 %v1304_v7, %v197_v0  ;;  %vm224_vm3 = vmor %vm222_vm2, %vm223_vm1  ;;  %vm204_vm6 = vweird.f32 %v1304_v7 }
  0xc5   :  { %v219_v6 = vsub.f32 1.0, %v218_v2  ;;  %vm205_vm7 = vmor %vm203_vm5, %vm204_vm6 }
  0xc6   :  { %v200_v16 = vsub.f32 1.0, %v199_v12 }
  0xc7   :  { %v220_v10 = vmul.f32 %v1302_v1, %v219_v6 }
  0xc8   :  { %v201_v24 = vmul.f32 %v1304_v7, %v200_v16 }
  0xc9   :  { %v221_v13 = vadd.f32 %v1302_v1, %v220_v10 }
  0xca   :  { %v202_v34 = vadd.f32 %v1304_v7, %v201_v24 }
  0xcb   :  { %v225_v21 = vsel %vm224_vm3, %v1302_v1, %v221_v13 }
  0xcc   :  { %v230_v29 = vsel %vm227_vm4, %v229_v25, %v225_v21  ;;  %v206_v37 = vsel %vm205_vm7, %v1304_v7, %v202_v34 }
  0xcd   :  { %v211_v39 = vsel %vm208_vm8, %v210_v36, %v206_v37  ;;  %v245_v43 = vmul.f32 0.0, %v230_v29 }
  0xce   :  { %v234_v47 = vmul.f32 0.0, %v211_v39 }
 0x128   :  { %v248_v26 = vpop.permute.xlu0 %247 }
 0x129   :  { %v250_v33 = vmul.f32 %v248_v26, %v230_v29 }
 0x12b   :  { %252 = vrot.lane.b32.xlu1 %v250_v33, %s1452_s8 }
 0x130   :  { %v237_v38 = vpop.permute.xlu0 %236 }
 0x131   :  { %v239_v41 = vmul.f32 %v237_v38, %v211_v39 }
 0x133   :  { %241 = vrot.lane.b32.xlu1 %v239_v41, %s1452_s8 }
 0x19d   :  { %v253_v45 = vpop.permute.xlu1 %252 }
 0x19e   :  { %v1684_v46 = vadd.f32 %v253_v45, %v245_v43 }
 0x1a0   :  { %1305 = vtanh.f32 %v1684_v46 }
 0x1a5   :  { %v242_v50 = vpop.permute.xlu1 %241 }
 0x1a6   :  { %v1306_v51 = vpop.eup %1305  ;;  %v1687_v53 = vadd.f32 %v242_v50, %v234_v47 }
 0x1a7   :  { %264 = vrot.lane.b32.xlu2 %v1306_v51, %s1451_s3 }
 0x1a8   :  { %1307 = vtanh.f32 %v1687_v53 }
 0x1ae   :  { %v1308_v54 = vpop.eup %1307 }
 0x1af   :  { %258 = vrot.lane.b32.xlu2 %v1308_v54, %s1451_s3 }
 0x201   :  { %v265_v55 = vpop.permute.xlu2 %264 }
 0x202   :  { %v267_v56 = vmul.f32 %v265_v55, %v230_v29 }
 0x204   :  { %v273_v57 = vrot.slane %v267_v56, 4 }
 0x206   :  { %274 = vrot.lane.b32.xlu1 %v273_v57, %s1451_s3 }
 0x209   :  { %v259_v58 = vpop.permute.xlu2 %258 }
 0x20a   :  { %v261_v59 = vmul.f32 %v259_v58, %v211_v39 }
 0x20c   :  { %269 = vrot.lane.b32.xlu0 %v261_v59, %s1452_s8 }
 0x278   :  { %v275_v60 = vpop.permute.xlu1 %274 }
 0x27e   :  { %v270_v61 = vpop.permute.xlu0 %269 }
 0x27f   :  { %v278_v62 = vsel %vm277_vm9, %v270_v61, %v275_v60  ;;  %v382_v60 = vrot.slane %v1684_v46, 4  ;;  %v368_v61 = vrot.slane %v1687_v53, 4 }
 0x280   :  { %1272 = vmatmul.msk.f32.vlgmr.msrb.gmra.mxu2 %vm59_vm0, %v278_v62  ;;  %1273 = vmatmul.msk.f32.vlgmr.msrb.gmra.mxu3 %vm59_vm0, %v278_v62 }
 0x281   :  { %844 = vmatpush.msrb.mxu2 %v1491_v3  ;;  %864 = vmatpush.msrb.mxu3 %v1495_v5 }
 0x283   :  { %845 = vmatpush.msrb.mxu2 %v1493_v4  ;;  %865 = vmatpush.msrb.mxu3 %v1505_v8 }
 0x285   :  { %846 = vmatpush.msrb.mxu2 %v1507_v9  ;;  %866 = vmatpush.msrb.mxu3 %v1512_v11 }
 0x287   :  { %847 = vmatpush.msrb.mxu2 %v1522_v14  ;;  %867 = vmatpush.msrb.mxu3 %v1524_v15 }
 0x289   :  { %848 = vmatpush.msrb.mxu2 %v1534_v18  ;;  %868 = vmatpush.msrb.mxu3 %v1536_v19 }
 0x28b   :  { %849 = vmatpush.msrb.mxu2 %v1546_v22  ;;  %869 = vmatpush.msrb.mxu3 %v1548_v23 }
 0x28d   :  { %850 = vmatpush.msrb.mxu2 %v1561_v27  ;;  %870 = vmatpush.msrb.mxu3 %v1565_v28 }
 0x28f   :  { %851 = vmatpush.msrb.mxu2 %v1570_v30  ;;  %871 = vmatpush.msrb.mxu3 %v1574_v31 }
 0x303   :  { %v299_v63 = vpop.f32.mrf.mxu2  ;;  %v319_v0 = vpop.f32.mrf.mxu3 }
 0x304   :  { %v323_v1 = vrot.slane %v299_v63, 4  ;;  %v326_v2 = vadd.f32 %v319_v0, %v1673_v49 }
 0x306   :  { %v325_v6 = vadd.f32 %v323_v1, %v1677_v52  ;;  %1309 = vtanh.f32 %v326_v2  ;;  %v346_v12 = vsub.f32 0.0, %v326_v2 }
 0x308   :  { %1311 = vtanh.f32 %v325_v6  ;;  %v347_v13 = vmul.f32 1.442695, %v346_v12  ;;  %v327_v20 = vsub.f32 0.0, %v325_v6 }
 0x30a   :  { %1313 = vpow2.f32 %v347_v13  ;;  %v328_v24 = vmul.f32 1.442695, %v327_v20 }
 0x30c   :  { %v1310_v7 = vpop.eup %1309 }
 0x30d   :  { %386 = vrot.lane.b32.xlu2 %v1310_v7, %s1451_s3 }
 0x30e   :  { %v1312_v10 = vpop.eup %1311 }
 0x30f   :  { %372 = vrot.lane.b32.xlu0 %v1312_v10, %s1451_s3 }
 0x310   :  { %v1314_v16 = vpop.eup %1313 }
 0x311   :  { %v349_v17 = vadd.f32 1.0, %v1314_v16 }
 0x313   :  { %1315 = vrcp.f32 %v349_v17  ;;  %v361_v33 = vand.u32 2147483648, %v349_v17  ;;  %vm355_vm11 = vweird.f32 %v349_v17  ;;  %v359_v34 = vand.u32 2147483647, %v349_v17 }
 0x314   :  { %1317 = vpow2.f32 %v328_v24 }
 0x315   :  { %v362_v36 = vor.u32 1.1754944e-38, %v361_v33  ;;  %vm360_vm13 = vcmp.eq.f32.partialorder %v359_v34, 8.507059e+37 }
 0x319   :  { %v1316_v21 = vpop.eup %1315 }
 0x31a   :  { %v351_v49 = vmul.f32 %v1316_v21, %v349_v17  ;;  %v1318_v26 = vpop.eup %1317  ;;  %vm356_vm10 = vweird.f32 %v1316_v21 }
 0x31b   :  { %v330_v32 = vadd.f32 1.0, %v1318_v26  ;;  %vm357_vm12 = vmor %vm355_vm11, %vm356_vm10 }
 0x31c   :  { %v352_v52 = vsub.f32 1.0, %v351_v49  ;;  %v92_v49 = vpop.f32.mrf.mxu0 }
 0x31d   :  { %1319 = vrcp.f32 %v330_v32  ;;  %v342_v51 = vand.u32 2147483648, %v330_v32  ;;  %vm336_vm15 = vweird.f32 %v330_v32  ;;  %v340_v54 = vand.u32 2147483647, %v330_v32 }
 0x31e   :  { %v353_v25 = vmul.f32 %v1316_v21, %v352_v52  ;;  %v1755_v26 = vadd.f32 %v92_v49, %v1671_v48 }
 0x31f   :  { %v343_v56 = vor.u32 1.1754944e-38, %v342_v51  ;;  %vm341_vm2 = vcmp.eq.f32.partialorder %v340_v54, 8.507059e+37 }
 0x320   :  { %v354_v29 = vadd.f32 %v1316_v21, %v353_v25 }
 0x322   :  { %v358_v35 = vsel %vm357_vm12, %v1316_v21, %v354_v29 }
 0x323   :  { %v363_v38 = vsel %vm360_vm13, %v362_v36, %v358_v35  ;;  %v1320_v41 = vpop.eup %1319 }
 0x324   :  { %v332_v43 = vmul.f32 %v1320_v41, %v330_v32  ;;  %vm337_vm14 = vweird.f32 %v1320_v41  ;;  %v384_v62 = vmul.f32 %v382_v60, %v363_v38  ;;  %v1750_v52 = vpop.f32.mrf.mxu0 }
 0x325   :  { %vm338_vm1 = vmor %vm336_vm15, %vm337_vm14 }
 0x326   :  { %v333_v45 = vsub.f32 1.0, %v332_v43 }
 0x328   :  { %v334_v47 = vmul.f32 %v1320_v41, %v333_v45 }
 0x32a   :  { %v335_v50 = vadd.f32 %v1320_v41, %v334_v47 }
 0x32c   :  { %v339_v55 = vsel %vm338_vm1, %v1320_v41, %v335_v50  ;;  %v1752_v25 = vpop.f32.mrf.mxu0 }
 0x32d   :  { %v344_v58 = vsel %vm341_vm2, %v343_v56, %v339_v55 }
 0x32e   :  { %v370_v1 = vmul.f32 %v368_v61, %v344_v58 }
 0x367   :  { %v387_v37 = vpop.permute.xlu2 %386 }
 0x368   :  { %v389_v39 = vmul.f32 %v387_v37, %v363_v38 }
 0x36a   :  { %391 = vrot.lane.b32.xlu1 %v389_v39, %s1452_s8 }
 0x381   :  { %v373_v57 = vpop.permute.xlu0 %372 }
 0x382   :  { %v375_v59 = vmul.f32 %v373_v57, %v344_v58 }
 0x384   :  { %377 = vrot.lane.b32.xlu2 %v375_v59, %s1452_s8 }
 0x3dc   :  { %v392_v63 = vpop.permute.xlu1 %391 }
 0x3dd   :  { %v1721_v0 = vadd.f32 %v392_v63, %v384_v62 }
 0x3de   :  { %v378_v2 = vpop.permute.xlu2 %377 }
 0x3df   :  { %1321 = vtanh.f32 %v1721_v0  ;;  %v1724_v6 = vadd.f32 %v378_v2, %v370_v1 }
 0x3e1   :  { %1323 = vtanh.f32 %v1724_v6 }
 0x3e5   :  { %v1322_v7 = vpop.eup %1321 }
 0x3e6   :  { %403 = vrot.lane.b32.xlu0 %v1322_v7, %s1451_s3 }
 0x3e7   :  { %v1324_v10 = vpop.eup %1323 }
 0x3e8   :  { %397 = vrot.lane.b32.xlu1 %v1324_v10, %s1451_s3 }
 0x458   :  { %v404_v46 = vpop.permute.xlu0 %403 }
 0x459   :  { %v406_v53 = vmul.f32 %v404_v46, %v363_v38 }
 0x45a   :  { %v398_v12 = vpop.permute.xlu1 %397 }
 0x45b   :  { %v412_v13 = vrot.slane %v406_v53, 4  ;;  %v400_v16 = vmul.f32 %v398_v12, %v344_v58 }
 0x45d   :  { %413 = vrot.lane.b32.xlu0 %v412_v13, %s1451_s3  ;;  %408 = vrot.lane.b32.xlu2 %v400_v16, %s1452_s8 }
 0x4b7   :  { %v409_v17 = vpop.permute.xlu2 %408 }
 0x4cf   :  { %v414_v20 = vpop.permute.xlu0 %413 }
 0x4d0   :  { %v416_v21 = vsel %vm277_vm9, %v409_v17, %v414_v20 }
 0x4d1   :  { %v418_v24 = vrot.slane %v416_v21, 4 }
 0x4d3   :  { %1274 = vmatmul.msk.f32.vlgmr.msrb.gmra.mxu0 %vm59_vm0, %v418_v24  ;;  %1275 = vmatmul.msk.f32.vlgmr.msrb.gmra.mxu1 %vm59_vm0, %v418_v24 }
 0x4d4   :  { %983 = vmatpush.msrb.mxu0 %v1491_v3  ;;  %1003 = vmatpush.msrb.mxu1 %v1495_v5 }
 0x4d6   :  { %984 = vmatpush.msrb.mxu0 %v1493_v4  ;;  %1004 = vmatpush.msrb.mxu1 %v1505_v8 }
 0x4d8   :  { %985 = vmatpush.msrb.mxu0 %v1507_v9  ;;  %1005 = vmatpush.msrb.mxu1 %v1512_v11 }
 0x4da   :  { %986 = vmatpush.msrb.mxu0 %v1522_v14  ;;  %1006 = vmatpush.msrb.mxu1 %v1524_v15 }
 0x4dc   :  { %987 = vmatpush.msrb.mxu0 %v1534_v18  ;;  %1007 = vmatpush.msrb.mxu1 %v1536_v19 }
 0x4de   :  { %988 = vmatpush.msrb.mxu0 %v1546_v22  ;;  %1008 = vmatpush.msrb.mxu1 %v1548_v23 }
 0x4e0   :  { %989 = vmatpush.msrb.mxu0 %v1561_v27  ;;  %1009 = vmatpush.msrb.mxu1 %v1565_v28 }
 0x4e2   :  { %990 = vmatpush.msrb.mxu0 %v1570_v30  ;;  %1010 = vmatpush.msrb.mxu1 %v1574_v31 }
 0x550   :  { %v438_v29 = vpop.f32.mrf.mxu0  ;;  %v458_v32 = vpop.f32.mrf.mxu1 }
 0x551   :  { %v461_v33 = vadd.f32 %v438_v29, %v1755_v26  ;;  %v463_v34 = vrot.slane %v458_v32, 4  ;;  %v507_v29 = vrot.slane %v1724_v6, 4 }
 0x553   :  { %1325 = vtanh.f32 %v461_v33  ;;  %v465_v35 = vadd.f32 %v463_v34, %v1669_v44  ;;  %v466_v38 = vsub.f32 0.0, %v461_v33 }
 0x555   :  { %1327 = vtanh.f32 %v465_v35  ;;  %v467_v39 = vmul.f32 1.442695, %v466_v38  ;;  %v485_v45 = vsub.f32 0.0, %v465_v35 }
 0x557   :  { %1329 = vpow2.f32 %v467_v39  ;;  %v486_v50 = vmul.f32 1.442695, %v485_v45 }
 0x559   :  { %v1326_v36 = vpop.eup %1325 }
 0x55a   :  { %511 = vrot.lane.b32.xlu2 %v1326_v36, %s1451_s3  ;;  %v521_v36 = vrot.slane %v1721_v0, 4 }
 0x55b   :  { %v1328_v37 = vpop.eup %1327 }
 0x55c   :  { %525 = vrot.lane.b32.xlu1 %v1328_v37, %s1451_s3 }
 0x55d   :  { %v1330_v41 = vpop.eup %1329 }
 0x55e   :  { %v469_v43 = vadd.f32 1.0, %v1330_v41 }
 0x560   :  { %1331 = vrcp.f32 %v469_v43  ;;  %v481_v59 = vand.u32 2147483648, %v469_v43  ;;  %vm475_vm4 = vweird.f32 %v469_v43  ;;  %v479_v60 = vand.u32 2147483647, %v469_v43 }
 0x561   :  { %1333 = vpow2.f32 %v486_v50 }
 0x562   :  { %v482_v62 = vor.u32 1.1754944e-38, %v481_v59  ;;  %vm480_vm6 = vcmp.eq.f32.partialorder %v479_v60, 8.507059e+37 }
 0x566   :  { %v1332_v47 = vpop.eup %1331 }
 0x567   :  { %v471_v51 = vmul.f32 %v1332_v47, %v469_v43  ;;  %v1334_v56 = vpop.eup %1333  ;;  %vm476_vm3 = vweird.f32 %v1332_v47 }
 0x568   :  { %v488_v58 = vadd.f32 1.0, %v1334_v56  ;;  %vm477_vm5 = vmor %vm475_vm4, %vm476_vm3 }
 0x569   :  { %v472_v54 = vsub.f32 1.0, %v471_v51 }
 0x56a   :  { %1335 = vrcp.f32 %v488_v58  ;;  %v500_v13 = vand.u32 2147483648, %v488_v58  ;;  %vm494_vm8 = vweird.f32 %v488_v58  ;;  %v498_v16 = vand.u32 2147483647, %v488_v58 }
 0x56b   :  { %v473_v55 = vmul.f32 %v1332_v47, %v472_v54 }
 0x56c   :  { %v501_v20 = vor.u32 1.1754944e-38, %v500_v13  ;;  %vm499_vm11 = vcmp.eq.f32.partialorder %v498_v16, 8.507059e+37 }
 0x56d   :  { %v474_v57 = vadd.f32 %v1332_v47, %v473_v55 }
 0x56f   :  { %v478_v61 = vsel %vm477_vm5, %v1332_v47, %v474_v57 }
 0x570   :  { %v483_v1 = vsel %vm480_vm6, %v482_v62, %v478_v61  ;;  %v1336_v7 = vpop.eup %1335 }
 0x571   :  { %v490_v10 = vmul.f32 %v1336_v7, %v488_v58  ;;  %vm495_vm7 = vweird.f32 %v1336_v7  ;;  %v509_v32 = vmul.f32 %v507_v29, %v483_v1 }
 0x572   :  { %vm496_vm10 = vmor %vm494_vm8, %vm495_vm7 }
 0x573   :  { %v491_v46 = vsub.f32 1.0, %v490_v10 }
 0x575   :  { %v492_v53 = vmul.f32 %v1336_v7, %v491_v46 }
 0x577   :  { %v493_v12 = vadd.f32 %v1336_v7, %v492_v53 }
 0x579   :  { %v497_v17 = vsel %vm496_vm10, %v1336_v7, %v493_v12 }
 0x57a   :  { %v502_v24 = vsel %vm499_vm11, %v501_v20, %v497_v17 }
 0x57b   :  { %v523_v37 = vmul.f32 %v521_v36, %v502_v24 }
 0x5b4   :  { %v512_v63 = vpop.permute.xlu2 %511 }
 0x5b5   :  { %v514_v2 = vmul.f32 %v512_v63, %v483_v1 }
 0x5b7   :  { %516 = vrot.lane.b32.xlu1 %v514_v2, %s1452_s8 }
 0x5ce   :  { %v526_v21 = vpop.permute.xlu1 %525 }
 0x5cf   :  { %v528_v49 = vmul.f32 %v526_v21, %v502_v24 }
 0x5d1   :  { %530 = vrot.lane.b32.xlu0 %v528_v49, %s1452_s8 }
 0x629   :  { %v517_v33 = vpop.permute.xlu1 %516 }
 0x62a   :  { %v1764_v34 = vadd.f32 %v517_v33, %v509_v32 }
 0x62c   :  { %1337 = vtanh.f32 %v1764_v34 }
 0x632   :  { %v1338_v35 = vpop.eup %1337 }
 0x633   :  { %536 = vrot.lane.b32.xlu0 %v1338_v35, %s1451_s3  ;;  %v645_v35 = vrot.slane %v1764_v34, 4 }
 0x643   :  { %v531_v38 = vpop.permute.xlu0 %530 }
 0x644   :  { %v1769_v39 = vadd.f32 %v531_v38, %v523_v37 }
 0x646   :  { %1339 = vtanh.f32 %v1769_v39 }
 0x64c   :  { %v1340_v41 = vpop.eup %1339 }
 0x64d   :  { %542 = vrot.lane.b32.xlu2 %v1340_v41, %s1451_s3 }
 0x6a5   :  { %v537_v6 = vpop.permute.xlu0 %536 }
 0x6a6   :  { %v539_v43 = vmul.f32 %v537_v6, %v483_v1 }
 0x6a7   :  { %v543_v45 = vpop.permute.xlu2 %542 }
 0x6a8   :  { %v545_v47 = vmul.f32 %v543_v45, %v502_v24  ;;  %547 = vrot.lane.b32.xlu1 %v539_v43, %s1452_s8  ;;  %v659_v24 = vrot.slane %v1769_v39, 4 }
 0x6aa   :  { %v551_v50 = vrot.slane %v545_v47, 4 }
 0x6ac   :  { %552 = vrot.lane.b32.xlu2 %v551_v50, %s1451_s3 }
 0x706   :  { %v553_v51 = vpop.permute.xlu2 %552 }
 0x71a   :  { %v548_v0 = vpop.permute.xlu1 %547 }
 0x71b   :  { %v555_v54 = vsel %vm277_vm9, %v548_v0, %v553_v51 }
 0x71c   :  { %1276 = vmatmul.msk.f32.vlgmr.msra.gmra.mxu2 %vm59_vm0, %v555_v54  ;;  %1277 = vmatmul.msk.f32.vlgmr.msra.gmra.mxu3 %vm59_vm0, %v555_v54  ;;  %v1817_v54 = vadd.f32 %v1750_v52, %v1671_v48 }
 0x71d   :  { %1121 = vmatpush.msra.mxu2 %v1491_v3  ;;  %1141 = vmatpush.msra.mxu3 %v1495_v5 }
 0x71f   :  { %1122 = vmatpush.msra.mxu2 %v1493_v4  ;;  %1142 = vmatpush.msra.mxu3 %v1505_v8 }
 0x721   :  { %1123 = vmatpush.msra.mxu2 %v1507_v9  ;;  %1143 = vmatpush.msra.mxu3 %v1512_v11 }
 0x723   :  { %1124 = vmatpush.msra.mxu2 %v1522_v14  ;;  %1144 = vmatpush.msra.mxu3 %v1524_v15 }
 0x725   :  { %1125 = vmatpush.msra.mxu2 %v1534_v18  ;;  %1145 = vmatpush.msra.mxu3 %v1536_v19 }
 0x727   :  { %1126 = vmatpush.msra.mxu2 %v1546_v22  ;;  %1146 = vmatpush.msra.mxu3 %v1548_v23 }
 0x729   :  { %1127 = vmatpush.msra.mxu2 %v1561_v27  ;;  %1147 = vmatpush.msra.mxu3 %v1565_v28 }
 0x72b   :  { %1128 = vmatpush.msra.mxu2 %v1570_v30  ;;  %1148 = vmatpush.msra.mxu3 %v1574_v31 }
 0x79f   :  { %v576_v3 = vpop.f32.mrf.mxu2  ;;  %v596_v4 = vpop.f32.mrf.mxu3 }
 0x7a0   :  { %v600_v5 = vrot.slane %v576_v3, 4  ;;  %v603_v8 = vadd.f32 %v596_v4, %v1669_v44 }
 0x7a2   :  { %v602_v9 = vadd.f32 %v600_v5, %v1755_v26  ;;  %1341 = vtanh.f32 %v603_v8  ;;  %v623_v15 = vsub.f32 0.0, %v603_v8 }
 0x7a4   :  { %1343 = vtanh.f32 %v602_v9  ;;  %v604_v18 = vsub.f32 0.0, %v602_v9  ;;  %v624_v19 = vmul.f32 1.442695, %v623_v15 }
 0x7a6   :  { %v605_v22 = vmul.f32 1.442695, %v604_v18  ;;  %1345 = vpow2.f32 %v624_v19 }
 0x7a8   :  { %v1342_v11 = vpop.eup %1341  ;;  %1347 = vpow2.f32 %v605_v22 }
 0x7a9   :  { %663 = vrot.lane.b32.xlu0 %v1342_v11, %s1451_s3 }
 0x7aa   :  { %v1344_v14 = vpop.eup %1343 }
 0x7ab   :  { %649 = vrot.lane.b32.xlu1 %v1344_v14, %s1451_s3 }
 0x7ac   :  { %v1346_v23 = vpop.eup %1345 }
 0x7ad   :  { %v626_v28 = vadd.f32 1.0, %v1346_v23 }
 0x7ae   :  { %v1348_v27 = vpop.eup %1347 }
 0x7af   :  { %v607_v30 = vadd.f32 1.0, %v1348_v27  ;;  %1349 = vrcp.f32 %v626_v28  ;;  %v638_v61 = vand.u32 2147483648, %v626_v28  ;;  %vm632_vm13 = vweird.f32 %v626_v28 }
 0x7b0   :  { %v636_v62 = vand.u32 2147483647, %v626_v28 }
 0x7b1   :  { %1351 = vrcp.f32 %v607_v30  ;;  %v619_v1 = vand.u32 2147483648, %v607_v30  ;;  %vm613_vm1 = vweird.f32 %v607_v30  ;;  %v617_v7 = vand.u32 2147483647, %v607_v30 }
 0x7b2   :  { %v639_v10 = vor.u32 1.1754944e-38, %v638_v61  ;;  %vm637_vm3 = vcmp.eq.f32.partialorder %v636_v62, 8.507059e+37 }
 0x7b3   :  { %v620_v13 = vor.u32 1.1754944e-38, %v619_v1  ;;  %vm618_vm4 = vcmp.eq.f32.partialorder %v617_v7, 8.507059e+37 }
 0x7b5   :  { %v1350_v31 = vpop.eup %1349 }
 0x7b6   :  { %v628_v26 = vmul.f32 %v1350_v31, %v626_v28  ;;  %vm633_vm12 = vweird.f32 %v1350_v31 }
 0x7b7   :  { %v1352_v44 = vpop.eup %1351  ;;  %vm634_vm15 = vmor %vm632_vm13, %vm633_vm12 }
 0x7b8   :  { %v609_v55 = vmul.f32 %v1352_v44, %v607_v30  ;;  %v629_v56 = vsub.f32 1.0, %v628_v26  ;;  %vm614_vm14 = vweird.f32 %v1352_v44 }
 0x7b9   :  { %vm615_vm2 = vmor %vm613_vm1, %vm614_vm14 }
 0x7ba   :  { %v610_v57 = vsub.f32 1.0, %v609_v55  ;;  %v630_v58 = vmul.f32 %v1350_v31, %v629_v56 }
 0x7bc   :  { %v611_v59 = vmul.f32 %v1352_v44, %v610_v57  ;;  %v631_v60 = vadd.f32 %v1350_v31, %v630_v58 }
 0x7be   :  { %v612_v63 = vadd.f32 %v1352_v44, %v611_v59  ;;  %v635_v2 = vsel %vm634_vm15, %v1350_v31, %v631_v60 }
 0x7bf   :  { %v640_v12 = vsel %vm637_vm3, %v639_v10, %v635_v2 }
 0x7c0   :  { %v616_v46 = vsel %vm615_vm2, %v1352_v44, %v612_v63  ;;  %v661_v49 = vmul.f32 %v659_v24, %v640_v12 }
 0x7c1   :  { %v621_v20 = vsel %vm618_vm4, %v620_v13, %v616_v46 }
 0x7c2   :  { %v647_v36 = vmul.f32 %v645_v35, %v621_v20 }
 0x81b   :  { %v664_v53 = vpop.permute.xlu0 %663 }
 0x81c   :  { %v666_v16 = vmul.f32 %v664_v53, %v640_v12 }
 0x81d   :  { %v650_v17 = vpop.permute.xlu1 %649 }
 0x81e   :  { %v652_v21 = vmul.f32 %v650_v17, %v621_v20  ;;  %668 = vrot.lane.b32.xlu2 %v666_v16, %s1452_s8 }
 0x820   :  { %654 = vrot.lane.b32.xlu0 %v652_v21, %s1452_s8 }
 0x878   :  { %v669_v29 = vpop.permute.xlu2 %668 }
 0x879   :  { %v1801_v32 = vadd.f32 %v669_v29, %v661_v49 }
 0x87b   :  { %1353 = vtanh.f32 %v1801_v32  ;;  %v798_v24 = vrot.slane %v1801_v32, 4 }
 0x881   :  { %v1354_v33 = vpop.eup %1353 }
 0x882   :  { %680 = vrot.lane.b32.xlu1 %v1354_v33, %s1451_s3 }
 0x892   :  { %v655_v37 = vpop.permute.xlu0 %654 }
 0x893   :  { %v1806_v38 = vadd.f32 %v655_v37, %v647_v36 }
 0x895   :  { %1355 = vtanh.f32 %v1806_v38  ;;  %v784_v21 = vrot.slane %v1806_v38, 4 }
 0x89b   :  { %v1356_v41 = vpop.eup %1355 }
 0x89c   :  { %674 = vrot.lane.b32.xlu2 %v1356_v41, %s1451_s3 }
 0x8f4   :  { %v681_v39 = vpop.permute.xlu1 %680 }
 0x8f5   :  { %v683_v6 = vmul.f32 %v681_v39, %v640_v12 }
 0x8f6   :  { %v675_v43 = vpop.permute.xlu2 %674 }
 0x8f7   :  { %v689_v45 = vrot.slane %v683_v6, 4  ;;  %v677_v47 = vmul.f32 %v675_v43, %v621_v20 }
 0x8f9   :  { %690 = vrot.lane.b32.xlu1 %v689_v45, %s1451_s3  ;;  %685 = vrot.lane.b32.xlu0 %v677_v47, %s1452_s8 }
 0x96b   :  { %v691_v50 = vpop.permute.xlu1 %690  ;;  %v686_v34 = vpop.permute.xlu0 %685 }
 0x96c   :  { %v693_v51 = vsel %vm277_vm9, %v686_v34, %v691_v50 }
 0x96d   :  { %v695_v0 = vrot.slane %v693_v51, 4 }
 0x96f   :  { %1278 = vmatmul.msk.f32.vlgmr.msra.gmra.mxu0 %vm59_vm0, %v695_v0  ;;  %1279 = vmatmul.msk.f32.vlgmr.msra.gmra.mxu1 %vm59_vm0, %v695_v0 }
 0x9ec   :  { %v715_v3 = vpop.f32.mrf.mxu0  ;;  %v735_v4 = vpop.f32.mrf.mxu1 }
 0x9ed   :  { %v738_v5 = vadd.f32 %v715_v3, %v1817_v54  ;;  %v740_v8 = vrot.slane %v735_v4, 4 }
 0x9ef   :  { %1357 = vtanh.f32 %v738_v5  ;;  %v742_v9 = vadd.f32 %v740_v8, %v1667_v42  ;;  %v743_v22 = vsub.f32 0.0, %v738_v5 }
 0x9f1   :  { %1359 = vtanh.f32 %v742_v9  ;;  %v762_v15 = vsub.f32 0.0, %v742_v9  ;;  %v744_v23 = vmul.f32 1.442695, %v743_v22 }
 0x9f3   :  { %v763_v18 = vmul.f32 1.442695, %v762_v15 }
 0x9f5   :  { %v1358_v11 = vpop.eup %1357  ;;  %1361 = vpow2.f32 %v763_v18 }
 0x9f6   :  { %788 = vrot.lane.b32.xlu0 %v1358_v11, %s1451_s3 }
 0x9f7   :  { %v1360_v14 = vpop.eup %1359 }
 0x9f8   :  { %802 = vrot.lane.b32.xlu2 %v1360_v14, %s1451_s3 }
 0x9fb   :  { %v1362_v52 = vpop.eup %1361 }
 0x9fc   :  { %v765_v19 = vadd.f32 1.0, %v1362_v52 }
 0x9fe   :  { %1363 = vrcp.f32 %v765_v19  ;;  %v777_v56 = vand.u32 2147483648, %v765_v19  ;;  %vm771_vm6 = vweird.f32 %v765_v19  ;;  %v775_v57 = vand.u32 2147483647, %v765_v19 }
 0x9ff   :  { %1365 = vpow2.f32 %v744_v23 }
 0xa00   :  { %v778_v59 = vor.u32 1.1754944e-38, %v777_v56  ;;  %vm776_vm8 = vcmp.eq.f32.partialorder %v775_v57, 8.507059e+37 }
 0xa04   :  { %v1364_v27 = vpop.eup %1363 }
 0xa05   :  { %v767_v28 = vmul.f32 %v1364_v27, %v765_v19  ;;  %v1366_v31 = vpop.eup %1365  ;;  %vm772_vm5 = vweird.f32 %v1364_v27 }
 0xa06   :  { %v746_v26 = vadd.f32 1.0, %v1366_v31  ;;  %vm773_vm7 = vmor %vm771_vm6, %vm772_vm5 }
 0xa07   :  { %v768_v30 = vsub.f32 1.0, %v767_v28 }
 0xa08   :  { %1367 = vrcp.f32 %v746_v26  ;;  %v758_v46 = vand.u32 2147483648, %v746_v26  ;;  %vm752_vm11 = vweird.f32 %v746_v26  ;;  %v756_v53 = vand.u32 2147483647, %v746_v26 }
 0xa09   :  { %v769_v44 = vmul.f32 %v1364_v27, %v768_v30 }
 0xa0a   :  { %v759_v13 = vor.u32 1.1754944e-38, %v758_v46  ;;  %vm757_vm13 = vcmp.eq.f32.partialorder %v756_v53, 8.507059e+37 }
 0xa0b   :  { %v770_v55 = vadd.f32 %v1364_v27, %v769_v44 }
 0xa0d   :  { %v774_v58 = vsel %vm773_vm7, %v1364_v27, %v770_v55 }
 0xa0e   :  { %v1368_v60 = vpop.eup %1367  ;;  %v779_v62 = vsel %vm776_vm8, %v778_v59, %v774_v58 }
 0xa0f   :  { %v748_v1 = vmul.f32 %v1368_v60, %v746_v26  ;;  %vm753_vm10 = vweird.f32 %v1368_v60  ;;  %v800_v35 = vmul.f32 %v798_v24, %v779_v62 }
 0xa10   :  { %vm754_vm12 = vmor %vm752_vm11, %vm753_vm10 }
 0xa11   :  { %v749_v2 = vsub.f32 1.0, %v748_v1 }
 0xa13   :  { %v750_v7 = vmul.f32 %v1368_v60, %v749_v2 }
 0xa15   :  { %v751_v10 = vadd.f32 %v1368_v60, %v750_v7 }
 0xa17   :  { %v755_v12 = vsel %vm754_vm12, %v1368_v60, %v751_v10 }
 0xa18   :  { %v760_v17 = vsel %vm757_vm13, %v759_v13, %v755_v12 }
 0xa19   :  { %v786_v49 = vmul.f32 %v784_v21, %v760_v17 }
 0xa52   :  { %v803_v61 = vpop.permute.xlu2 %802 }
 0xa53   :  { %v805_v63 = vmul.f32 %v803_v61, %v779_v62 }
 0xa55   :  { %807 = vrot.lane.b32.xlu1 %v805_v63, %s1452_s8 }
 0xa68   :  { %v789_v16 = vpop.permute.xlu0 %788 }
 0xa69   :  { %v791_v20 = vmul.f32 %v789_v16, %v760_v17 }
 0xa6b   :  { %793 = vrot.lane.b32.xlu2 %v791_v20, %s1452_s8 }
 0xac5   :  { %v794_v29 = vpop.permute.xlu2 %793 }
 0xac6   :  { %v1827_v33 = vadd.f32 %v794_v29, %v786_v49 }
 0xac7   :  { %v808_v36 = vpop.permute.xlu1 %807 }
 0xac8   :  { %1369 = vtanh.f32 %v1827_v33  ;;  %v1830_v37 = vadd.f32 %v808_v36, %v800_v35  ;;  %v922_v13 = vrot.slane %v1827_v33, 4 }
 0xaca   :  { %1371 = vtanh.f32 %v1830_v37  ;;  %v936_v24 = vrot.slane %v1830_v37, 4 }
 0xace   :  { %v1370_v41 = vpop.eup %1369 }
 0xacf   :  { %813 = vrot.lane.b32.xlu1 %v1370_v41, %s1451_s3 }
 0xad0   :  { %v1372_v39 = vpop.eup %1371 }
 0xad1   :  { %819 = vrot.lane.b32.xlu0 %v1372_v39, %s1451_s3 }
 0xb41   :  { %v814_v38 = vpop.permute.xlu1 %813 }
 0xb42   :  { %v816_v32 = vmul.f32 %v814_v38, %v760_v17 }
 0xb43   :  { %v820_v6 = vpop.permute.xlu0 %819 }
 0xb44   :  { %v822_v43 = vmul.f32 %v820_v6, %v779_v62  ;;  %824 = vrot.lane.b32.xlu2 %v816_v32, %s1452_s8 }
 0xb46   :  { %v828_v45 = vrot.slane %v822_v43, 4 }
 0xb48   :  { %829 = vrot.lane.b32.xlu0 %v828_v45, %s1451_s3 }
 0xb9e   :  { %v825_v47 = vpop.permute.xlu2 %824 }
 0xbba   :  { %v830_v50 = vpop.permute.xlu0 %829 }
 0xbbb   :  { %v832_v34 = vsel %vm277_vm9, %v825_v47, %v830_v50  ;;  %v1863_v47 = vadd.f32 %v1752_v25, %v1671_v48 }
 0xbbc   :  { %1280 = vmatmul.msk.f32.vlgmr.msrb.gmra.mxu2 %vm59_vm0, %v832_v34  ;;  %1281 = vmatmul.msk.f32.vlgmr.msrb.gmra.mxu3 %vm59_vm0, %v832_v34 }
 0xc3f   :  { %v853_v51 = vpop.f32.mrf.mxu2  ;;  %v873_v0 = vpop.f32.mrf.mxu3 }
 0xc40   :  { %v877_v3 = vrot.slane %v853_v51, 4  ;;  %v880_v4 = vadd.f32 %v873_v0, %v1667_v42 }
 0xc42   :  { %v879_v5 = vadd.f32 %v877_v3, %v1817_v54  ;;  %1373 = vtanh.f32 %v880_v4  ;;  %v900_v52 = vsub.f32 0.0, %v880_v4 }
 0xc44   :  { %1375 = vtanh.f32 %v879_v5  ;;  %v881_v11 = vsub.f32 0.0, %v879_v5  ;;  %v901_v19 = vmul.f32 1.442695, %v900_v52 }
 0xc46   :  { %v882_v14 = vmul.f32 1.442695, %v881_v11 }
 0xc48   :  { %v1374_v8 = vpop.eup %1373  ;;  %1377 = vpow2.f32 %v882_v14 }
 0xc49   :  { %940 = vrot.lane.b32.xlu1 %v1374_v8, %s1451_s3 }
 0xc4a   :  { %v1376_v9 = vpop.eup %1375 }
 0xc4b   :  { %926 = vrot.lane.b32.xlu2 %v1376_v9, %s1451_s3 }
 0xc4e   :  { %v1378_v15 = vpop.eup %1377 }
 0xc4f   :  { %v884_v18 = vadd.f32 1.0, %v1378_v15 }
 0xc51   :  { %1379 = vrcp.f32 %v884_v18  ;;  %v896_v31 = vand.u32 2147483648, %v884_v18  ;;  %vm890_vm15 = vweird.f32 %v884_v18  ;;  %v894_v44 = vand.u32 2147483647, %v884_v18 }
 0xc52   :  { %1381 = vpow2.f32 %v901_v19 }
 0xc53   :  { %v897_v55 = vor.u32 1.1754944e-38, %v896_v31  ;;  %vm895_vm2 = vcmp.eq.f32.partialorder %v894_v44, 8.507059e+37 }
 0xc57   :  { %v1380_v22 = vpop.eup %1379 }
 0xc58   :  { %v886_v42 = vmul.f32 %v1380_v22, %v884_v18  ;;  %v1382_v23 = vpop.eup %1381  ;;  %vm891_vm14 = vweird.f32 %v1380_v22 }
 0xc59   :  { %v903_v28 = vadd.f32 1.0, %v1382_v23  ;;  %vm892_vm1 = vmor %vm890_vm15, %vm891_vm14 }
 0xc5a   :  { %v887_v54 = vsub.f32 1.0, %v886_v42 }
 0xc5b   :  { %1383 = vrcp.f32 %v903_v28  ;;  %v915_v1 = vand.u32 2147483648, %v903_v28  ;;  %vm909_vm4 = vweird.f32 %v903_v28  ;;  %v913_v2 = vand.u32 2147483647, %v903_v28 }
 0xc5c   :  { %v888_v27 = vmul.f32 %v1380_v22, %v887_v54 }
 0xc5d   :  { %v916_v10 = vor.u32 1.1754944e-38, %v915_v1  ;;  %vm914_vm6 = vcmp.eq.f32.partialorder %v913_v2, 8.507059e+37 }
 0xc5e   :  { %v889_v30 = vadd.f32 %v1380_v22, %v888_v27 }
 0xc60   :  { %v893_v26 = vsel %vm892_vm1, %v1380_v22, %v889_v30 }
 0xc61   :  { %v1384_v56 = vpop.eup %1383  ;;  %v898_v58 = vsel %vm895_vm2, %v897_v55, %v893_v26 }
 0xc62   :  { %v905_v60 = vmul.f32 %v1384_v56, %v903_v28  ;;  %vm910_vm3 = vweird.f32 %v1384_v56  ;;  %v924_v16 = vmul.f32 %v922_v13, %v898_v58 }
 0xc63   :  { %vm911_vm5 = vmor %vm909_vm4, %vm910_vm3 }
 0xc64   :  { %v906_v61 = vsub.f32 1.0, %v905_v60 }
 0xc66   :  { %v907_v62 = vmul.f32 %v1384_v56, %v906_v61 }
 0xc68   :  { %v908_v63 = vadd.f32 %v1384_v56, %v907_v62 }
 0xc6a   :  { %v912_v7 = vsel %vm911_vm5, %v1384_v56, %v908_v63 }
 0xc6b   :  { %v917_v53 = vsel %vm914_vm6, %v916_v10, %v912_v7 }
 0xc6c   :  { %v938_v49 = vmul.f32 %v936_v24, %v917_v53 }
 0xca5   :  { %v927_v57 = vpop.permute.xlu2 %926 }
 0xca6   :  { %v929_v59 = vmul.f32 %v927_v57, %v898_v58 }
 0xca8   :  { %931 = vrot.lane.b32.xlu1 %v929_v59, %s1452_s8 }
 0xcbb   :  { %v941_v46 = vpop.permute.xlu1 %940 }
 0xcbc   :  { %v943_v12 = vmul.f32 %v941_v46, %v917_v53 }
 0xcbe   :  { %945 = vrot.lane.b32.xlu0 %v943_v12, %s1452_s8 }
 0xd1a   :  { %v932_v17 = vpop.permute.xlu1 %931 }
 0xd1b   :  { %v1847_v20 = vadd.f32 %v932_v17, %v924_v16 }
 0xd1d   :  { %1385 = vtanh.f32 %v1847_v20  ;;  %v1061_v16 = vrot.slane %v1847_v20, 4 }
 0xd23   :  { %v1386_v21 = vpop.eup %1385 }
 0xd24   :  { %951 = vrot.lane.b32.xlu0 %v1386_v21, %s1451_s3 }
 0xd30   :  { %v946_v29 = vpop.permute.xlu0 %945 }
 0xd31   :  { %v1852_v35 = vadd.f32 %v946_v29, %v938_v49 }
 0xd33   :  { %1387 = vtanh.f32 %v1852_v35  ;;  %v1075_v10 = vrot.slane %v1852_v35, 4 }
 0xd39   :  { %v1388_v36 = vpop.eup %1387 }
 0xd3a   :  { %957 = vrot.lane.b32.xlu2 %v1388_v36, %s1451_s3 }
 0xd94   :  { %v958_v33 = vpop.permute.xlu2 %957 }
 0xd95   :  { %v960_v41 = vmul.f32 %v958_v33, %v917_v53 }
 0xd96   :  { %v952_v39 = vpop.permute.xlu0 %951 }
 0xd97   :  { %v966_v38 = vrot.slane %v960_v41, 4  ;;  %v954_v32 = vmul.f32 %v952_v39, %v898_v58 }
 0xd99   :  { %967 = vrot.lane.b32.xlu2 %v966_v38, %s1451_s3  ;;  %962 = vrot.lane.b32.xlu1 %v954_v32, %s1452_s8 }
 0xdf3   :  { %v968_v6 = vpop.permute.xlu2 %967 }
 0xe0b   :  { %v963_v37 = vpop.permute.xlu1 %962 }
 0xe0c   :  { %v970_v43 = vsel %vm277_vm9, %v963_v37, %v968_v6 }
 0xe0d   :  { %v972_v45 = vrot.slane %v970_v43, 4 }
 0xe0f   :  { %1282 = vmatmul.msk.f32.vlgmr.msrb.gmra.mxu0 %vm59_vm0, %v972_v45  ;;  %1283 = vmatmul.msk.f32.vlgmr.msrb.gmra.mxu1 %vm59_vm0, %v972_v45 }
 0xe8c   :  { %v992_v50 = vpop.f32.mrf.mxu0  ;;  %v1012_v34 = vpop.f32.mrf.mxu1 }
 0xe8d   :  { %v1015_v51 = vadd.f32 %v992_v50, %v1863_v47  ;;  %v1017_v0 = vrot.slane %v1012_v34, 4 }
 0xe8f   :  { %1389 = vtanh.f32 %v1015_v51  ;;  %v1019_v3 = vadd.f32 %v1017_v0, %v1665_v40  ;;  %v1020_v8 = vsub.f32 0.0, %v1015_v51 }
 0xe91   :  { %1391 = vtanh.f32 %v1019_v3  ;;  %v1039_v9 = vsub.f32 0.0, %v1019_v3  ;;  %v1021_v11 = vmul.f32 1.442695, %v1020_v8 }
 0xe93   :  { %v1040_v48 = vmul.f32 1.442695, %v1039_v9  ;;  %1393 = vpow2.f32 %v1021_v11 }
 0xe95   :  { %v1390_v4 = vpop.eup %1389  ;;  %1395 = vpow2.f32 %v1040_v48 }
 0xe96   :  { %1065 = vrot.lane.b32.xlu1 %v1390_v4, %s1451_s3 }
 0xe97   :  { %v1392_v5 = vpop.eup %1391 }
 0xe98   :  { %1079 = vrot.lane.b32.xlu0 %v1392_v5, %s1451_s3 }
 0xe99   :  { %v1394_v25 = vpop.eup %1393 }
 0xe9a   :  { %v1023_v15 = vadd.f32 1.0, %v1394_v25 }
 0xe9b   :  { %v1396_v14 = vpop.eup %1395 }
 0xe9c   :  { %v1042_v18 = vadd.f32 1.0, %v1396_v14  ;;  %1397 = vrcp.f32 %v1023_v15  ;;  %v1035_v31 = vand.u32 2147483648, %v1023_v15  ;;  %vm1029_vm8 = vweird.f32 %v1023_v15 }
 0xe9d   :  { %v1033_v44 = vand.u32 2147483647, %v1023_v15 }
 0xe9e   :  { %1399 = vrcp.f32 %v1042_v18  ;;  %v1054_v55 = vand.u32 2147483648, %v1042_v18  ;;  %vm1048_vm12 = vweird.f32 %v1042_v18  ;;  %v1052_v57 = vand.u32 2147483647, %v1042_v18 }
 0xe9f   :  { %v1036_v58 = vor.u32 1.1754944e-38, %v1035_v31  ;;  %vm1034_vm14 = vcmp.eq.f32.partialorder %v1033_v44, 8.507059e+37 }
 0xea0   :  { %v1055_v62 = vor.u32 1.1754944e-38, %v1054_v55  ;;  %vm1053_vm15 = vcmp.eq.f32.partialorder %v1052_v57, 8.507059e+37 }
 0xea2   :  { %v1398_v52 = vpop.eup %1397 }
 0xea3   :  { %v1025_v22 = vmul.f32 %v1398_v52, %v1023_v15  ;;  %vm1030_vm7 = vweird.f32 %v1398_v52 }
 0xea4   :  { %v1400_v19 = vpop.eup %1399  ;;  %vm1031_vm11 = vmor %vm1029_vm8, %vm1030_vm7  ;;  %vm1252_vm8 = vcmask 261124  }
 0xea5   :  { %v1044_v42 = vmul.f32 %v1400_v19, %v1042_v18  ;;  %v1026_v54 = vsub.f32 1.0, %v1025_v22  ;;  %vm1049_vm10 = vweird.f32 %v1400_v19 }
 0xea6   :  { %vm1050_vm13 = vmor %vm1048_vm12, %vm1049_vm10  ;;  %vm1257_vm10 = vcmask 523524  }
 0xea7   :  { %v1045_v23 = vsub.f32 1.0, %v1044_v42  ;;  %v1027_v27 = vmul.f32 %v1398_v52, %v1026_v54 }
 0xea9   :  { %v1046_v28 = vmul.f32 %v1400_v19, %v1045_v23  ;;  %v1028_v30 = vadd.f32 %v1398_v52, %v1027_v27 }
 0xeab   :  { %v1047_v26 = vadd.f32 %v1400_v19, %v1046_v28  ;;  %v1032_v56 = vsel %vm1031_vm11, %v1398_v52, %v1028_v30 }
 0xeac   :  { %v1037_v61 = vsel %vm1034_vm14, %v1036_v58, %v1032_v56 }
 0xead   :  { %v1051_v59 = vsel %vm1050_vm13, %v1400_v19, %v1047_v26  ;;  %v1063_v17 = vmul.f32 %v1061_v16, %v1037_v61 }
 0xeae   :  { %v1056_v2 = vsel %vm1053_vm15, %v1055_v62, %v1051_v59 }
 0xeaf   :  { %v1077_v46 = vmul.f32 %v1075_v10, %v1056_v2 }
 0xf08   :  { %v1066_v60 = vpop.permute.xlu1 %1065 }
 0xf09   :  { %v1068_v63 = vmul.f32 %v1066_v60, %v1037_v61 }
 0xf0a   :  { %v1080_v1 = vpop.permute.xlu0 %1079 }
 0xf0b   :  { %v1082_v7 = vmul.f32 %v1080_v1, %v1056_v2  ;;  %1070 = vrot.lane.b32.xlu0 %v1068_v63, %s1452_s8 }
 0xf0d   :  { %1084 = vrot.lane.b32.xlu2 %v1082_v7, %s1452_s8 }
 0xf67   :  { %v1085_v53 = vpop.permute.xlu2 %1084 }
 0xf68   :  { %v1872_v12 = vadd.f32 %v1085_v53, %v1077_v46 }
 0xf6a   :  { %1401 = vtanh.f32 %v1872_v12  ;;  %v1213_v60 = vrot.slane %v1872_v12, 4 }
 0xf70   :  { %v1402_v13 = vpop.eup %1401 }
 0xf71   :  { %1096 = vrot.lane.b32.xlu1 %v1402_v13, %s1451_s3 }
 0xf7d   :  { %v1071_v21 = vpop.permute.xlu0 %1070 }
 0xf7e   :  { %v1877_v24 = vadd.f32 %v1071_v21, %v1063_v17 }
 0xf80   :  { %1403 = vtanh.f32 %v1877_v24 }
 0xf86   :  { %v1404_v49 = vpop.eup %1403 }
 0xf87   :  { %1090 = vrot.lane.b32.xlu2 %v1404_v49, %s1451_s3 }
 0xfe1   :  { %v1091_v29 = vpop.permute.xlu2 %1090 }
 0xfe2   :  { %v1093_v35 = vmul.f32 %v1091_v29, %v1037_v61  ;;  %v1199_v61 = vrot.slane %v1877_v24, 4 }
 0xfe3   :  { %v1097_v36 = vpop.permute.xlu1 %1096 }
 0xfe4   :  { %v1099_v33 = vmul.f32 %v1097_v36, %v1056_v2  ;;  %1101 = vrot.lane.b32.xlu0 %v1093_v35, %s1452_s8 }
 0xfe6   :  { %v1105_v41 = vrot.slane %v1099_v33, 4 }
 0xfe8   :  { %1106 = vrot.lane.b32.xlu1 %v1105_v41, %s1451_s3 }
0x1056   :  { %v1102_v39 = vpop.permute.xlu0 %1101 }
0x105a   :  { %v1107_v20 = vpop.permute.xlu1 %1106 }
0x105b   :  { %v1109_v38 = vsel %vm277_vm9, %v1102_v39, %v1107_v20 }
0x105c   :  { %1284 = vmatmul.msk.f32.vlgmr.msra.gmra.mxu2 %vm59_vm0, %v1109_v38  ;;  %1285 = vmatmul.msk.f32.vlgmr.msra.gmra.mxu3 %vm59_vm0, %v1109_v38 }
0x10df   :  { %v1130_v32 = vpop.f32.mrf.mxu2  ;;  %v1150_v6 = vpop.f32.mrf.mxu3 }
0x10e0   :  { %v1154_v37 = vrot.slane %v1130_v32, 4  ;;  %v1157_v43 = vadd.f32 %v1150_v6, %v1665_v40 }
0x10e2   :  { %v1156_v45 = vadd.f32 %v1154_v37, %v1863_v47  ;;  %1405 = vtanh.f32 %v1157_v43  ;;  %v1177_v51 = vsub.f32 0.0, %v1157_v43 }
0x10e4   :  { %1407 = vtanh.f32 %v1156_v45  ;;  %v1178_v0 = vmul.f32 1.442695, %v1177_v51  ;;  %v1158_v5 = vsub.f32 0.0, %v1156_v45 }
0x10e6   :  { %1409 = vpow2.f32 %v1178_v0  ;;  %v1159_v9 = vmul.f32 1.442695, %v1158_v5 }
0x10e8   :  { %v1406_v50 = vpop.eup %1405 }
0x10e9   :  { %1217 = vrot.lane.b32.xlu2 %v1406_v50, %s1451_s3 }
0x10ea   :  { %v1408_v34 = vpop.eup %1407 }
0x10eb   :  { %1203 = vrot.lane.b32.xlu0 %v1408_v34, %s1451_s3 }
0x10ec   :  { %v1410_v3 = vpop.eup %1409 }
0x10ed   :  { %v1180_v4 = vadd.f32 1.0, %v1410_v3 }
0x10ef   :  { %1411 = vrcp.f32 %v1180_v4  ;;  %v1192_v15 = vand.u32 2147483648, %v1180_v4  ;;  %vm1186_vm1 = vweird.f32 %v1180_v4  ;;  %v1190_v18 = vand.u32 2147483647, %v1180_v4 }
0x10f0   :  { %1413 = vpow2.f32 %v1159_v9 }
0x10f1   :  { %v1193_v19 = vor.u32 1.1754944e-38, %v1192_v15  ;;  %vm1191_vm3 = vcmp.eq.f32.partialorder %v1190_v18, 8.507059e+37 }
0x10f5   :  { %v1412_v8 = vpop.eup %1411 }
0x10f6   :  { %v1182_v40 = vmul.f32 %v1412_v8, %v1180_v4  ;;  %v1414_v48 = vpop.eup %1413  ;;  %vm1187_vm0 = vweird.f32 %v1412_v8 }
0x10f7   :  { %v1161_v14 = vadd.f32 1.0, %v1414_v48  ;;  %vm1188_vm2 = vmor %vm1186_vm1, %vm1187_vm0 }
0x10f8   :  { %v1183_v47 = vsub.f32 1.0, %v1182_v40 }
0x10f9   :  { %1415 = vrcp.f32 %v1161_v14  ;;  %v1173_v44 = vand.u32 2147483648, %v1161_v14  ;;  %vm1167_vm5 = vweird.f32 %v1161_v14  ;;  %v1171_v26 = vand.u32 2147483647, %v1161_v14 }
0x10fa   :  { %v1184_v11 = vmul.f32 %v1412_v8, %v1183_v47 }
0x10fb   :  { %v1174_v56 = vor.u32 1.1754944e-38, %v1173_v44  ;;  %vm1172_vm7 = vcmp.eq.f32.partialorder %v1171_v26, 8.507059e+37 }
0x10fc   :  { %v1185_v25 = vadd.f32 %v1412_v8, %v1184_v11 }
0x10fe   :  { %v1189_v52 = vsel %vm1188_vm2, %v1412_v8, %v1185_v25 }
0x10ff   :  { %v1194_v42 = vsel %vm1191_vm3, %v1193_v19, %v1189_v52  ;;  %v1416_v23 = vpop.eup %1415 }
0x1100   :  { %v1163_v27 = vmul.f32 %v1416_v23, %v1161_v14  ;;  %vm1168_vm4 = vweird.f32 %v1416_v23  ;;  %v1215_v62 = vmul.f32 %v1213_v60, %v1194_v42 }
0x1101   :  { %vm1169_vm6 = vmor %vm1167_vm5, %vm1168_vm4 }
0x1102   :  { %v1164_v28 = vsub.f32 1.0, %v1163_v27 }
0x1104   :  { %v1165_v30 = vmul.f32 %v1416_v23, %v1164_v28 }
0x1106   :  { %v1166_v31 = vadd.f32 %v1416_v23, %v1165_v30 }
0x1108   :  { %v1170_v55 = vsel %vm1169_vm6, %v1416_v23, %v1166_v31 }
0x1109   :  { %v1175_v58 = vsel %vm1172_vm7, %v1174_v56, %v1170_v55 }
0x110a   :  { %v1201_v2 = vmul.f32 %v1199_v61, %v1175_v58 }
0x1143   :  { %v1218_v22 = vpop.permute.xlu2 %1217 }
0x1144   :  { %v1220_v54 = vmul.f32 %v1218_v22, %v1194_v42 }
0x1146   :  { %1222 = vrot.lane.b32.xlu1 %v1220_v54, %s1452_s8 }
0x115d   :  { %v1204_v57 = vpop.permute.xlu0 %1203 }
0x115e   :  { %v1206_v59 = vmul.f32 %v1204_v57, %v1175_v58 }
0x1160   :  { %1208 = vrot.lane.b32.xlu2 %v1206_v59, %s1452_s8 }
0x11b8   :  { %v1223_v63 = vpop.permute.xlu1 %1222 }
0x11b9   :  { %v1225_v1 = vadd.f32 %v1223_v63, %v1215_v62 }
0x11ba   :  { %v1209_v7 = vpop.permute.xlu2 %1208 }
0x11bb   :  { %1417 = vtanh.f32 %v1225_v1  ;;  %v1211_v10 = vadd.f32 %v1209_v7, %v1201_v2 }
0x11bd   :  { %1419 = vtanh.f32 %v1211_v10 }
0x11c1   :  { %v1418_v46 = vpop.eup %1417 }
0x11c2   :  { %1234 = vrot.lane.b32.xlu0 %v1418_v46, %s1451_s3 }
0x11c3   :  { %v1420_v53 = vpop.eup %1419 }
0x11c4   :  { %1228 = vrot.lane.b32.xlu1 %v1420_v53, %s1451_s3 }
0x1234   :  { %v1235_v13 = vpop.permute.xlu0 %1234 }
0x1235   :  { %v1237_v16 = vmul.f32 %v1235_v13, %v1194_v42 }
0x1236   :  { %v1229_v17 = vpop.permute.xlu1 %1228 }
0x1237   :  { %v1243_v12 = vrot.slane %v1237_v16, 4  ;;  %v1231_v21 = vmul.f32 %v1229_v17, %v1175_v58 }
0x1239   :  { %1244 = vrot.lane.b32.xlu0 %v1243_v12, %s1451_s3  ;;  %1239 = vrot.lane.b32.xlu2 %v1231_v21, %s1452_s8 }
0x1293   :  { %v1240_v24 = vpop.permute.xlu2 %1239 }
0x12ab   :  { %v1245_v49 = vpop.permute.xlu0 %1244 }
0x12ac   :  { %v1247_v29 = vsel %vm277_vm9, %v1240_v24, %v1245_v49 }
0x12ad   :  { %1254 = vrot.lane.b32.xlu2 %v1247_v29, %s1452_s8  ;;  %1249 = vrot.lane.b32.xlu1 %v1247_v29, %s1453_s9 }
0x1307   :  { %v1255_v36 = vpop.permute.xlu2 %1254 }
0x131f   :  { %v1250_v35 = vpop.permute.xlu1 %1249 }
0x1320   :  { %1253 = vst.msk [vmem:[%s1910_s4 - $0x4] sm:$0xf0] %vm1252_vm8, %v1250_v35 }
0x1321   :  { %1258 = vst.msk [vmem:[%s1910_s4 - $0x4] sm:$0xf0] %vm1257_vm10, %v1255_v36 }
0x1322   :  { %1263 = vsyncpa [#allocation3], 1 }

// kernel: _lambda_.3
= control target key start
LH: loop header
LB: loop body
LE: loop exit
PB: predicated region body
PF: predicated region fallthrough
CT: control target
= control target key end

     0   :  { %vm31_vm0 = vcmask 130048   ;;  %v1438_v22 = vmov 0.0   ;;  %s1440_s10 = smov 32   ;;  %vm250_vm9 = vcmask 261120   ;;  %vm252_vm10 = vcmask 257024   ;;  %s2005_s1 = inlined_call_operand.vmem [shape: f32[16,256], index: 1, kind: input, shape index: {}]   ;;  %s2006_s0 = inlined_call_operand.vmem [shape: f32[32,16], index: 0, kind: input, shape index: {}]   ;;  %s2007_s2 = inlined_call_operand.vmem [shape: f32[64,256], index: 2, kind: input, shape index: {}]   ;;  %s2008_s3 = inlined_call_operand.vmem [shape: f32[1,256], index: 3, kind: input, shape index: {}]   ;;  %s2009_s4 = inlined_call_operand.vmem [shape: f32[8,4,64], index: 4, kind: output, shape index: {}]  }
   0x1   :  { %v24_v0 = vld [vmem:[%s2005_s1 + $0x18] sm:$0xff]  ;;  %v22_v1 = vld [vmem:[%s2005_s1 + $0x8] sm:$0xff]  ;;  %v17_v2 = vld [vmem:[%s2006_s0] sm:$0xff]  ;;  %vm118_vm11 = vcmask 523264  }
   0x2   :  { %87 = vmatpush.msra.mxu1 %v24_v0  ;;  %v1478_v3 = vld [vmem:[%s2007_s2 + $0x70] sm:$0xff]  ;;  %v1483_v4 = vld [vmem:[%s2007_s2 + $0x60] sm:$0xff]  ;;  %v1488_v5 = vld [vmem:[%s2007_s2 + $0x78] sm:$0xff] }
   0x3   :  { %130 = vmatpush.msra.mxu2 %v1478_v3  ;;  %150 = vmatpush.msra.mxu3 %v1488_v5  ;;  %v1495_v6 = vld [vmem:[%s2007_s2 + $0x68] sm:$0xff]  ;;  %v1500_v7 = vld [vmem:[%s2007_s2 + $0x50] sm:$0xff]  ;;  %v1507_v8 = vld [vmem:[%s2007_s2 + $0x58] sm:$0xff] }
   0x4   :  { %88 = vmatpush.msra.mxu1 %v22_v1  ;;  %v1513_v9 = vld [vmem:[%s2007_s2 + $0x40] sm:$0xff]  ;;  %v1520_v10 = vld [vmem:[%s2007_s2 + $0x48] sm:$0xff]  ;;  %v23_v11 = vld [vmem:[%s2005_s1 + $0x10] sm:$0xff] }
   0x5   :  { %1275 = vmatmul.msk.f32.vlgmr.msra.gmra.mxu1 %vm31_vm0, %v17_v2  ;;  %131 = vmatpush.msra.mxu2 %v1483_v4  ;;  %v1529_v12 = vld [vmem:[%s2007_s2 + $0x30] sm:$0xff]  ;;  %v21_v13 = vld [vmem:[%s2005_s1] sm:$0xff]  ;;  %v1538_v14 = vld [vmem:[%s2007_s2 + $0x38] sm:$0xff] }
   0x6   :  { %151 = vmatpush.msra.mxu3 %v1495_v6  ;;  %439 = vmatpush.msrb.mxu1 %v1488_v5  ;;  %v18_v15 = vld [vmem:[%s2006_s0 + $0x8] sm:$0xff]  ;;  %v1548_v16 = vld [vmem:[%s2007_s2 + $0x20] sm:$0xff]  ;;  %v1561_v18 = vld [vmem:[%s2007_s2 + $0x10] sm:$0xff] }
   0x7   :  { %132 = vmatpush.msra.mxu2 %v1500_v7  ;;  %58 = vmatpush.msra.mxu0 %v23_v11  ;;  %v1554_v17 = vld [vmem:[%s2007_s2 + $0x28] sm:$0xff]  ;;  %v1569_v19 = vld [vmem:[%s2007_s2 + $0x18] sm:$0xff]  ;;  %v1575_v20 = vld [vmem:[%s2007_s2] sm:$0xff] }
   0x8   :  { %152 = vmatpush.msra.mxu3 %v1507_v8  ;;  %440 = vmatpush.msrb.mxu1 %v1495_v6  ;;  %v1582_v21 = vld [vmem:[%s2007_s2 + $0x8] sm:$0xff]  ;;  %v19_v23 = vld [vmem:[%s2006_s0 + $0x10] sm:$0xff]  ;;  %v20_v24 = vld [vmem:[%s2006_s0 + $0x18] sm:$0xff] }
   0x9   :  { %133 = vmatpush.msra.mxu2 %v1513_v9  ;;  %59 = vmatpush.msra.mxu0 %v21_v13  ;;  %v25_v25 = vld [vmem:[%s2008_s3] sm:$0x3]  ;;  %s1439_s3 = smov 64  }
   0xa   :  { %153 = vmatpush.msra.mxu3 %v1520_v10  ;;  %1271 = vmatmul.msk.f32.vlgmr.msra.gmra.mxu0 %vm31_vm0, %v17_v2  ;;  %v28_v26 = vperm.slane %v25_v25, 1  ;;  %v1667_v36 = vperm.slane %v25_v25, 0 }
   0xb   :  { %134 = vmatpush.msra.mxu2 %v1529_v12  ;;  %419 = vmatpush.msrb.mxu0 %v1478_v3 }
   0xc   :  { %154 = vmatpush.msra.mxu3 %v1538_v14  ;;  %441 = vmatpush.msrb.mxu1 %v1507_v8 }
   0xd   :  { %1276 = vmatmul.msk.f32.gmra.mxu1 %vm31_vm0, %v18_v15  ;;  %135 = vmatpush.msra.mxu2 %v1548_v16 }
   0xe   :  { %155 = vmatpush.msra.mxu3 %v1554_v17  ;;  %420 = vmatpush.msrb.mxu0 %v1483_v4 }
   0xf   :  { %136 = vmatpush.msra.mxu2 %v1561_v18  ;;  %442 = vmatpush.msrb.mxu1 %v1520_v10 }
  0x10   :  { %156 = vmatpush.msra.mxu3 %v1569_v19  ;;  %421 = vmatpush.msrb.mxu0 %v1500_v7 }
  0x11   :  { %137 = vmatpush.msra.mxu2 %v1575_v20  ;;  %443 = vmatpush.msrb.mxu1 %v1538_v14 }
  0x12   :  { %138 = vmatmul.f32.vlgmr.msra.gmra.mxu2 %v1438_v22  ;;  %157 = vmatpush.msra.mxu3 %v1582_v21 }
  0x13   :  { %158 = vmatmul.f32.vlgmr.msra.gmra.mxu3 %v1438_v22  ;;  %271 = vmatpush.msrb.mxu2 %v1478_v3 }
  0x14   :  { %291 = vmatpush.msrb.mxu3 %v1488_v5  ;;  %1272 = vmatmul.msk.f32.gmra.mxu0 %vm31_vm0, %v18_v15 }
  0x15   :  { %1277 = vmatmul.msk.f32.gmra.mxu1 %vm31_vm0, %v19_v23  ;;  %272 = vmatpush.msrb.mxu2 %v1483_v4 }
  0x16   :  { %292 = vmatpush.msrb.mxu3 %v1495_v6  ;;  %422 = vmatpush.msrb.mxu0 %v1513_v9 }
  0x17   :  { %273 = vmatpush.msrb.mxu2 %v1500_v7  ;;  %444 = vmatpush.msrb.mxu1 %v1554_v17 }
  0x18   :  { %293 = vmatpush.msrb.mxu3 %v1507_v8  ;;  %423 = vmatpush.msrb.mxu0 %v1529_v12 }
  0x19   :  { %274 = vmatpush.msrb.mxu2 %v1513_v9  ;;  %445 = vmatpush.msrb.mxu1 %v1569_v19 }
  0x1a   :  { %294 = vmatpush.msrb.mxu3 %v1520_v10  ;;  %424 = vmatpush.msrb.mxu0 %v1548_v16 }
  0x1b   :  { %275 = vmatpush.msrb.mxu2 %v1529_v12  ;;  %446 = vmatpush.msrb.mxu1 %v1582_v21 }
  0x1c   :  { %295 = vmatpush.msrb.mxu3 %v1538_v14  ;;  %1273 = vmatmul.msk.f32.gmra.mxu0 %vm31_vm0, %v19_v23 }
  0x1d   :  { %1278 = vmatmul.msk.f32.gmra.mxu1 %vm31_vm0, %v20_v24  ;;  %276 = vmatpush.msrb.mxu2 %v1548_v16 }
  0x1e   :  { %296 = vmatpush.msrb.mxu3 %v1554_v17  ;;  %425 = vmatpush.msrb.mxu0 %v1561_v18 }
  0x1f   :  { %277 = vmatpush.msrb.mxu2 %v1561_v18  ;;  %730 = vmatpush.msra.mxu1 %v1488_v5 }
  0x20   :  { %297 = vmatpush.msrb.mxu3 %v1569_v19  ;;  %426 = vmatpush.msrb.mxu0 %v1575_v20 }
  0x21   :  { %278 = vmatpush.msrb.mxu2 %v1575_v20  ;;  %731 = vmatpush.msra.mxu1 %v1495_v6 }
  0x22   :  { %710 = vmatpush.msra.mxu0 %v1478_v3  ;;  %298 = vmatpush.msrb.mxu3 %v1582_v21 }
  0x23   :  { %564 = vmatpush.msra.mxu2 %v1478_v3  ;;  %732 = vmatpush.msra.mxu1 %v1507_v8 }
  0x24   :  { %584 = vmatpush.msra.mxu3 %v1488_v5  ;;  %1274 = vmatmul.msk.f32.gmra.mxu0 %vm31_vm0, %v20_v24 }
  0x25   :  { %565 = vmatpush.msra.mxu2 %v1483_v4  ;;  %711 = vmatpush.msra.mxu0 %v1483_v4 }
  0x26   :  { %585 = vmatpush.msra.mxu3 %v1495_v6  ;;  %733 = vmatpush.msra.mxu1 %v1520_v10 }
  0x27   :  { %566 = vmatpush.msra.mxu2 %v1500_v7  ;;  %712 = vmatpush.msra.mxu0 %v1500_v7 }
  0x28   :  { %586 = vmatpush.msra.mxu3 %v1507_v8  ;;  %734 = vmatpush.msra.mxu1 %v1538_v14 }
  0x29   :  { %567 = vmatpush.msra.mxu2 %v1513_v9  ;;  %713 = vmatpush.msra.mxu0 %v1513_v9 }
  0x2a   :  { %587 = vmatpush.msra.mxu3 %v1520_v10  ;;  %735 = vmatpush.msra.mxu1 %v1554_v17 }
  0x2b   :  { %568 = vmatpush.msra.mxu2 %v1529_v12  ;;  %714 = vmatpush.msra.mxu0 %v1529_v12 }
  0x2c   :  { %588 = vmatpush.msra.mxu3 %v1538_v14  ;;  %736 = vmatpush.msra.mxu1 %v1569_v19 }
  0x2d   :  { %569 = vmatpush.msra.mxu2 %v1548_v16  ;;  %715 = vmatpush.msra.mxu0 %v1548_v16 }
  0x2e   :  { %589 = vmatpush.msra.mxu3 %v1554_v17  ;;  %737 = vmatpush.msra.mxu1 %v1582_v21 }
  0x2f   :  { %570 = vmatpush.msra.mxu2 %v1561_v18  ;;  %716 = vmatpush.msra.mxu0 %v1561_v18 }
  0x30   :  { %590 = vmatpush.msra.mxu3 %v1569_v19 }
  0x31   :  { %571 = vmatpush.msra.mxu2 %v1575_v20  ;;  %717 = vmatpush.msra.mxu0 %v1575_v20 }
  0x32   :  { %591 = vmatpush.msra.mxu3 %v1582_v21 }
  0x82   :  { %v90_v27 = vpop.f32.mrf.mxu1 }
  0x83   :  { %v1661_v28 = vadd.f32 %v90_v27, %v28_v26 }
  0x87   :  { %v61_v38 = vpop.f32.mrf.mxu0 }
  0x88   :  { %v1673_v40 = vadd.f32 %v61_v38, %v1667_v36 }
  0x8a   :  { %v93_v29 = vpop.f32.mrf.mxu1 }
  0x8b   :  { %v1663_v30 = vadd.f32 %v93_v29, %v28_v26 }
  0x92   :  { %v96_v31 = vpop.f32.mrf.mxu1 }
  0x93   :  { %v1665_v32 = vadd.f32 %v96_v31, %v28_v26 }
  0x95   :  { %v139_v41 = vpop.f32.mrf.mxu2 }
  0x96   :  { %v159_v33 = vpop.f32.mrf.mxu3  ;;  %v162_v42 = vadd.f32 %v139_v41, %v1673_v40 }
  0x97   :  { %v164_v34 = vrot.slane %v159_v33, 4 }
  0x98   :  { %v167_v47 = vsub.f32 0.0, %v162_v42 }
  0x9a   :  { %v99_v35 = vpop.f32.mrf.mxu1  ;;  %v168_v48 = vmul.f32 1.442695, %v167_v47 }
  0x9b   :  { %v1669_v37 = vadd.f32 %v99_v35, %v28_v26 }
  0x9d   :  { %v166_v39 = vadd.f32 %v164_v34, %v1669_v37 }
  0x9f   :  { %1310 = vtanh.f32 %v166_v39  ;;  %v186_v45 = vsub.f32 0.0, %v166_v39 }
  0xa0   :  { %1312 = vtanh.f32 %v162_v42 }
  0xa1   :  { %v187_v46 = vmul.f32 1.442695, %v186_v45 }
  0xa3   :  { %1314 = vpow2.f32 %v187_v46 }
  0xa4   :  { %1316 = vpow2.f32 %v168_v48 }
  0xa5   :  { %v1311_v43 = vpop.eup %1310 }
  0xa6   :  { %220 = vrot.lane.b32.xlu0 %v1311_v43, %s1439_s3  ;;  %v1313_v44 = vpop.eup %1312 }
  0xa9   :  { %v1315_v49 = vpop.eup %1314 }
  0xaa   :  { %v189_v50 = vadd.f32 1.0, %v1315_v49  ;;  %v1317_v51 = vpop.eup %1316 }
  0xab   :  { %v170_v52 = vadd.f32 1.0, %v1317_v51 }
  0xac   :  { %1318 = vrcp.f32 %v189_v50  ;;  %v201_v61 = vand.u32 2147483648, %v189_v50  ;;  %vm195_vm2 = vweird.f32 %v189_v50  ;;  %v199_v62 = vand.u32 2147483647, %v189_v50 }
  0xad   :  { %1320 = vrcp.f32 %v170_v52  ;;  %vm176_vm5 = vweird.f32 %v170_v52  ;;  %v182_v13 = vand.u32 2147483648, %v170_v52  ;;  %v180_v23 = vand.u32 2147483647, %v170_v52 }
  0xae   :  { %209 = vrot.lane.b32.xlu0 %v1313_v44, %s1439_s3  ;;  %v202_v1 = vor.u32 1.1754944e-38, %v201_v61  ;;  %vm200_vm4 = vcmp.eq.f32.partialorder %v199_v62, 8.507059e+37 }
  0xaf   :  { %v183_v24 = vor.u32 1.1754944e-38, %v182_v13  ;;  %vm181_vm8 = vcmp.eq.f32.partialorder %v180_v23, 8.507059e+37 }
  0xb2   :  { %v1319_v53 = vpop.eup %1318 }
  0xb3   :  { %v191_v54 = vmul.f32 %v1319_v53, %v189_v50  ;;  %v1321_v56 = vpop.eup %1320  ;;  %vm196_vm1 = vweird.f32 %v1319_v53 }
  0xb4   :  { %v172_v58 = vmul.f32 %v1321_v56, %v170_v52  ;;  %vm197_vm3 = vmor %vm195_vm2, %vm196_vm1  ;;  %vm177_vm6 = vweird.f32 %v1321_v56 }
  0xb5   :  { %v192_v55 = vsub.f32 1.0, %v191_v54  ;;  %vm178_vm7 = vmor %vm176_vm5, %vm177_vm6 }
  0xb6   :  { %v173_v60 = vsub.f32 1.0, %v172_v58 }
  0xb7   :  { %v193_v57 = vmul.f32 %v1319_v53, %v192_v55 }
  0xb8   :  { %v174_v0 = vmul.f32 %v1321_v56, %v173_v60 }
  0xb9   :  { %v194_v59 = vadd.f32 %v1319_v53, %v193_v57 }
  0xba   :  { %v175_v22 = vadd.f32 %v1321_v56, %v174_v0 }
  0xbb   :  { %v198_v63 = vsel %vm197_vm3, %v1319_v53, %v194_v59 }
  0xbc   :  { %v203_v11 = vsel %vm200_vm4, %v202_v1, %v198_v63  ;;  %v179_v25 = vsel %vm178_vm7, %v1321_v56, %v175_v22  ;;  %vm399_vm4 = vcmask 261124  }
  0xbd   :  { %v184_v27 = vsel %vm181_vm8, %v183_v24, %v179_v25  ;;  %v218_v31 = vmul.f32 0.0, %v203_v11 }
  0xbe   :  { %v207_v35 = vmul.f32 0.0, %v184_v27 }
 0x118   :  { %v221_v2 = vpop.permute.xlu0 %220 }
 0x119   :  { %v223_v15 = vmul.f32 %v221_v2, %v203_v11 }
 0x11b   :  { %225 = vrot.lane.b32.xlu1 %v223_v15, %s1440_s10 }
 0x120   :  { %v210_v26 = vpop.permute.xlu0 %209 }
 0x121   :  { %v212_v29 = vmul.f32 %v210_v26, %v184_v27 }
 0x123   :  { %214 = vrot.lane.b32.xlu1 %v212_v29, %s1440_s10 }
 0x18d   :  { %v226_v33 = vpop.permute.xlu1 %225 }
 0x18e   :  { %v1680_v34 = vadd.f32 %v226_v33, %v218_v31 }
 0x190   :  { %1322 = vtanh.f32 %v1680_v34 }
 0x195   :  { %v215_v38 = vpop.permute.xlu1 %214 }
 0x196   :  { %v1323_v39 = vpop.eup %1322  ;;  %v1683_v41 = vadd.f32 %v215_v38, %v207_v35 }
 0x197   :  { %237 = vrot.lane.b32.xlu2 %v1323_v39, %s1439_s3 }
 0x198   :  { %1324 = vtanh.f32 %v1683_v41 }
 0x19e   :  { %v1325_v42 = vpop.eup %1324 }
 0x19f   :  { %231 = vrot.lane.b32.xlu2 %v1325_v42, %s1439_s3 }
 0x1f1   :  { %v238_v43 = vpop.permute.xlu2 %237 }
 0x1f2   :  { %v1688_v44 = vmul.f32 %v238_v43, %v203_v11 }
 0x1f4   :  { %v246_v45 = vrot.slane %v1688_v44, 4 }
 0x1f6   :  { %247 = vrot.lane.b32.xlu1 %v246_v45, %s1439_s3 }
 0x1f9   :  { %v232_v46 = vpop.permute.xlu2 %231 }
 0x1fa   :  { %v234_v47 = vmul.f32 %v232_v46, %v184_v27 }
 0x1fc   :  { %242 = vrot.lane.b32.xlu0 %v234_v47, %s1440_s10 }
 0x268   :  { %v248_v48 = vpop.permute.xlu1 %247 }
 0x26e   :  { %v243_v49 = vpop.permute.xlu0 %242 }
 0x26f   :  { %v251_v50 = vsel %vm250_vm9, %v243_v49, %v248_v48  ;;  %253 = vst.msk [vmem:[%s2009_s4] sm:$0xf] %vm252_vm10, %v243_v49  ;;  %v363_v49 = vrot.slane %v1680_v34, 4 }
 0x270   :  { %1280 = vmatmul.msk.f32.vlgmr.msrb.gmra.mxu2 %vm118_vm11, %v251_v50  ;;  %1281 = vmatmul.msk.f32.vlgmr.msrb.gmra.mxu3 %vm118_vm11, %v251_v50  ;;  %v349_v50 = vrot.slane %v1683_v41, 4 }
 0x271   :  { %853 = vmatpush.msrb.mxu2 %v1478_v3  ;;  %873 = vmatpush.msrb.mxu3 %v1488_v5 }
 0x273   :  { %854 = vmatpush.msrb.mxu2 %v1483_v4  ;;  %874 = vmatpush.msrb.mxu3 %v1495_v6 }
 0x275   :  { %855 = vmatpush.msrb.mxu2 %v1500_v7  ;;  %875 = vmatpush.msrb.mxu3 %v1507_v8 }
 0x277   :  { %856 = vmatpush.msrb.mxu2 %v1513_v9  ;;  %876 = vmatpush.msrb.mxu3 %v1520_v10 }
 0x279   :  { %857 = vmatpush.msrb.mxu2 %v1529_v12  ;;  %877 = vmatpush.msrb.mxu3 %v1538_v14 }
 0x27b   :  { %858 = vmatpush.msrb.mxu2 %v1548_v16  ;;  %878 = vmatpush.msrb.mxu3 %v1554_v17 }
 0x27d   :  { %859 = vmatpush.msrb.mxu2 %v1561_v18  ;;  %879 = vmatpush.msrb.mxu3 %v1569_v19 }
 0x27f   :  { %860 = vmatpush.msrb.mxu2 %v1575_v20  ;;  %880 = vmatpush.msrb.mxu3 %v1582_v21 }
 0x2f3   :  { %v280_v51 = vpop.f32.mrf.mxu2  ;;  %v300_v52 = vpop.f32.mrf.mxu3 }
 0x2f4   :  { %v304_v53 = vrot.slane %v280_v51, 4  ;;  %v307_v54 = vadd.f32 %v300_v52, %v1669_v37 }
 0x2f6   :  { %v306_v55 = vadd.f32 %v304_v53, %v1673_v40  ;;  %1326 = vtanh.f32 %v307_v54  ;;  %v327_v58 = vsub.f32 0.0, %v307_v54 }
 0x2f8   :  { %1328 = vtanh.f32 %v306_v55  ;;  %v328_v59 = vmul.f32 1.442695, %v327_v58  ;;  %v308_v62 = vsub.f32 0.0, %v306_v55 }
 0x2fa   :  { %1330 = vpow2.f32 %v328_v59  ;;  %v309_v0 = vmul.f32 1.442695, %v308_v62 }
 0x2fc   :  { %v1327_v56 = vpop.eup %1326 }
 0x2fd   :  { %367 = vrot.lane.b32.xlu2 %v1327_v56, %s1439_s3 }
 0x2fe   :  { %v1329_v57 = vpop.eup %1328 }
 0x2ff   :  { %353 = vrot.lane.b32.xlu0 %v1329_v57, %s1439_s3 }
 0x300   :  { %v1331_v60 = vpop.eup %1330 }
 0x301   :  { %v330_v61 = vadd.f32 1.0, %v1331_v60 }
 0x303   :  { %1332 = vrcp.f32 %v330_v61  ;;  %v342_v15 = vand.u32 2147483648, %v330_v61  ;;  %vm336_vm13 = vweird.f32 %v330_v61  ;;  %v340_v22 = vand.u32 2147483647, %v330_v61 }
 0x304   :  { %1334 = vpow2.f32 %v309_v0 }
 0x305   :  { %v343_v24 = vor.u32 1.1754944e-38, %v342_v15  ;;  %vm341_vm15 = vcmp.eq.f32.partialorder %v340_v22, 8.507059e+37 }
 0x309   :  { %v1333_v63 = vpop.eup %1332 }
 0x30a   :  { %v332_v37 = vmul.f32 %v1333_v63, %v330_v61  ;;  %v1335_v2 = vpop.eup %1334  ;;  %vm337_vm12 = vweird.f32 %v1333_v63 }
 0x30b   :  { %v311_v13 = vadd.f32 1.0, %v1335_v2  ;;  %vm338_vm14 = vmor %vm336_vm13, %vm337_vm12 }
 0x30c   :  { %v333_v40 = vsub.f32 1.0, %v332_v37 }
 0x30d   :  { %1336 = vrcp.f32 %v311_v13  ;;  %v323_v39 = vand.u32 2147483648, %v311_v13  ;;  %vm317_vm1 = vweird.f32 %v311_v13  ;;  %v321_v42 = vand.u32 2147483647, %v311_v13 }
 0x30e   :  { %v334_v1 = vmul.f32 %v1333_v63, %v333_v40  ;;  %v64_v40 = vpop.f32.mrf.mxu0 }
 0x30f   :  { %v324_v45 = vor.u32 1.1754944e-38, %v323_v39  ;;  %vm322_vm3 = vcmp.eq.f32.partialorder %v321_v42, 8.507059e+37 }
 0x310   :  { %v335_v11 = vadd.f32 %v1333_v63, %v334_v1 }
 0x312   :  { %v339_v23 = vsel %vm338_vm14, %v1333_v63, %v335_v11  ;;  %v1765_v11 = vadd.f32 %v64_v40, %v1667_v36 }
 0x313   :  { %v344_v26 = vsel %vm341_vm15, %v343_v24, %v339_v23  ;;  %v1337_v29 = vpop.eup %1336 }
 0x314   :  { %v313_v31 = vmul.f32 %v1337_v29, %v311_v13  ;;  %vm318_vm0 = vweird.f32 %v1337_v29  ;;  %v365_v51 = vmul.f32 %v363_v49, %v344_v26 }
 0x315   :  { %vm319_vm2 = vmor %vm317_vm1, %vm318_vm0 }
 0x316   :  { %v314_v33 = vsub.f32 1.0, %v313_v31  ;;  %v1760_v1 = vpop.f32.mrf.mxu0 }
 0x318   :  { %v315_v35 = vmul.f32 %v1337_v29, %v314_v33 }
 0x31a   :  { %v316_v38 = vadd.f32 %v1337_v29, %v315_v35 }
 0x31c   :  { %v320_v43 = vsel %vm319_vm2, %v1337_v29, %v316_v38 }
 0x31d   :  { %v325_v47 = vsel %vm322_vm3, %v324_v45, %v320_v43 }
 0x31e   :  { %v351_v54 = vmul.f32 %v349_v50, %v325_v47  ;;  %v1762_v2 = vpop.f32.mrf.mxu0 }
 0x357   :  { %v368_v25 = vpop.permute.xlu2 %367 }
 0x358   :  { %v370_v27 = vmul.f32 %v368_v25, %v344_v26 }
 0x35a   :  { %372 = vrot.lane.b32.xlu1 %v370_v27, %s1440_s10 }
 0x371   :  { %v354_v46 = vpop.permute.xlu0 %353 }
 0x372   :  { %v356_v48 = vmul.f32 %v354_v46, %v325_v47 }
 0x374   :  { %358 = vrot.lane.b32.xlu2 %v356_v48, %s1440_s10 }
 0x3cc   :  { %v373_v52 = vpop.permute.xlu1 %372 }
 0x3cd   :  { %v1724_v53 = vadd.f32 %v373_v52, %v365_v51 }
 0x3ce   :  { %v359_v55 = vpop.permute.xlu2 %358 }
 0x3cf   :  { %1338 = vtanh.f32 %v1724_v53  ;;  %v1727_v56 = vadd.f32 %v359_v55, %v351_v54 }
 0x3d1   :  { %1340 = vtanh.f32 %v1727_v56 }
 0x3d5   :  { %v1339_v57 = vpop.eup %1338 }
 0x3d6   :  { %384 = vrot.lane.b32.xlu0 %v1339_v57, %s1439_s3 }
 0x3d7   :  { %v1341_v58 = vpop.eup %1340 }
 0x3d8   :  { %378 = vrot.lane.b32.xlu1 %v1341_v58, %s1439_s3 }
 0x448   :  { %v385_v34 = vpop.permute.xlu0 %384 }
 0x449   :  { %v1732_v41 = vmul.f32 %v385_v34, %v344_v26 }
 0x44a   :  { %v379_v59 = vpop.permute.xlu1 %378 }
 0x44b   :  { %v393_v60 = vrot.slane %v1732_v41, 4  ;;  %v381_v61 = vmul.f32 %v379_v59, %v325_v47 }
 0x44d   :  { %394 = vrot.lane.b32.xlu0 %v393_v60, %s1439_s3  ;;  %389 = vrot.lane.b32.xlu2 %v381_v61, %s1440_s10 }
 0x4a7   :  { %v390_v62 = vpop.permute.xlu2 %389 }
 0x4a8   :  { %1282 = vst.msk [vmem:[%s2009_s4] sm:$0xf0] %vm399_vm4, %v390_v62 }
 0x4bf   :  { %v395_v63 = vpop.permute.xlu0 %394 }
 0x4c0   :  { %v397_v0 = vsel %vm250_vm9, %v390_v62, %v395_v63 }
 0x4c1   :  { %v408_v37 = vrot.slane %v397_v0, 4 }
 0x4c3   :  { %1284 = vmatmul.msk.f32.vlgmr.msrb.gmra.mxu0 %vm118_vm11, %v408_v37  ;;  %1285 = vmatmul.msk.f32.vlgmr.msrb.gmra.mxu1 %vm118_vm11, %v408_v37 }
 0x4c4   :  { %997 = vmatpush.msrb.mxu0 %v1478_v3  ;;  %1017 = vmatpush.msrb.mxu1 %v1488_v5 }
 0x4c6   :  { %998 = vmatpush.msrb.mxu0 %v1483_v4  ;;  %1018 = vmatpush.msrb.mxu1 %v1495_v6 }
 0x4c8   :  { %999 = vmatpush.msrb.mxu0 %v1500_v7  ;;  %1019 = vmatpush.msrb.mxu1 %v1507_v8 }
 0x4ca   :  { %1000 = vmatpush.msrb.mxu0 %v1513_v9  ;;  %1020 = vmatpush.msrb.mxu1 %v1520_v10 }
 0x4cc   :  { %1001 = vmatpush.msrb.mxu0 %v1529_v12  ;;  %1021 = vmatpush.msrb.mxu1 %v1538_v14 }
 0x4ce   :  { %1002 = vmatpush.msrb.mxu0 %v1548_v16  ;;  %1022 = vmatpush.msrb.mxu1 %v1554_v17 }
 0x4d0   :  { %1003 = vmatpush.msrb.mxu0 %v1561_v18  ;;  %1023 = vmatpush.msrb.mxu1 %v1569_v19 }
 0x4d2   :  { %1004 = vmatpush.msrb.mxu0 %v1575_v20  ;;  %1024 = vmatpush.msrb.mxu1 %v1582_v21 }
 0x540   :  { %v428_v13 = vpop.f32.mrf.mxu0  ;;  %v448_v15 = vpop.f32.mrf.mxu1 }
 0x541   :  { %v451_v22 = vadd.f32 %v428_v13, %v1765_v11  ;;  %v453_v23 = vrot.slane %v448_v15, 4 }
 0x543   :  { %1342 = vtanh.f32 %v451_v22  ;;  %v455_v24 = vadd.f32 %v453_v23, %v1665_v32  ;;  %v456_v27 = vsub.f32 0.0, %v451_v22  ;;  %v497_v22 = vrot.slane %v1727_v56, 4 }
 0x545   :  { %1344 = vtanh.f32 %v455_v24  ;;  %v457_v29 = vmul.f32 1.442695, %v456_v27  ;;  %v475_v35 = vsub.f32 0.0, %v455_v24  ;;  %v511_v27 = vrot.slane %v1724_v53, 4 }
 0x547   :  { %1346 = vpow2.f32 %v457_v29  ;;  %v476_v39 = vmul.f32 1.442695, %v475_v35 }
 0x549   :  { %v1343_v25 = vpop.eup %1342 }
 0x54a   :  { %501 = vrot.lane.b32.xlu2 %v1343_v25, %s1439_s3 }
 0x54b   :  { %v1345_v26 = vpop.eup %1344 }
 0x54c   :  { %515 = vrot.lane.b32.xlu1 %v1345_v26, %s1439_s3 }
 0x54d   :  { %v1347_v31 = vpop.eup %1346 }
 0x54e   :  { %v459_v33 = vadd.f32 1.0, %v1347_v31 }
 0x550   :  { %1348 = vrcp.f32 %v459_v33  ;;  %v471_v49 = vand.u32 2147483648, %v459_v33  ;;  %vm465_vm6 = vweird.f32 %v459_v33  ;;  %v469_v50 = vand.u32 2147483647, %v459_v33 }
 0x551   :  { %1350 = vpow2.f32 %v476_v39 }
 0x552   :  { %v472_v52 = vor.u32 1.1754944e-38, %v471_v49  ;;  %vm470_vm8 = vcmp.eq.f32.partialorder %v469_v50, 8.507059e+37 }
 0x556   :  { %v1349_v38 = vpop.eup %1348 }
 0x557   :  { %v461_v42 = vmul.f32 %v1349_v38, %v459_v33  ;;  %v1351_v46 = vpop.eup %1350  ;;  %vm466_vm5 = vweird.f32 %v1349_v38 }
 0x558   :  { %v478_v48 = vadd.f32 1.0, %v1351_v46  ;;  %vm467_vm7 = vmor %vm465_vm6, %vm466_vm5 }
 0x559   :  { %v462_v43 = vsub.f32 1.0, %v461_v42 }
 0x55a   :  { %1352 = vrcp.f32 %v478_v48  ;;  %v490_v62 = vand.u32 2147483648, %v478_v48  ;;  %vm484_vm13 = vweird.f32 %v478_v48  ;;  %v488_v63 = vand.u32 2147483647, %v478_v48 }
 0x55b   :  { %v463_v45 = vmul.f32 %v1349_v38, %v462_v43 }
 0x55c   :  { %v491_v37 = vor.u32 1.1754944e-38, %v490_v62  ;;  %vm489_vm15 = vcmp.eq.f32.partialorder %v488_v63, 8.507059e+37 }
 0x55d   :  { %v464_v47 = vadd.f32 %v1349_v38, %v463_v45 }
 0x55f   :  { %v468_v51 = vsel %vm467_vm7, %v1349_v38, %v464_v47 }
 0x560   :  { %v473_v55 = vsel %vm470_vm8, %v472_v52, %v468_v51  ;;  %v1353_v58 = vpop.eup %1352 }
 0x561   :  { %v480_v34 = vmul.f32 %v1353_v58, %v478_v48  ;;  %vm485_vm12 = vweird.f32 %v1353_v58  ;;  %v499_v23 = vmul.f32 %v497_v22, %v473_v55 }
 0x562   :  { %vm486_vm14 = vmor %vm484_vm13, %vm485_vm12 }
 0x563   :  { %v481_v59 = vsub.f32 1.0, %v480_v34 }
 0x565   :  { %v482_v60 = vmul.f32 %v1353_v58, %v481_v59 }
 0x567   :  { %v483_v61 = vadd.f32 %v1353_v58, %v482_v60 }
 0x569   :  { %v487_v0 = vsel %vm486_vm14, %v1353_v58, %v483_v61 }
 0x56a   :  { %v492_v13 = vsel %vm489_vm15, %v491_v37, %v487_v0 }
 0x56b   :  { %v513_v29 = vmul.f32 %v511_v27, %v492_v13 }
 0x5a4   :  { %v502_v54 = vpop.permute.xlu2 %501 }
 0x5a5   :  { %v504_v57 = vmul.f32 %v502_v54, %v473_v55 }
 0x5a7   :  { %506 = vrot.lane.b32.xlu1 %v504_v57, %s1440_s10 }
 0x5be   :  { %v516_v40 = vpop.permute.xlu1 %515 }
 0x5bf   :  { %v518_v15 = vmul.f32 %v516_v40, %v492_v13 }
 0x5c1   :  { %520 = vrot.lane.b32.xlu0 %v518_v15, %s1440_s10 }
 0x619   :  { %v507_v24 = vpop.permute.xlu1 %506 }
 0x61a   :  { %v1774_v25 = vadd.f32 %v507_v24, %v499_v23 }
 0x61c   :  { %1354 = vtanh.f32 %v1774_v25 }
 0x622   :  { %v1355_v26 = vpop.eup %1354 }
 0x623   :  { %526 = vrot.lane.b32.xlu0 %v1355_v26, %s1439_s3 }
 0x633   :  { %v521_v31 = vpop.permute.xlu0 %520 }
 0x634   :  { %v1779_v33 = vadd.f32 %v521_v31, %v513_v29  ;;  %v642_v29 = vrot.slane %v1774_v25, 4 }
 0x636   :  { %1356 = vtanh.f32 %v1779_v33  ;;  %v656_v22 = vrot.slane %v1779_v33, 4 }
 0x63c   :  { %v1357_v35 = vpop.eup %1356 }
 0x63d   :  { %532 = vrot.lane.b32.xlu2 %v1357_v35, %s1439_s3 }
 0x695   :  { %v527_v56 = vpop.permute.xlu0 %526 }
 0x696   :  { %v529_v38 = vmul.f32 %v527_v56, %v473_v55 }
 0x697   :  { %v533_v39 = vpop.permute.xlu2 %532 }
 0x698   :  { %v1783_v42 = vmul.f32 %v533_v39, %v492_v13  ;;  %537 = vrot.lane.b32.xlu1 %v529_v38, %s1440_s10 }
 0x69a   :  { %v541_v43 = vrot.slane %v1783_v42, 4 }
 0x69c   :  { %542 = vrot.lane.b32.xlu2 %v541_v43, %s1439_s3 }
 0x6f6   :  { %v543_v53 = vpop.permute.xlu2 %542 }
 0x70a   :  { %v538_v45 = vpop.permute.xlu1 %537 }
 0x70b   :  { %v545_v46 = vsel %vm250_vm9, %v538_v45, %v543_v53  ;;  %1286 = vst.msk [vmem:[%s2009_s4 + $0x8] sm:$0xf] %vm252_vm10, %v538_v45 }
 0x70c   :  { %1288 = vmatmul.msk.f32.vlgmr.msra.gmra.mxu2 %vm118_vm11, %v545_v46  ;;  %1289 = vmatmul.msk.f32.vlgmr.msra.gmra.mxu3 %vm118_vm11, %v545_v46 }
 0x70d   :  { %1140 = vmatpush.msra.mxu2 %v1478_v3  ;;  %1160 = vmatpush.msra.mxu3 %v1488_v5 }
 0x70f   :  { %1141 = vmatpush.msra.mxu2 %v1483_v4  ;;  %1161 = vmatpush.msra.mxu3 %v1495_v6 }
 0x711   :  { %1142 = vmatpush.msra.mxu2 %v1500_v7  ;;  %1162 = vmatpush.msra.mxu3 %v1507_v8 }
 0x713   :  { %1143 = vmatpush.msra.mxu2 %v1513_v9  ;;  %1163 = vmatpush.msra.mxu3 %v1520_v10 }
 0x715   :  { %1144 = vmatpush.msra.mxu2 %v1529_v12  ;;  %1164 = vmatpush.msra.mxu3 %v1538_v14 }
 0x717   :  { %1145 = vmatpush.msra.mxu2 %v1548_v16  ;;  %1165 = vmatpush.msra.mxu3 %v1554_v17 }
 0x719   :  { %1146 = vmatpush.msra.mxu2 %v1561_v18  ;;  %1166 = vmatpush.msra.mxu3 %v1569_v19 }
 0x71b   :  { %1147 = vmatpush.msra.mxu2 %v1575_v20  ;;  %1167 = vmatpush.msra.mxu3 %v1582_v21 }
 0x78f   :  { %v573_v3 = vpop.f32.mrf.mxu2  ;;  %v593_v4 = vpop.f32.mrf.mxu3 }
 0x790   :  { %v597_v5 = vrot.slane %v573_v3, 4  ;;  %v600_v6 = vadd.f32 %v593_v4, %v1665_v32 }
 0x792   :  { %v599_v7 = vadd.f32 %v597_v5, %v1765_v11  ;;  %1358 = vtanh.f32 %v600_v6  ;;  %v620_v10 = vsub.f32 0.0, %v600_v6  ;;  %v1841_v5 = vadd.f32 %v1760_v1, %v1667_v36 }
 0x794   :  { %1360 = vtanh.f32 %v599_v7  ;;  %v601_v12 = vsub.f32 0.0, %v599_v7  ;;  %v621_v14 = vmul.f32 1.442695, %v620_v10 }
 0x796   :  { %v602_v16 = vmul.f32 1.442695, %v601_v12  ;;  %1362 = vpow2.f32 %v621_v14 }
 0x798   :  { %v1359_v8 = vpop.eup %1358  ;;  %1364 = vpow2.f32 %v602_v16 }
 0x799   :  { %660 = vrot.lane.b32.xlu0 %v1359_v8, %s1439_s3 }
 0x79a   :  { %v1361_v9 = vpop.eup %1360 }
 0x79b   :  { %646 = vrot.lane.b32.xlu1 %v1361_v9, %s1439_s3 }
 0x79c   :  { %v1363_v17 = vpop.eup %1362 }
 0x79d   :  { %v623_v19 = vadd.f32 1.0, %v1363_v17 }
 0x79e   :  { %v1365_v18 = vpop.eup %1364 }
 0x79f   :  { %v604_v20 = vadd.f32 1.0, %v1365_v18  ;;  %1366 = vrcp.f32 %v623_v19  ;;  %v635_v54 = vand.u32 2147483648, %v623_v19  ;;  %vm629_vm1 = vweird.f32 %v623_v19 }
 0x7a0   :  { %v633_v55 = vand.u32 2147483647, %v623_v19 }
 0x7a1   :  { %1368 = vrcp.f32 %v604_v20  ;;  %v616_v58 = vand.u32 2147483648, %v604_v20  ;;  %vm610_vm5 = vweird.f32 %v604_v20  ;;  %v614_v59 = vand.u32 2147483647, %v604_v20 }
 0x7a2   :  { %v636_v60 = vor.u32 1.1754944e-38, %v635_v54  ;;  %vm634_vm7 = vcmp.eq.f32.partialorder %v633_v55, 8.507059e+37 }
 0x7a3   :  { %v617_v0 = vor.u32 1.1754944e-38, %v616_v58  ;;  %vm615_vm8 = vcmp.eq.f32.partialorder %v614_v59, 8.507059e+37 }
 0x7a5   :  { %v1367_v21 = vpop.eup %1366 }
 0x7a6   :  { %v625_v11 = vmul.f32 %v1367_v21, %v623_v19  ;;  %vm630_vm0 = vweird.f32 %v1367_v21 }
 0x7a7   :  { %v1369_v32 = vpop.eup %1368  ;;  %vm631_vm3 = vmor %vm629_vm1, %vm630_vm0 }
 0x7a8   :  { %v606_v47 = vmul.f32 %v1369_v32, %v604_v20  ;;  %v626_v48 = vsub.f32 1.0, %v625_v11  ;;  %vm611_vm2 = vweird.f32 %v1369_v32 }
 0x7a9   :  { %vm612_vm6 = vmor %vm610_vm5, %vm611_vm2 }
 0x7aa   :  { %v607_v49 = vsub.f32 1.0, %v606_v47  ;;  %v627_v50 = vmul.f32 %v1367_v21, %v626_v48 }
 0x7ac   :  { %v608_v51 = vmul.f32 %v1369_v32, %v607_v49  ;;  %v628_v52 = vadd.f32 %v1367_v21, %v627_v50 }
 0x7ae   :  { %v609_v57 = vadd.f32 %v1369_v32, %v608_v51  ;;  %v632_v34 = vsel %vm631_vm3, %v1367_v21, %v628_v52 }
 0x7af   :  { %v637_v63 = vsel %vm634_vm7, %v636_v60, %v632_v34 }
 0x7b0   :  { %v613_v61 = vsel %vm612_vm6, %v1369_v32, %v609_v57  ;;  %v658_v23 = vmul.f32 %v656_v22, %v637_v63 }
 0x7b1   :  { %v618_v13 = vsel %vm615_vm8, %v617_v0, %v613_v61 }
 0x7b2   :  { %v644_v31 = vmul.f32 %v642_v29, %v618_v13 }
 0x80b   :  { %v661_v62 = vpop.permute.xlu0 %660 }
 0x80c   :  { %v663_v37 = vmul.f32 %v661_v62, %v637_v63 }
 0x80d   :  { %v647_v40 = vpop.permute.xlu1 %646 }
 0x80e   :  { %v649_v15 = vmul.f32 %v647_v40, %v618_v13  ;;  %665 = vrot.lane.b32.xlu2 %v663_v37, %s1440_s10 }
 0x810   :  { %651 = vrot.lane.b32.xlu0 %v649_v15, %s1440_s10 }
 0x868   :  { %v666_v24 = vpop.permute.xlu2 %665 }
 0x869   :  { %v1818_v26 = vadd.f32 %v666_v24, %v658_v23 }
 0x86b   :  { %1370 = vtanh.f32 %v1818_v26 }
 0x871   :  { %v1371_v27 = vpop.eup %1370 }
 0x872   :  { %677 = vrot.lane.b32.xlu1 %v1371_v27, %s1439_s3  ;;  %v802_v27 = vrot.slane %v1818_v26, 4 }
 0x882   :  { %v652_v35 = vpop.permute.xlu0 %651 }
 0x883   :  { %v1823_v56 = vadd.f32 %v652_v35, %v644_v31 }
 0x885   :  { %1372 = vtanh.f32 %v1823_v56  ;;  %v788_v24 = vrot.slane %v1823_v56, 4 }
 0x88b   :  { %v1373_v38 = vpop.eup %1372 }
 0x88c   :  { %671 = vrot.lane.b32.xlu2 %v1373_v38, %s1439_s3 }
 0x8e4   :  { %v678_v33 = vpop.permute.xlu1 %677 }
 0x8e5   :  { %v1827_v39 = vmul.f32 %v678_v33, %v637_v63 }
 0x8e6   :  { %v672_v43 = vpop.permute.xlu2 %671 }
 0x8e7   :  { %v686_v53 = vrot.slane %v1827_v39, 4  ;;  %v674_v45 = vmul.f32 %v672_v43, %v618_v13 }
 0x8e9   :  { %687 = vrot.lane.b32.xlu1 %v686_v53, %s1439_s3  ;;  %682 = vrot.lane.b32.xlu0 %v674_v45, %s1440_s10 }
 0x95b   :  { %v688_v25 = vpop.permute.xlu1 %687  ;;  %v683_v46 = vpop.permute.xlu0 %682 }
 0x95c   :  { %v690_v3 = vsel %vm250_vm9, %v683_v46, %v688_v25  ;;  %1290 = vst.msk [vmem:[%s2009_s4 + $0x8] sm:$0xf0] %vm399_vm4, %v683_v46 }
 0x95d   :  { %v699_v4 = vrot.slane %v690_v3, 4 }
 0x95f   :  { %1292 = vmatmul.msk.f32.vlgmr.msra.gmra.mxu0 %vm118_vm11, %v699_v4  ;;  %1293 = vmatmul.msk.f32.vlgmr.msra.gmra.mxu1 %vm118_vm11, %v699_v4 }
 0x9dc   :  { %v719_v6 = vpop.f32.mrf.mxu0  ;;  %v739_v7 = vpop.f32.mrf.mxu1 }
 0x9dd   :  { %v742_v8 = vadd.f32 %v719_v6, %v1841_v5  ;;  %v744_v9 = vrot.slane %v739_v7, 4 }
 0x9df   :  { %1374 = vtanh.f32 %v742_v8  ;;  %v746_v10 = vadd.f32 %v744_v9, %v1663_v30  ;;  %v747_v19 = vsub.f32 0.0, %v742_v8 }
 0x9e1   :  { %1376 = vtanh.f32 %v746_v10  ;;  %v766_v16 = vsub.f32 0.0, %v746_v10  ;;  %v748_v20 = vmul.f32 1.442695, %v747_v19 }
 0x9e3   :  { %v767_v17 = vmul.f32 1.442695, %v766_v16 }
 0x9e5   :  { %v1375_v12 = vpop.eup %1374  ;;  %1378 = vpow2.f32 %v767_v17 }
 0x9e6   :  { %792 = vrot.lane.b32.xlu0 %v1375_v12, %s1439_s3 }
 0x9e7   :  { %v1377_v14 = vpop.eup %1376 }
 0x9e8   :  { %806 = vrot.lane.b32.xlu2 %v1377_v14, %s1439_s3 }
 0x9eb   :  { %v1379_v1 = vpop.eup %1378 }
 0x9ec   :  { %v769_v18 = vadd.f32 1.0, %v1379_v1 }
 0x9ee   :  { %1380 = vrcp.f32 %v769_v18  ;;  %v781_v51 = vand.u32 2147483648, %v769_v18  ;;  %vm775_vm13 = vweird.f32 %v769_v18  ;;  %v779_v52 = vand.u32 2147483647, %v769_v18 }
 0x9ef   :  { %1382 = vpow2.f32 %v748_v20 }
 0x9f0   :  { %v782_v55 = vor.u32 1.1754944e-38, %v781_v51  ;;  %vm780_vm15 = vcmp.eq.f32.partialorder %v779_v52, 8.507059e+37 }
 0x9f4   :  { %v1381_v21 = vpop.eup %1380 }
 0x9f5   :  { %v771_v32 = vmul.f32 %v1381_v21, %v769_v18  ;;  %v1383_v47 = vpop.eup %1382  ;;  %vm776_vm12 = vweird.f32 %v1381_v21 }
 0x9f6   :  { %v750_v49 = vadd.f32 1.0, %v1383_v47  ;;  %vm777_vm14 = vmor %vm775_vm13, %vm776_vm12 }
 0x9f7   :  { %v772_v11 = vsub.f32 1.0, %v771_v32 }
 0x9f8   :  { %1384 = vrcp.f32 %v750_v49  ;;  %v762_v0 = vand.u32 2147483648, %v750_v49  ;;  %vm756_vm1 = vweird.f32 %v750_v49  ;;  %v760_v37 = vand.u32 2147483647, %v750_v49 }
 0x9f9   :  { %v773_v48 = vmul.f32 %v1381_v21, %v772_v11 }
 0x9fa   :  { %v763_v13 = vor.u32 1.1754944e-38, %v762_v0  ;;  %vm761_vm3 = vcmp.eq.f32.partialorder %v760_v37, 8.507059e+37 }
 0x9fb   :  { %v774_v50 = vadd.f32 %v1381_v21, %v773_v48 }
 0x9fd   :  { %v778_v54 = vsel %vm777_vm14, %v1381_v21, %v774_v50 }
 0x9fe   :  { %v1385_v57 = vpop.eup %1384  ;;  %v783_v34 = vsel %vm780_vm15, %v782_v55, %v778_v54 }
 0x9ff   :  { %v752_v60 = vmul.f32 %v1385_v57, %v750_v49  ;;  %vm757_vm0 = vweird.f32 %v1385_v57  ;;  %v804_v38 = vmul.f32 %v802_v27, %v783_v34 }
 0xa00   :  { %vm758_vm2 = vmor %vm756_vm1, %vm757_vm0 }
 0xa01   :  { %v753_v61 = vsub.f32 1.0, %v752_v60 }
 0xa03   :  { %v754_v62 = vmul.f32 %v1385_v57, %v753_v61 }
 0xa05   :  { %v755_v63 = vadd.f32 %v1385_v57, %v754_v62 }
 0xa07   :  { %v759_v40 = vsel %vm758_vm2, %v1385_v57, %v755_v63 }
 0xa08   :  { %v764_v22 = vsel %vm761_vm3, %v763_v13, %v759_v40 }
 0xa09   :  { %v790_v29 = vmul.f32 %v788_v24, %v764_v22 }
 0xa42   :  { %v807_v58 = vpop.permute.xlu2 %806 }
 0xa43   :  { %v809_v59 = vmul.f32 %v807_v58, %v783_v34 }
 0xa45   :  { %811 = vrot.lane.b32.xlu1 %v809_v59, %s1440_s10 }
 0xa58   :  { %v793_v15 = vpop.permute.xlu0 %792 }
 0xa59   :  { %v795_v23 = vmul.f32 %v793_v15, %v764_v22 }
 0xa5b   :  { %797 = vrot.lane.b32.xlu2 %v795_v23, %s1440_s10 }
 0xab5   :  { %v798_v31 = vpop.permute.xlu2 %797 }
 0xab6   :  { %v1851_v35 = vadd.f32 %v798_v31, %v790_v29 }
 0xab7   :  { %v812_v33 = vpop.permute.xlu1 %811 }
 0xab8   :  { %1386 = vtanh.f32 %v1851_v35  ;;  %v1854_v43 = vadd.f32 %v812_v33, %v804_v38  ;;  %v931_v24 = vrot.slane %v1851_v35, 4 }
 0xaba   :  { %1388 = vtanh.f32 %v1854_v43  ;;  %v945_v33 = vrot.slane %v1854_v43, 4 }
 0xabe   :  { %v1387_v53 = vpop.eup %1386 }
 0xabf   :  { %817 = vrot.lane.b32.xlu1 %v1387_v53, %s1439_s3 }
 0xac0   :  { %v1389_v45 = vpop.eup %1388 }
 0xac1   :  { %823 = vrot.lane.b32.xlu0 %v1389_v45, %s1439_s3 }
 0xb31   :  { %v818_v56 = vpop.permute.xlu1 %817 }
 0xb32   :  { %v820_v26 = vmul.f32 %v818_v56, %v764_v22 }
 0xb33   :  { %v824_v25 = vpop.permute.xlu0 %823 }
 0xb34   :  { %v1859_v46 = vmul.f32 %v824_v25, %v783_v34  ;;  %828 = vrot.lane.b32.xlu2 %v820_v26, %s1440_s10 }
 0xb36   :  { %v832_v3 = vrot.slane %v1859_v46, 4 }
 0xb38   :  { %833 = vrot.lane.b32.xlu0 %v832_v3, %s1439_s3 }
 0xb8e   :  { %v1864_v4 = vpop.permute.xlu2 %828 }
 0xbaa   :  { %v834_v6 = vpop.permute.xlu0 %833 }
 0xbab   :  { %v836_v7 = vsel %vm250_vm9, %v1864_v4, %v834_v6 }
 0xbac   :  { %1296 = vmatmul.msk.f32.vlgmr.msrb.gmra.mxu2 %vm118_vm11, %v836_v7  ;;  %1297 = vmatmul.msk.f32.vlgmr.msrb.gmra.mxu3 %vm118_vm11, %v836_v7 }
 0xc2f   :  { %v862_v8 = vpop.f32.mrf.mxu2  ;;  %v882_v9 = vpop.f32.mrf.mxu3 }
 0xc30   :  { %v886_v10 = vrot.slane %v862_v8, 4  ;;  %v889_v12 = vadd.f32 %v882_v9, %v1663_v30 }
 0xc32   :  { %v888_v14 = vadd.f32 %v886_v10, %v1841_v5  ;;  %1390 = vtanh.f32 %v889_v12  ;;  %v909_v21 = vsub.f32 0.0, %v889_v12  ;;  %v1899_v12 = vadd.f32 %v1762_v2, %v1667_v36 }
 0xc34   :  { %1392 = vtanh.f32 %v888_v14  ;;  %v890_v1 = vsub.f32 0.0, %v888_v14  ;;  %v910_v32 = vmul.f32 1.442695, %v909_v21 }
 0xc36   :  { %v891_v18 = vmul.f32 1.442695, %v890_v1 }
 0xc38   :  { %v1391_v16 = vpop.eup %1390  ;;  %1394 = vpow2.f32 %v891_v18 }
 0xc39   :  { %949 = vrot.lane.b32.xlu1 %v1391_v16, %s1439_s3 }
 0xc3a   :  { %v1393_v17 = vpop.eup %1392 }
 0xc3b   :  { %935 = vrot.lane.b32.xlu2 %v1393_v17, %s1439_s3 }
 0xc3e   :  { %v1395_v19 = vpop.eup %1394 }
 0xc3f   :  { %v893_v20 = vadd.f32 1.0, %v1395_v19 }
 0xc41   :  { %1396 = vrcp.f32 %v893_v20  ;;  %v905_v51 = vand.u32 2147483648, %v893_v20  ;;  %vm899_vm6 = vweird.f32 %v893_v20  ;;  %v903_v52 = vand.u32 2147483647, %v893_v20 }
 0xc42   :  { %1398 = vpow2.f32 %v910_v32 }
 0xc43   :  { %v906_v55 = vor.u32 1.1754944e-38, %v905_v51  ;;  %vm904_vm8 = vcmp.eq.f32.partialorder %v903_v52, 8.507059e+37 }
 0xc47   :  { %v1397_v11 = vpop.eup %1396 }
 0xc48   :  { %v895_v30 = vmul.f32 %v1397_v11, %v893_v20  ;;  %v1399_v47 = vpop.eup %1398  ;;  %vm900_vm5 = vweird.f32 %v1397_v11 }
 0xc49   :  { %v912_v49 = vadd.f32 1.0, %v1399_v47  ;;  %vm901_vm7 = vmor %vm899_vm6, %vm900_vm5 }
 0xc4a   :  { %v896_v5 = vsub.f32 1.0, %v895_v30 }
 0xc4b   :  { %1400 = vrcp.f32 %v912_v49  ;;  %v924_v0 = vand.u32 2147483648, %v912_v49  ;;  %vm918_vm13 = vweird.f32 %v912_v49  ;;  %v922_v37 = vand.u32 2147483647, %v912_v49 }
 0xc4c   :  { %v897_v48 = vmul.f32 %v1397_v11, %v896_v5 }
 0xc4d   :  { %v925_v13 = vor.u32 1.1754944e-38, %v924_v0  ;;  %vm923_vm15 = vcmp.eq.f32.partialorder %v922_v37, 8.507059e+37 }
 0xc4e   :  { %v898_v50 = vadd.f32 %v1397_v11, %v897_v48 }
 0xc50   :  { %v902_v54 = vsel %vm901_vm7, %v1397_v11, %v898_v50 }
 0xc51   :  { %v1401_v57 = vpop.eup %1400  ;;  %v907_v34 = vsel %vm904_vm8, %v906_v55, %v902_v54 }
 0xc52   :  { %v914_v60 = vmul.f32 %v1401_v57, %v912_v49  ;;  %vm919_vm12 = vweird.f32 %v1401_v57  ;;  %v933_v27 = vmul.f32 %v931_v24, %v907_v34 }
 0xc53   :  { %vm920_vm14 = vmor %vm918_vm13, %vm919_vm12 }
 0xc54   :  { %v915_v61 = vsub.f32 1.0, %v914_v60 }
 0xc56   :  { %v916_v62 = vmul.f32 %v1401_v57, %v915_v61 }
 0xc58   :  { %v917_v63 = vadd.f32 %v1401_v57, %v916_v62 }
 0xc5a   :  { %v921_v40 = vsel %vm920_vm14, %v1401_v57, %v917_v63 }
 0xc5b   :  { %v926_v22 = vsel %vm923_vm15, %v925_v13, %v921_v40 }
 0xc5c   :  { %v947_v53 = vmul.f32 %v945_v33, %v926_v22 }
 0xc95   :  { %v936_v58 = vpop.permute.xlu2 %935 }
 0xc96   :  { %v938_v59 = vmul.f32 %v936_v58, %v907_v34 }
 0xc98   :  { %940 = vrot.lane.b32.xlu1 %v938_v59, %s1440_s10 }
 0xcab   :  { %v950_v15 = vpop.permute.xlu1 %949 }
 0xcac   :  { %v952_v23 = vmul.f32 %v950_v15, %v926_v22 }
 0xcae   :  { %954 = vrot.lane.b32.xlu0 %v952_v23, %s1440_s10 }
 0xd0a   :  { %v941_v29 = vpop.permute.xlu1 %940 }
 0xd0b   :  { %v1877_v31 = vadd.f32 %v941_v29, %v933_v27 }
 0xd0d   :  { %1402 = vtanh.f32 %v1877_v31 }
 0xd13   :  { %v1403_v38 = vpop.eup %1402 }
 0xd14   :  { %960 = vrot.lane.b32.xlu0 %v1403_v38, %s1439_s3 }
 0xd20   :  { %v955_v45 = vpop.permute.xlu0 %954 }
 0xd21   :  { %v1882_v56 = vadd.f32 %v955_v45, %v947_v53 }
 0xd23   :  { %1404 = vtanh.f32 %v1882_v56  ;;  %v1089_v29 = vrot.slane %v1882_v56, 4 }
 0xd29   :  { %v1405_v26 = vpop.eup %1404 }
 0xd2a   :  { %966 = vrot.lane.b32.xlu2 %v1405_v26, %s1439_s3  ;;  %v1075_v26 = vrot.slane %v1877_v31, 4 }
 0xd84   :  { %v967_v35 = vpop.permute.xlu2 %966 }
 0xd85   :  { %v1886_v25 = vmul.f32 %v967_v35, %v926_v22 }
 0xd86   :  { %v961_v3 = vpop.permute.xlu0 %960 }
 0xd87   :  { %v975_v6 = vrot.slane %v1886_v25, 4  ;;  %v963_v7 = vmul.f32 %v961_v3, %v907_v34 }
 0xd89   :  { %976 = vrot.lane.b32.xlu2 %v975_v6, %s1439_s3  ;;  %971 = vrot.lane.b32.xlu1 %v963_v7, %s1440_s10 }
 0xde3   :  { %v977_v43 = vpop.permute.xlu2 %976 }
 0xdfb   :  { %v1891_v8 = vpop.permute.xlu1 %971 }
 0xdfc   :  { %v979_v9 = vsel %vm250_vm9, %v1891_v8, %v977_v43 }
 0xdfd   :  { %v986_v10 = vrot.slane %v979_v9, 4 }
 0xdff   :  { %1300 = vmatmul.msk.f32.vlgmr.msrb.gmra.mxu0 %vm118_vm11, %v986_v10  ;;  %1301 = vmatmul.msk.f32.vlgmr.msrb.gmra.mxu1 %vm118_vm11, %v986_v10 }
 0xe7c   :  { %v1006_v14 = vpop.f32.mrf.mxu0  ;;  %v1026_v16 = vpop.f32.mrf.mxu1 }
 0xe7d   :  { %v1029_v17 = vadd.f32 %v1006_v14, %v1899_v12  ;;  %v1031_v1 = vrot.slane %v1026_v16, 4 }
 0xe7f   :  { %1406 = vtanh.f32 %v1029_v17  ;;  %v1033_v18 = vadd.f32 %v1031_v1, %v1661_v28  ;;  %v1034_v21 = vsub.f32 0.0, %v1029_v17 }
 0xe81   :  { %1408 = vtanh.f32 %v1033_v18  ;;  %v1053_v32 = vsub.f32 0.0, %v1033_v18  ;;  %v1035_v11 = vmul.f32 1.442695, %v1034_v21 }
 0xe83   :  { %v1054_v36 = vmul.f32 1.442695, %v1053_v32  ;;  %1410 = vpow2.f32 %v1035_v11 }
 0xe85   :  { %v1407_v19 = vpop.eup %1406  ;;  %1412 = vpow2.f32 %v1054_v36 }
 0xe86   :  { %1079 = vrot.lane.b32.xlu1 %v1407_v19, %s1439_s3 }
 0xe87   :  { %v1409_v20 = vpop.eup %1408 }
 0xe88   :  { %1093 = vrot.lane.b32.xlu0 %v1409_v20, %s1439_s3 }
 0xe89   :  { %v1411_v2 = vpop.eup %1410 }
 0xe8a   :  { %v1037_v5 = vadd.f32 1.0, %v1411_v2 }
 0xe8b   :  { %v1413_v30 = vpop.eup %1412 }
 0xe8c   :  { %v1056_v47 = vadd.f32 1.0, %v1413_v30  ;;  %1414 = vrcp.f32 %v1037_v5  ;;  %v1049_v34 = vand.u32 2147483648, %v1037_v5  ;;  %vm1043_vm1 = vweird.f32 %v1037_v5 }
 0xe8d   :  { %v1047_v59 = vand.u32 2147483647, %v1037_v5 }
 0xe8e   :  { %1416 = vrcp.f32 %v1056_v47  ;;  %v1068_v61 = vand.u32 2147483648, %v1056_v47  ;;  %vm1062_vm5 = vweird.f32 %v1056_v47  ;;  %v1066_v63 = vand.u32 2147483647, %v1056_v47 }
 0xe8f   :  { %v1050_v0 = vor.u32 1.1754944e-38, %v1049_v34  ;;  %vm1048_vm7 = vcmp.eq.f32.partialorder %v1047_v59, 8.507059e+37 }
 0xe90   :  { %v1069_v15 = vor.u32 1.1754944e-38, %v1068_v61  ;;  %vm1067_vm8 = vcmp.eq.f32.partialorder %v1066_v63, 8.507059e+37 }
 0xe92   :  { %v1415_v48 = vpop.eup %1414 }
 0xe93   :  { %v1039_v50 = vmul.f32 %v1415_v48, %v1037_v5  ;;  %vm1044_vm0 = vweird.f32 %v1415_v48 }
 0xe94   :  { %v1417_v49 = vpop.eup %1416  ;;  %vm1045_vm3 = vmor %vm1043_vm1, %vm1044_vm0 }
 0xe95   :  { %v1058_v51 = vmul.f32 %v1417_v49, %v1056_v47  ;;  %v1040_v52 = vsub.f32 1.0, %v1039_v50  ;;  %vm1063_vm2 = vweird.f32 %v1417_v49 }
 0xe96   :  { %vm1064_vm6 = vmor %vm1062_vm5, %vm1063_vm2  ;;  %vm258_vm2 = vcmask 523524  }
 0xe97   :  { %v1059_v54 = vsub.f32 1.0, %v1058_v51  ;;  %v1041_v55 = vmul.f32 %v1415_v48, %v1040_v52 }
 0xe99   :  { %v1060_v57 = vmul.f32 %v1417_v49, %v1059_v54  ;;  %v1042_v58 = vadd.f32 %v1415_v48, %v1041_v55 }
 0xe9b   :  { %v1061_v60 = vadd.f32 %v1417_v49, %v1060_v57  ;;  %v1046_v62 = vsel %vm1045_vm3, %v1415_v48, %v1042_v58  ;;  %vm405_vm3 = vcmask 519424  }
 0xe9c   :  { %v1051_v13 = vsel %vm1048_vm7, %v1050_v0, %v1046_v62 }
 0xe9d   :  { %v1065_v37 = vsel %vm1064_vm6, %v1417_v49, %v1061_v60  ;;  %v1077_v35 = vmul.f32 %v1075_v26, %v1051_v13 }
 0xe9e   :  { %v1070_v24 = vsel %vm1067_vm8, %v1069_v15, %v1065_v37 }
 0xe9f   :  { %v1091_v38 = vmul.f32 %v1089_v29, %v1070_v24 }
 0xef8   :  { %v1080_v40 = vpop.permute.xlu1 %1079 }
 0xef9   :  { %v1082_v22 = vmul.f32 %v1080_v40, %v1051_v13 }
 0xefa   :  { %v1094_v23 = vpop.permute.xlu0 %1093 }
 0xefb   :  { %v1096_v27 = vmul.f32 %v1094_v23, %v1070_v24  ;;  %1084 = vrot.lane.b32.xlu0 %v1082_v22, %s1440_s10 }
 0xefd   :  { %1098 = vrot.lane.b32.xlu2 %v1096_v27, %s1440_s10 }
 0xf57   :  { %v1099_v33 = vpop.permute.xlu2 %1098 }
 0xf58   :  { %v1908_v53 = vadd.f32 %v1099_v33, %v1091_v38 }
 0xf5a   :  { %1418 = vtanh.f32 %v1908_v53  ;;  %v1232_v38 = vrot.slane %v1908_v53, 4 }
 0xf60   :  { %v1419_v45 = vpop.eup %1418 }
 0xf61   :  { %1110 = vrot.lane.b32.xlu1 %v1419_v45, %s1439_s3 }
 0xf6d   :  { %v1085_v3 = vpop.permute.xlu0 %1084 }
 0xf6e   :  { %v1913_v6 = vadd.f32 %v1085_v3, %v1077_v35 }
 0xf70   :  { %1420 = vtanh.f32 %v1913_v6  ;;  %v1218_v33 = vrot.slane %v1913_v6, 4 }
 0xf76   :  { %v1421_v7 = vpop.eup %1420 }
 0xf77   :  { %1104 = vrot.lane.b32.xlu2 %v1421_v7, %s1439_s3 }
 0xfd1   :  { %v1105_v56 = vpop.permute.xlu2 %1104 }
 0xfd2   :  { %v1107_v43 = vmul.f32 %v1105_v56, %v1051_v13 }
 0xfd3   :  { %v1111_v9 = vpop.permute.xlu1 %1110 }
 0xfd4   :  { %v1917_v10 = vmul.f32 %v1111_v9, %v1070_v24  ;;  %1115 = vrot.lane.b32.xlu0 %v1107_v43, %s1440_s10 }
 0xfd6   :  { %v1119_v14 = vrot.slane %v1917_v10, 4 }
 0xfd8   :  { %1120 = vrot.lane.b32.xlu1 %v1119_v14, %s1439_s3 }
0x1046   :  { %v1922_v31 = vpop.permute.xlu0 %1115 }
0x104a   :  { %v1121_v16 = vpop.permute.xlu1 %1120 }
0x104b   :  { %v1123_v17 = vsel %vm250_vm9, %v1922_v31, %v1121_v16 }
0x104c   :  { %1304 = vmatmul.msk.f32.vlgmr.msra.gmra.mxu2 %vm118_vm11, %v1123_v17  ;;  %1305 = vmatmul.msk.f32.vlgmr.msra.gmra.mxu3 %vm118_vm11, %v1123_v17 }
0x10cf   :  { %v1149_v1 = vpop.f32.mrf.mxu2  ;;  %v1169_v18 = vpop.f32.mrf.mxu3 }
0x10d0   :  { %v1173_v19 = vrot.slane %v1149_v1, 4  ;;  %v1176_v20 = vadd.f32 %v1169_v18, %v1661_v28 }
0x10d2   :  { %v1175_v21 = vadd.f32 %v1173_v19, %v1899_v12  ;;  %1422 = vtanh.f32 %v1176_v20  ;;  %v1196_v47 = vsub.f32 0.0, %v1176_v20 }
0x10d4   :  { %1424 = vtanh.f32 %v1175_v21  ;;  %v1177_v36 = vsub.f32 0.0, %v1175_v21  ;;  %v1197_v48 = vmul.f32 1.442695, %v1196_v47 }
0x10d6   :  { %v1178_v2 = vmul.f32 1.442695, %v1177_v36 }
0x10d8   :  { %v1423_v32 = vpop.eup %1422  ;;  %1426 = vpow2.f32 %v1178_v2 }
0x10d9   :  { %1236 = vrot.lane.b32.xlu0 %v1423_v32, %s1439_s3 }
0x10da   :  { %v1425_v11 = vpop.eup %1424 }
0x10db   :  { %1222 = vrot.lane.b32.xlu2 %v1425_v11, %s1439_s3 }
0x10de   :  { %v1427_v30 = vpop.eup %1426 }
0x10df   :  { %v1180_v5 = vadd.f32 1.0, %v1427_v30 }
0x10e1   :  { %1428 = vrcp.f32 %v1180_v5  ;;  %v1192_v55 = vand.u32 2147483648, %v1180_v5  ;;  %vm1186_vm11 = vweird.f32 %v1180_v5  ;;  %v1190_v57 = vand.u32 2147483647, %v1180_v5 }
0x10e2   :  { %1430 = vpow2.f32 %v1197_v48 }
0x10e3   :  { %v1193_v34 = vor.u32 1.1754944e-38, %v1192_v55  ;;  %vm1191_vm13 = vcmp.eq.f32.partialorder %v1190_v57, 8.507059e+37 }
0x10e7   :  { %v1429_v49 = vpop.eup %1428 }
0x10e8   :  { %v1182_v28 = vmul.f32 %v1429_v49, %v1180_v5  ;;  %v1431_v50 = vpop.eup %1430  ;;  %vm1187_vm9 = vweird.f32 %v1429_v49 }
0x10e9   :  { %v1199_v52 = vadd.f32 1.0, %v1431_v50  ;;  %vm1188_vm12 = vmor %vm1186_vm11, %vm1187_vm9 }
0x10ea   :  { %v1183_v12 = vsub.f32 1.0, %v1182_v28 }
0x10eb   :  { %1432 = vrcp.f32 %v1199_v52  ;;  %v1211_v13 = vand.u32 2147483648, %v1199_v52  ;;  %vm1205_vm15 = vweird.f32 %v1199_v52  ;;  %v1209_v15 = vand.u32 2147483647, %v1199_v52 }
0x10ec   :  { %v1184_v51 = vmul.f32 %v1429_v49, %v1183_v12 }
0x10ed   :  { %v1212_v23 = vor.u32 1.1754944e-38, %v1211_v13  ;;  %vm1210_vm1 = vcmp.eq.f32.partialorder %v1209_v15, 8.507059e+37 }
0x10ee   :  { %v1185_v54 = vadd.f32 %v1429_v49, %v1184_v51 }
0x10f0   :  { %v1189_v58 = vsel %vm1188_vm12, %v1429_v49, %v1185_v54 }
0x10f1   :  { %v1433_v59 = vpop.eup %1432  ;;  %v1194_v61 = vsel %vm1191_vm13, %v1193_v34, %v1189_v58 }
0x10f2   :  { %v1201_v63 = vmul.f32 %v1433_v59, %v1199_v52  ;;  %vm1206_vm14 = vweird.f32 %v1433_v59  ;;  %v1220_v3 = vmul.f32 %v1218_v33, %v1194_v61 }
0x10f3   :  { %vm1207_vm0 = vmor %vm1205_vm15, %vm1206_vm14 }
0x10f4   :  { %v1202_v0 = vsub.f32 1.0, %v1201_v63 }
0x10f6   :  { %v1203_v37 = vmul.f32 %v1433_v59, %v1202_v0 }
0x10f8   :  { %v1204_v40 = vadd.f32 %v1433_v59, %v1203_v37 }
0x10fa   :  { %v1208_v22 = vsel %vm1207_vm0, %v1433_v59, %v1204_v40 }
0x10fb   :  { %v1213_v27 = vsel %vm1210_vm1, %v1212_v23, %v1208_v22 }
0x10fc   :  { %v1234_v45 = vmul.f32 %v1232_v38, %v1213_v27 }
0x1135   :  { %v1223_v60 = vpop.permute.xlu2 %1222 }
0x1136   :  { %v1225_v62 = vmul.f32 %v1223_v60, %v1194_v61 }
0x1138   :  { %1227 = vrot.lane.b32.xlu1 %v1225_v62, %s1440_s10 }
0x114b   :  { %v1237_v24 = vpop.permute.xlu0 %1236 }
0x114c   :  { %v1239_v29 = vmul.f32 %v1237_v24, %v1213_v27 }
0x114e   :  { %1241 = vrot.lane.b32.xlu2 %v1239_v29, %s1440_s10 }
0x1156   :  { %254 = vrot.lane.b32.xlu2 %v1688_v44, %s1439_s3 }
0x115e   :  { %693 = vrot.lane.b32.xlu2 %v1827_v39, %s1439_s3 }
0x1166   :  { %1125 = vrot.lane.b32.xlu2 %v1917_v10, %s1439_s3 }
0x11a8   :  { %v1242_v26 = vpop.permute.xlu2 %1241 }
0x11a9   :  { %v1244_v35 = vadd.f32 %v1242_v26, %v1234_v45 }
0x11aa   :  { %v1228_v7 = vpop.permute.xlu1 %1227 }
0x11ab   :  { %1434 = vtanh.f32 %v1244_v35  ;;  %v1230_v56 = vadd.f32 %v1228_v7, %v1220_v3 }
0x11ad   :  { %1436 = vtanh.f32 %v1230_v56 }
0x11b0   :  { %v255_v44 = vpop.permute.xlu2 %254 }
0x11b1   :  { %v1435_v43 = vpop.eup %1434  ;;  %1279 = vst.msk [vmem:[%s2009_s4 + $0x18] sm:$0xf0] %vm258_vm2, %v255_v44 }
0x11b2   :  { %1253 = vrot.lane.b32.xlu1 %v1435_v43, %s1439_s3 }
0x11b3   :  { %v1437_v39 = vpop.eup %1436 }
0x11b4   :  { %1247 = vrot.lane.b32.xlu0 %v1437_v39, %s1439_s3 }
0x11b8   :  { %v694_v53 = vpop.permute.xlu2 %693 }
0x11b9   :  { %1291 = vst.msk [vmem:[%s2009_s4 + $0x10] sm:$0xf] %vm405_vm3, %v694_v53 }
0x11ba   :  { %1294 = vst.msk [vmem:[%s2009_s4 + $0x10] sm:$0xf] %vm252_vm10, %v1864_v4  ;;  %548 = vrot.lane.b32.xlu1 %v1783_v42, %s1439_s3 }
0x11bc   :  { %401 = vrot.lane.b32.xlu0 %v1732_v41, %s1439_s3 }
0x11c0   :  { %v1126_v6 = vpop.permute.xlu2 %1125 }
0x11c1   :  { %1303 = vst.msk [vmem:[%s2009_s4] sm:$0xf0] %vm258_vm2, %v1126_v6 }
0x11c2   :  { %981 = vrot.lane.b32.xlu1 %v1886_v25, %s1439_s3 }
0x11c4   :  { %838 = vrot.lane.b32.xlu0 %v1859_v46, %s1439_s3 }
0x1224   :  { %v1254_v9 = vpop.permute.xlu1 %1253 }
0x1225   :  { %v1256_v4 = vmul.f32 %v1254_v9, %v1213_v27 }
0x1226   :  { %v1248_v10 = vpop.permute.xlu0 %1247 }
0x1227   :  { %v1250_v14 = vmul.f32 %v1248_v10, %v1194_v61  ;;  %1263 = vrot.lane.b32.xlu1 %v1256_v4, %s1439_s3 }
0x1229   :  { %1258 = vrot.lane.b32.xlu0 %v1250_v14, %s1440_s10 }
0x122c   :  { %v549_v41 = vpop.permute.xlu1 %548 }
0x122d   :  { %1287 = vst.msk [vmem:[%s2009_s4 + $0x10] sm:$0xf0] %vm258_vm2, %v549_v41 }
0x122e   :  { %1298 = vst.msk [vmem:[%s2009_s4 + $0x10] sm:$0xf0] %vm399_vm4, %v1891_v8  ;;  %v402_v42 = vpop.permute.xlu0 %401 }
0x122f   :  { %1283 = vst.msk [vmem:[%s2009_s4 + $0x18] sm:$0xf] %vm405_vm3, %v402_v42 }
0x1230   :  { %1302 = vst.msk [vmem:[%s2009_s4 + $0x18] sm:$0xf] %vm252_vm10, %v1922_v31 }
0x1234   :  { %v982_v46 = vpop.permute.xlu1 %981 }
0x1235   :  { %1299 = vst.msk [vmem:[%s2009_s4 + $0x8] sm:$0xf] %vm405_vm3, %v982_v46 }
0x1236   :  { %v839_v25 = vpop.permute.xlu0 %838 }
0x1237   :  { %1295 = vst.msk [vmem:[%s2009_s4 + $0x8] sm:$0xf0] %vm258_vm2, %v839_v25 }
0x1299   :  { %v1264_v8 = vpop.permute.xlu1 %1263 }
0x129a   :  { %1266 = vst.msk [vmem:[%s2009_s4] sm:$0xf] %vm405_vm3, %v1264_v8 }
0x129b   :  { %v1259_v16 = vpop.permute.xlu0 %1258 }
0x129c   :  { %1306 = vst.msk [vmem:[%s2009_s4 + $0x18] sm:$0xf0] %vm399_vm4, %v1259_v16 }

</bundles_post_ra>
